<compile_context>
chip_gen: v7x
topology: tpu7x:2x2x1
jax: 0.10.0
libtpu: 0.0.40
codegen_flags: <defaults>
</compile_context>

<pallas_src>
import functools
import math

import jax
import jax.numpy as jnp
from jax.experimental import pallas as pl
from jax.experimental.pallas import tpu as pltpu

# ----------------------- tiny synthetic model config -----------------------
B, S = 2, 8            # batch, sequence
D = 128                # hidden size            (multiple of 128 -> lane-dense)
H = 4                  # attention heads
KV_H = 2               # key/value heads (GQA, like Qwen2.5)
DH = D // H            # head dim
I = 256                # MLP intermediate (SwiGLU)
V = 128                # vocab size             (multiple of 128 -> lane-dense)
L = 2                  # decoder layers
EPS = 1e-6
ROPE_THETA = 1e6
PARAM_DTYPE = jnp.bfloat16
APPROX_SOFTMAX_RECIP = True    # set False when diffing against an fp32 reference

QKV_N = (H + 2 * KV_H) * DH    # fused q|k|v output width


# --------------------- single-buffered constant blocks ----------------------

def _supports_buffered_one() -> bool:
    """pl.Buffered(1) on constant-index blocks removes pointless double
    buffering of the biggest VMEM consumers (matters most on v7x's 64 MiB).
    Feature-detect so the script still runs if this JAX build rejects it."""
    try:
        def k(x_ref, o_ref):
            o_ref[...] = x_ref[...] + 1.0

        x = jnp.zeros((8, 128), jnp.float32)
        out = pl.pallas_call(
            k,
            out_shape=jax.ShapeDtypeStruct((16, 128), jnp.float32),
            grid=(2,),
            in_specs=[pl.BlockSpec((8, 128), lambda i: (0, 0),
                                   pipeline_mode=pl.Buffered(1))],
            out_specs=pl.BlockSpec((8, 128), lambda i: (i, 0)),
        )(x)
        jax.block_until_ready(out)
        return True
    except Exception:
        return False


_BUFFERED_ONE = _supports_buffered_one()


def _const_spec(block_shape):
    """BlockSpec for a block whose index_map is constant over the whole grid."""
    block_shape = tuple(block_shape)
    idx = lambda *_: (0,) * len(block_shape)
    if _BUFFERED_ONE:
        return pl.BlockSpec(block_shape, idx, pipeline_mode=pl.Buffered(1))
    return pl.BlockSpec(block_shape, idx)


def _row_tile(m, min_steps=2):
    # largest multiple-of-8 row tile that still gives >= min_steps grid steps
    # (so v7x's two TensorCores both get work); fall back to full m.
    for t in (512, 256, 128, 64, 32, 16, 8):
        if m % t == 0 and m // t >= min_steps:
            return t
    return m


# ------------------------------ Pallas kernels ------------------------------

def _rmsnorm_f32(x_ref, g_ref):
    """fp32 RMSNorm (v5e has no bf16 VPU/EUP); returns (fp32 residual, normed)."""
    x = x_ref[...].astype(jnp.float32)
    var = jnp.mean(x * x, axis=-1, keepdims=True)
    return x, (x * jax.lax.rsqrt(var + EPS)) * g_ref[...].astype(jnp.float32)


def _attn_block_kernel(x_ref, g_ref, wqkv_ref, bqkv_ref, cos_ref, sin_ref,
                       wo_ref, o_ref, *, num_heads, num_kv_heads, approx_recip):
    """One full pre-norm attention block for one batch element:
    ln1 -> fused QKV(+bias) -> RoPE -> GQA causal attention -> o_proj -> +res."""
    seq = x_ref.shape[0]
    dh = cos_ref.shape[-1]
    rep = num_heads // num_kv_heads
    scale = 1.0 / math.sqrt(dh)

    # --- ln1 + fused QKV projection (+bias); bf16 straight into the MXU -----
    x_res, xn = _rmsnorm_f32(x_ref, g_ref)
    qkv = jnp.dot(xn.astype(wqkv_ref.dtype), wqkv_ref[...],
                  preferred_element_type=jnp.float32)
    qkv = qkv + bqkv_ref[...].astype(jnp.float32)              # (seq, QKV_N) f32

    # --- RoPE fused into the projection epilogue; cos/sin broadcast hoisted --
    cos = cos_ref[...].astype(jnp.float32)[:, None, :]          # (seq, 1, dh)
    sin = sin_ref[...].astype(jnp.float32)[:, None, :]

    def rope(t):                                                 # (seq, h, dh)
        t1, t2 = t[..., : dh // 2], t[..., dh // 2:]
        return t * cos + jnp.concatenate([-t2, t1], axis=-1) * sin

    nq, nkv = num_heads * dh, num_kv_heads * dh
    q = qkv[:, :nq].reshape(seq, num_heads, dh)
    k = qkv[:, nq:nq + nkv].reshape(seq, num_kv_heads, dh)
    v = qkv[:, nq + nkv:].reshape(seq, num_kv_heads, dh)

    q = (rope(q) * scale).astype(wqkv_ref.dtype)   # scale folded into q, not S*S scores
    k = rope(k).astype(wqkv_ref.dtype)
    v = v.astype(wqkv_ref.dtype)

    # --- GQA causal attention: head-major batched einsums, no Python head
    #     loops; K/V shared in-VMEM (never duplicated through HBM). ----------
    # TODO(synk): at real S this must be a flash-style kernel (KV tiling,
    # online-softmax m/l/acc scratch, pl.when init/finalize).
    qh = jnp.transpose(q, (1, 0, 2))                             # (H, seq, dh)
    kh = jnp.transpose(
        jnp.broadcast_to(k[:, :, None, :], (seq, num_kv_heads, rep, dh)
                         ).reshape(seq, num_heads, dh), (1, 0, 2))
    vh = jnp.transpose(
        jnp.broadcast_to(v[:, :, None, :], (seq, num_kv_heads, rep, dh)
                         ).reshape(seq, num_heads, dh), (1, 0, 2))

    s = jnp.einsum('hqd,hkd->hqk', qh, kh,
                   preferred_element_type=jnp.float32)           # (H, seq, seq)
    row = jax.lax.broadcasted_iota(jnp.int32, (seq, seq), 0)
    col = jax.lax.broadcasted_iota(jnp.int32, (seq, seq), 1)
    s = jnp.where((col <= row)[None], s, jnp.finfo(s.dtype).min)  # dtype-derived fill
    s = s - jnp.max(s, axis=-1, keepdims=True)
    p = jnp.exp(s)
    denom = jnp.sum(p, axis=-1, keepdims=True)
    if approx_recip:
        p = p * pl.reciprocal(denom, approx=True)   # EUP slot, off the VPU path
    else:
        p = p / denom

    ctx = jnp.einsum('hqk,hkd->hqd', p.astype(vh.dtype), vh,
                     preferred_element_type=jnp.float32)         # (H, seq, dh)
    ctx = jnp.transpose(ctx, (1, 0, 2)).reshape(seq, num_heads * dh)

    # --- o_proj + residual fused in the epilogue -----------------------------
    out = jnp.dot(ctx.astype(wo_ref.dtype), wo_ref[...],
                  preferred_element_type=jnp.float32)
    o_ref[...] = (x_res + out).astype(o_ref.dtype)


def _mlp_block_kernel(x_ref, g_ref, wgu_ref, wd_ref, o_ref):
    """One full pre-norm MLP block: ln2 -> fused gate|up -> SwiGLU -> down -> +res."""
    x_res, xn = _rmsnorm_f32(x_ref, g_ref)
    gu = jnp.dot(xn.astype(wgu_ref.dtype), wgu_ref[...],
                 preferred_element_type=jnp.float32)             # (tm, 2I) f32
    inter = wd_ref.shape[0]
    gate, up = gu[:, :inter], gu[:, inter:]
    h = (gate * jax.nn.sigmoid(gate) * up).astype(wd_ref.dtype)  # SwiGLU, bf16
    y = jnp.dot(h, wd_ref[...], preferred_element_type=jnp.float32)
    o_ref[...] = (x_res + y).astype(o_ref.dtype)


def _norm_lm_head_kernel(x_ref, g_ref, w_ref, o_ref):
    """Final RMSNorm fused into lm_head; fp32 logits like HF."""
    _, xn = _rmsnorm_f32(x_ref, g_ref)
    o_ref[...] = jnp.dot(xn.astype(w_ref.dtype), w_ref[...],
                         preferred_element_type=jnp.float32).astype(o_ref.dtype)


# ------------------------------ call wrappers --------------------------------

def attn_block(x, gamma, w_qkv, b_qkv, cos, sin, wo, *, seq_len,
               num_heads, num_kv_heads):
    m, d = x.shape
    batch = m // seq_len
    qkv_n = w_qkv.shape[1]
    kernel = functools.partial(_attn_block_kernel, num_heads=num_heads,
                               num_kv_heads=num_kv_heads,
                               approx_recip=APPROX_SOFTMAX_RECIP)
    return pl.pallas_call(
        kernel,
        out_shape=jax.ShapeDtypeStruct((m, d), x.dtype),
        grid=(batch,),
        in_specs=[pl.BlockSpec((seq_len, d), lambda b: (b, 0)),
                  _const_spec((1, d)),
                  _const_spec(w_qkv.shape),
                  _const_spec((1, qkv_n)),
                  _const_spec(cos.shape),
                  _const_spec(sin.shape),
                  _const_spec(wo.shape)],
        out_specs=pl.BlockSpec((seq_len, d), lambda b: (b, 0)),
        input_output_aliases={0: 0},              # residual written in place
        compiler_params=pltpu.CompilerParams(dimension_semantics=("parallel",)),
    )(x, gamma.reshape(1, d), w_qkv, b_qkv.reshape(1, qkv_n), cos, sin, wo)


def mlp_block(x, gamma, w_gateup, w_down):
    m, d = x.shape
    tm = _row_tile(m)
    return pl.pallas_call(
        _mlp_block_kernel,
        out_shape=jax.ShapeDtypeStruct((m, d), x.dtype),
        grid=(m // tm,),
        in_specs=[pl.BlockSpec((tm, d), lambda i: (i, 0)),
                  _const_spec((1, d)),
                  _const_spec(w_gateup.shape),
                  _const_spec(w_down.shape)],
        out_specs=pl.BlockSpec((tm, d), lambda i: (i, 0)),
        input_output_aliases={0: 0},              # residual written in place
        compiler_params=pltpu.CompilerParams(dimension_semantics=("parallel",)),
    )(x, gamma.reshape(1, d), w_gateup, w_down)


def norm_lm_head(x, gamma, w):
    m, d = x.shape
    n = w.shape[1]
    tm = _row_tile(m)
    ce = pl.CostEstimate(flops=2 * m * d * n, transcendentals=0,
                         bytes_accessed=m * d * 2 + d * n * 2 + m * n * 4)
    # TODO(synk): at real vocab (~152k) tile over N with an fp32 accumulator,
    # pl.Buffered(2-3) weight tiles and an explicit vmem_limit_bytes.
    return pl.pallas_call(
        _norm_lm_head_kernel,
        out_shape=jax.ShapeDtypeStruct((m, n), jnp.float32),
        grid=(m // tm,),
        in_specs=[pl.BlockSpec((tm, d), lambda i: (i, 0)),
                  _const_spec((1, d)),
                  _const_spec(w.shape)],
        out_specs=pl.BlockSpec((tm, n), lambda i: (i, 0)),
        compiler_params=pltpu.CompilerParams(dimension_semantics=("parallel",)),
        cost_estimate=ce,
    )(x, gamma.reshape(1, d), w)


# ------------------------------- JAX glue -----------------------------------

def rope_tables(seq_len, dim, theta=ROPE_THETA):
    inv = 1.0 / (theta ** (jnp.arange(0, dim, 2, dtype=jnp.float32) / dim))
    t = jnp.arange(seq_len, dtype=jnp.float32)
    freqs = jnp.outer(t, inv)                         # (S, dim/2)
    emb = jnp.concatenate([freqs, freqs], axis=-1)    # (S, dim)
    return jnp.cos(emb), jnp.sin(emb)


def init_params(key):
    def nrm(k, shape, scale=0.02):
        return (scale * jax.random.normal(k, shape, jnp.float32)).astype(PARAM_DTYPE)

    keys = jax.random.split(key, 2 + L)
    params = {
        'embed': nrm(keys[0], (V, D)),
        'ln_f': jnp.ones((D,), PARAM_DTYPE),
        'lm_head': nrm(keys[1], (D, V)),
        'layers': [],
    }
    for l in range(L):
        lk = jax.random.split(keys[2 + l], 5)
        params['layers'].append({
            'ln1': jnp.ones((D,), PARAM_DTYPE),
            'ln2': jnp.ones((D,), PARAM_DTYPE),
            'w_qkv': nrm(lk[0], (D, QKV_N)),   # fused wq|wk|wv
            'b_qkv': nrm(lk[1], (QKV_N,)),     # fused bq|bk|bv (Qwen2.5 QKV bias)
            'wo': nrm(lk[2], (H * DH, D)),     # o_proj (no bias in Qwen2.5)
            'w_gateup': nrm(lk[3], (D, 2 * I)),
            'w_down': nrm(lk[4], (I, D)),
        })
    return params


@jax.jit
def qwen_detection_forward(params, input_ids):
    """Equivalent of Qwen25VLWithDetection.forward after the detection-only
    keys are popped: base causal-LM -> logits."""
    # token-embedding gather stays in XLA (data-dependent gather).
    h = jnp.take(params['embed'], input_ids, axis=0)             # (B, S, D) bf16
    batch, seq = input_ids.shape
    cos, sin = rope_tables(seq, DH)
    x = h.reshape(batch * seq, D)

    for p in params['layers']:
        # attention block: ln1 + QKV + RoPE + GQA attn + o_proj + residual
        x = attn_block(x, p['ln1'], p['w_qkv'], p['b_qkv'], cos, sin, p['wo'],
                       seq_len=seq, num_heads=H, num_kv_heads=KV_H)
        # MLP block: ln2 + gate/up + SwiGLU + down_proj + residual
        x = mlp_block(x, p['ln2'], p['w_gateup'], p['w_down'])

    logits = norm_lm_head(x, params['ln_f'], params['lm_head'])
    return logits.reshape(batch, seq, V)


if __name__ == "__main__":
    key = jax.random.PRNGKey(0)
    pkey, ikey = jax.random.split(key)
    params = init_params(pkey)

    # synthetic model inputs (the wrapper's forward pops detection-only keys,
    # then feeds input_ids etc. to the base model)
    inputs = {
        'input_ids': jax.random.randint(ikey, (B, S), 0, V, dtype=jnp.int32),
        'ground_truth_objects': None,        # popped, exactly like the wrapper
        'image_counts_per_sample': None,     # popped, exactly like the wrapper
    }
    model_inputs = dict(inputs)
    model_inputs.pop('ground_truth_objects', None)
    model_inputs.pop('image_counts_per_sample', None)

    logits = qwen_detection_forward(params, model_inputs['input_ids'])
    jax.block_until_ready(logits)
    assert logits.shape == (B, S, V) and logits.dtype == jnp.float32
    assert bool(jnp.all(jnp.isfinite(logits)))
    print("KERNEL_OK")
</pallas_src>

<mosaic_0001>
module attributes {stable_mosaic.version = 11 : i64} {
  func.func @k(%arg0: i32, %arg1: memref<8x128xf32, #tpu.memory_space<vmem>>, %arg2: memref<8x128xf32, #tpu.memory_space<vmem>>) attributes {dimension_semantics = [#tpu.dimension_semantics<arbitrary>], iteration_bounds = array<i64: 2>, scalar_prefetch = 0 : i64, scratch_operands = 0 : i64, tpu.core_type = #tpu.core_type<tc>, window_params = [{pipeline_mode = #tpu.pipeline_mode<synchronous>, transform_indices = @transform_0, window_bounds = array<i64: 8, 128>}, {transform_indices = @transform_1, window_bounds = array<i64: 8, 128>}]} {
    %c0 = arith.constant 0 : index
    %c0_0 = arith.constant 0 : index
    %0 = vector.load %arg1[%c0, %c0_0] : memref<8x128xf32, #tpu.memory_space<vmem>>, vector<8x128xf32>
    %cst = arith.constant 1.000000e+00 : f32
    %1 = vector.broadcast %cst : f32 to vector<8x128xf32>
    %2 = arith.addf %0, %1 : vector<8x128xf32>
    %c0_1 = arith.constant 0 : index
    %c0_2 = arith.constant 0 : index
    %3 = vector.load %arg2[%c0_1, %c0_2] : memref<8x128xf32, #tpu.memory_space<vmem>>, vector<8x128xf32>
    tpu.vector_store %arg2[%c0_1, %c0_2], %2 {strides = array<i32>} : memref<8x128xf32, #tpu.memory_space<vmem>>, vector<8x128xf32>,
    return
  }
  func.func @transform_0(%arg0: i32) -> (i32, i32) {
    %c0_i32 = arith.constant 0 : i32
    %c0_i32_0 = arith.constant 0 : i32
    %c0_i32_1 = arith.constant 0 : i32
    return %c0_i32, %c0_i32_0 : i32, i32
  }
  func.func @transform_1(%arg0: i32) -> (i32, i32) {
    %c0_i32 = arith.constant 0 : i32
    %c0_i32_0 = arith.constant 0 : i32
    return %arg0, %c0_i32 : i32, i32
  }
}

module attributes {stable_mosaic.version = 11 : i64} {
  func.func @_attn_block_kernel(%arg0: i32, %arg1: memref<8x128xbf16, #tpu.memory_space<vmem>>, %arg2: memref<1x128xbf16, #tpu.memory_space<vmem>>, %arg3: memref<128x256xbf16, #tpu.memory_space<vmem>>, %arg4: memref<1x256xbf16, #tpu.memory_space<vmem>>, %arg5: memref<8x32xf32, #tpu.memory_space<vmem>>, %arg6: memref<8x32xf32, #tpu.memory_space<vmem>>, %arg7: memref<128x128xbf16, #tpu.memory_space<vmem>>, %arg8: memref<8x128xbf16, #tpu.memory_space<vmem>>) attributes {dimension_semantics = [#tpu.dimension_semantics<parallel>], iteration_bounds = array<i64: 2>, scalar_prefetch = 0 : i64, scratch_operands = 0 : i64, tpu.core_type = #tpu.core_type<tc>, window_params = [{transform_indices = @transform_0, window_bounds = array<i64: 8, 128>}, {pipeline_mode = #tpu.pipeline_mode<synchronous>, transform_indices = @transform_1, window_bounds = array<i64: 1, 128>}, {pipeline_mode = #tpu.pipeline_mode<synchronous>, transform_indices = @transform_2, window_bounds = array<i64: 128, 256>}, {pipeline_mode = #tpu.pipeline_mode<synchronous>, transform_indices = @transform_3, window_bounds = array<i64: 1, 256>}, {pipeline_mode = #tpu.pipeline_mode<synchronous>, transform_indices = @transform_4, window_bounds = array<i64: 8, 32>}, {pipeline_mode = #tpu.pipeline_mode<synchronous>, transform_indices = @transform_5, window_bounds = array<i64: 8, 32>}, {pipeline_mode = #tpu.pipeline_mode<synchronous>, transform_indices = @transform_6, window_bounds = array<i64: 128, 128>}, {transform_indices = @transform_7, window_bounds = array<i64: 8, 128>}]} {
    %c0 = arith.constant 0 : index
    %c0_0 = arith.constant 0 : index
    %0 = vector.load %arg1[%c0, %c0_0] : memref<8x128xbf16, #tpu.memory_space<vmem>>, vector<8x128xbf16>
    %1 = arith.extf %0 : vector<8x128xbf16> to vector<8x128xf32>
    %2 = arith.mulf %1, %1 : vector<8x128xf32>
    %cst = arith.constant dense<0.000000e+00> : vector<8xf32>
    %3 = vector.multi_reduction <add>, %2, %cst [1] : vector<8x128xf32> to vector<8xf32>
    %4 = vector.shape_cast %3 : vector<8xf32> to vector<8x1xf32>
    %cst_1 = arith.constant 1.280000e+02 : f32
    %5 = vector.broadcast %cst_1 : f32 to vector<8x1xf32>
    %6 = arith.divf %4, %5 : vector<8x1xf32>
    %cst_2 = arith.constant 9.99999997E-7 : f32
    %7 = vector.broadcast %cst_2 : f32 to vector<8x1xf32>
    %8 = arith.addf %6, %7 : vector<8x1xf32>
    %9 = math.rsqrt %8 : vector<8x1xf32>
    %10 = vector.broadcast %9 : vector<8x1xf32> to vector<8x128xf32>
    %11 = arith.mulf %1, %10 : vector<8x128xf32>
    %c0_3 = arith.constant 0 : index
    %c0_4 = arith.constant 0 : index
    %12 = vector.load %arg2[%c0_3, %c0_4] : memref<1x128xbf16, #tpu.memory_space<vmem>>, vector<1x128xbf16>
    %13 = arith.extf %12 : vector<1x128xbf16> to vector<1x128xf32>
    %14 = vector.broadcast %13 : vector<1x128xf32> to vector<8x128xf32>
    %15 = arith.mulf %11, %14 : vector<8x128xf32>
    %16 = arith.truncf %15 : vector<8x128xf32> to vector<8x128xbf16>
    %c0_5 = arith.constant 0 : index
    %c0_6 = arith.constant 0 : index
    %17 = vector.load %arg3[%c0_5, %c0_6] : memref<128x256xbf16, #tpu.memory_space<vmem>>, vector<128x256xbf16>
    %cst_7 = arith.constant dense<0.000000e+00> : vector<8x256xf32>
    %18 = tpu.matmul %16, %17, %cst_7 {dimension_numbers = #tpu.dot_dimension_numbers<[1], [0], [0], [1], [0, 0, 1, 1], [], []>} : vector<8x128xbf16>, vector<128x256xbf16>, vector<8x256xf32> -> vector<8x256xf32>
    %c0_8 = arith.constant 0 : index
    %c0_9 = arith.constant 0 : index
    %19 = vector.load %arg4[%c0_8, %c0_9] : memref<1x256xbf16, #tpu.memory_space<vmem>>, vector<1x256xbf16>
    %20 = arith.extf %19 : vector<1x256xbf16> to vector<1x256xf32>
    %21 = vector.broadcast %20 : vector<1x256xf32> to vector<8x256xf32>
    %22 = arith.addf %18, %21 : vector<8x256xf32>
    %c0_10 = arith.constant 0 : index
    %c0_11 = arith.constant 0 : index
    %23 = vector.load %arg5[%c0_10, %c0_11] : memref<8x32xf32, #tpu.memory_space<vmem>>, vector<8x32xf32>
    %24 = vector.shape_cast %23 : vector<8x32xf32> to vector<8x1x32xf32>
    %c0_12 = arith.constant 0 : index
    %c0_13 = arith.constant 0 : index
    %25 = vector.load %arg6[%c0_12, %c0_13] : memref<8x32xf32, #tpu.memory_space<vmem>>, vector<8x32xf32>
    %26 = vector.shape_cast %25 : vector<8x32xf32> to vector<8x1x32xf32>
    %27 = vector.extract_strided_slice %22 {offsets = [0, 0], sizes = [8, 128], strides = [1, 1]} : vector<8x256xf32> to vector<8x128xf32>
    %28 = vector.shape_cast %27 : vector<8x128xf32> to vector<8x4x32xf32>
    %29 = vector.extract_strided_slice %22 {offsets = [0, 128], sizes = [8, 64], strides = [1, 1]} : vector<8x256xf32> to vector<8x64xf32>
    %30 = vector.shape_cast %29 : vector<8x64xf32> to vector<8x2x32xf32>
    %31 = vector.extract_strided_slice %22 {offsets = [0, 192], sizes = [8, 64], strides = [1, 1]} : vector<8x256xf32> to vector<8x64xf32>
    %32 = vector.shape_cast %31 : vector<8x64xf32> to vector<8x2x32xf32>
    %33 = vector.extract_strided_slice %28 {offsets = [0, 0, 0], sizes = [8, 4, 16], strides = [1, 1, 1]} : vector<8x4x32xf32> to vector<8x4x16xf32>
    %34 = vector.extract_strided_slice %28 {offsets = [0, 0, 16], sizes = [8, 4, 16], strides = [1, 1, 1]} : vector<8x4x32xf32> to vector<8x4x16xf32>
    %35 = vector.broadcast %24 : vector<8x1x32xf32> to vector<8x4x32xf32>
    %36 = arith.mulf %28, %35 : vector<8x4x32xf32>
    %cst_14 = arith.constant 0.000000e+00 : f32
    %37 = vector.broadcast %cst_14 : f32 to vector<8x4x16xf32>
    %38 = arith.subf %37, %34 : vector<8x4x16xf32>
    %39 = tpu.concatenate %38, %33 in 2 : vector<8x4x16xf32>, vector<8x4x16xf32> -> vector<8x4x32xf32>
    %40 = vector.broadcast %26 : vector<8x1x32xf32> to vector<8x4x32xf32>
    %41 = arith.mulf %39, %40 : vector<8x4x32xf32>
    %42 = arith.addf %36, %41 : vector<8x4x32xf32>
    %cst_15 = arith.constant 0.176776692 : f32
    %43 = vector.broadcast %cst_15 : f32 to vector<8x4x32xf32>
    %44 = arith.mulf %42, %43 : vector<8x4x32xf32>
    %45 = arith.truncf %44 : vector<8x4x32xf32> to vector<8x4x32xbf16>
    %46 = vector.extract_strided_slice %30 {offsets = [0, 0, 0], sizes = [8, 2, 16], strides = [1, 1, 1]} : vector<8x2x32xf32> to vector<8x2x16xf32>
    %47 = vector.extract_strided_slice %30 {offsets = [0, 0, 16], sizes = [8, 2, 16], strides = [1, 1, 1]} : vector<8x2x32xf32> to vector<8x2x16xf32>
    %48 = vector.broadcast %24 : vector<8x1x32xf32> to vector<8x2x32xf32>
    %49 = arith.mulf %30, %48 : vector<8x2x32xf32>
    %cst_16 = arith.constant 0.000000e+00 : f32
    %50 = vector.broadcast %cst_16 : f32 to vector<8x2x16xf32>
    %51 = arith.subf %50, %47 : vector<8x2x16xf32>
    %52 = tpu.concatenate %51, %46 in 2 : vector<8x2x16xf32>, vector<8x2x16xf32> -> vector<8x2x32xf32>
    %53 = vector.broadcast %26 : vector<8x1x32xf32> to vector<8x2x32xf32>
    %54 = arith.mulf %52, %53 : vector<8x2x32xf32>
    %55 = arith.addf %49, %54 : vector<8x2x32xf32>
    %56 = arith.truncf %55 : vector<8x2x32xf32> to vector<8x2x32xbf16>
    %57 = arith.truncf %32 : vector<8x2x32xf32> to vector<8x2x32xbf16>
    %58 = tpu.transpose %45, [1, 0, 2] : vector<8x4x32xbf16> -> vector<4x8x32xbf16>
    %59 = vector.shape_cast %56 : vector<8x2x32xbf16> to vector<8x2x1x32xbf16>
    %60 = vector.shape_cast %59 : vector<8x2x1x32xbf16> to vector<8x2x1x32xbf16>
    %61 = vector.broadcast %60 : vector<8x2x1x32xbf16> to vector<8x2x2x32xbf16>
    %62 = vector.shape_cast %61 : vector<8x2x2x32xbf16> to vector<8x4x32xbf16>
    %63 = tpu.transpose %62, [1, 0, 2] : vector<8x4x32xbf16> -> vector<4x8x32xbf16>
    %64 = vector.shape_cast %57 : vector<8x2x32xbf16> to vector<8x2x1x32xbf16>
    %65 = vector.shape_cast %64 : vector<8x2x1x32xbf16> to vector<8x2x1x32xbf16>
    %66 = vector.broadcast %65 : vector<8x2x1x32xbf16> to vector<8x2x2x32xbf16>
    %67 = vector.shape_cast %66 : vector<8x2x2x32xbf16> to vector<8x4x32xbf16>
    %68 = tpu.transpose %67, [1, 0, 2] : vector<8x4x32xbf16> -> vector<4x8x32xbf16>
    "tpu.trace_start"() <{level = 10 : i32, message = "hqd,hkd->hqk"}> : () -> ()
    %cst_17 = arith.constant dense<0.000000e+00> : vector<4x8x8xf32>
    %69 = tpu.matmul %58, %63, %cst_17 {dimension_numbers = #tpu.dot_dimension_numbers<[2], [2], [1], [1], [0, 0, 0, 1, 1, 1], [0], [0]>} : vector<4x8x32xbf16>, vector<4x8x32xbf16>, vector<4x8x8xf32> -> vector<4x8x8xf32>
    "tpu.trace_stop"() : () -> ()
    %70 = tpu.iota {dimensions = array<i32: 0>} : vector<8x8xi32>
    %71 = tpu.iota {dimensions = array<i32: 1>} : vector<8x8xi32>
    %72 = arith.cmpi sle, %71, %70 : vector<8x8xi32>
    %73 = vector.shape_cast %72 : vector<8x8xi1> to vector<1x8x8xi1>
    %cst_18 = arith.constant -3.40282347E+38 : f32
    %74 = vector.shape_cast %73 : vector<1x8x8xi1> to vector<1x8x8xi1>
    %75 = vector.broadcast %74 : vector<1x8x8xi1> to vector<4x8x8xi1>
    %76 = vector.broadcast %cst_18 : f32 to vector<4x8x8xf32>
    %77 = arith.select %75, %69, %76 : vector<4x8x8xi1>, vector<4x8x8xf32>
    %cst_19 = arith.constant dense<0xFF800000> : vector<4x8xf32>
    %78 = vector.multi_reduction <maximumf>, %77, %cst_19 [2] : vector<4x8x8xf32> to vector<4x8xf32>
    %79 = vector.shape_cast %78 : vector<4x8xf32> to vector<4x8x1xf32>
    %80 = vector.broadcast %79 : vector<4x8x1xf32> to vector<4x8x8xf32>
    %81 = arith.subf %77, %80 : vector<4x8x8xf32>
    %82 = math.exp %81 : vector<4x8x8xf32>
    %cst_20 = arith.constant dense<0.000000e+00> : vector<4x8xf32>
    %83 = vector.multi_reduction <add>, %82, %cst_20 [2] : vector<4x8x8xf32> to vector<4x8xf32>
    %84 = vector.shape_cast %83 : vector<4x8xf32> to vector<4x8x1xf32>
    %85 = tpu.reciprocal %84 {approx = true} : vector<4x8x1xf32> -> vector<4x8x1xf32>
    %86 = vector.broadcast %85 : vector<4x8x1xf32> to vector<4x8x8xf32>
    %87 = arith.mulf %82, %86 : vector<4x8x8xf32>
    %88 = arith.truncf %87 : vector<4x8x8xf32> to vector<4x8x8xbf16>
    "tpu.trace_start"() <{level = 10 : i32, message = "hqk,hkd->hqd"}> : () -> ()
    %cst_21 = arith.constant dense<0.000000e+00> : vector<4x8x32xf32>
    %89 = tpu.matmul %88, %68, %cst_21 {dimension_numbers = #tpu.dot_dimension_numbers<[2], [1], [1], [2], [0, 0, 0, 1, 1, 2], [0], [0]>} : vector<4x8x8xbf16>, vector<4x8x32xbf16>, vector<4x8x32xf32> -> vector<4x8x32xf32>
    "tpu.trace_stop"() : () -> ()
    %90 = tpu.transpose %89, [1, 0, 2] : vector<4x8x32xf32> -> vector<8x4x32xf32>
    %91 = vector.shape_cast %90 : vector<8x4x32xf32> to vector<8x128xf32>
    %92 = arith.truncf %91 : vector<8x128xf32> to vector<8x128xbf16>
    %c0_22 = arith.constant 0 : index
    %c0_23 = arith.constant 0 : index
    %93 = vector.load %arg7[%c0_22, %c0_23] : memref<128x128xbf16, #tpu.memory_space<vmem>>, vector<128x128xbf16>
    %cst_24 = arith.constant dense<0.000000e+00> : vector<8x128xf32>
    %94 = tpu.matmul %92, %93, %cst_24 {dimension_numbers = #tpu.dot_dimension_numbers<[1], [0], [0], [1], [0, 0, 1, 1], [], []>} : vector<8x128xbf16>, vector<128x128xbf16>, vector<8x128xf32> -> vector<8x128xf32>
    %95 = arith.addf %1, %94 : vector<8x128xf32>
    %96 = arith.truncf %95 : vector<8x128xf32> to vector<8x128xbf16>
    %c0_25 = arith.constant 0 : index
    %c0_26 = arith.constant 0 : index
    %97 = vector.load %arg8[%c0_25, %c0_26] : memref<8x128xbf16, #tpu.memory_space<vmem>>, vector<8x128xbf16>
    tpu.vector_store %arg8[%c0_25, %c0_26], %96 {strides = array<i32>} : memref<8x128xbf16, #tpu.memory_space<vmem>>, vector<8x128xbf16>,
    return
  }
  func.func @transform_0(%arg0: i32) -> (i32, i32) {
    %c0_i32 = arith.constant 0 : i32
    %c0_i32_0 = arith.constant 0 : i32
    return %arg0, %c0_i32 : i32, i32
  }
  func.func @transform_1(%arg0: i32) -> (i32, i32) {
    %c0_i32 = arith.constant 0 : i32
    %c0_i32_0 = arith.constant 0 : i32
    %c0_i32_1 = arith.constant 0 : i32
    return %c0_i32, %c0_i32_0 : i32, i32
  }
  func.func @transform_2(%arg0: i32) -> (i32, i32) {
    %c0_i32 = arith.constant 0 : i32
    %c0_i32_0 = arith.constant 0 : i32
    %c0_i32_1 = arith.constant 0 : i32
    return %c0_i32, %c0_i32_0 : i32, i32
  }
  func.func @transform_3(%arg0: i32) -> (i32, i32) {
    %c0_i32 = arith.constant 0 : i32
    %c0_i32_0 = arith.constant 0 : i32
    %c0_i32_1 = arith.constant 0 : i32
    return %c0_i32, %c0_i32_0 : i32, i32
  }
  func.func @transform_4(%arg0: i32) -> (i32, i32) {
    %c0_i32 = arith.constant 0 : i32
    %c0_i32_0 = arith.constant 0 : i32
    %c0_i32_1 = arith.constant 0 : i32
    return %c0_i32, %c0_i32_0 : i32, i32
  }
  func.func @transform_5(%arg0: i32) -> (i32, i32) {
    %c0_i32 = arith.constant 0 : i32
    %c0_i32_0 = arith.constant 0 : i32
    %c0_i32_1 = arith.constant 0 : i32
    return %c0_i32, %c0_i32_0 : i32, i32
  }
  func.func @transform_6(%arg0: i32) -> (i32, i32) {
    %c0_i32 = arith.constant 0 : i32
    %c0_i32_0 = arith.constant 0 : i32
    %c0_i32_1 = arith.constant 0 : i32
    return %c0_i32, %c0_i32_0 : i32, i32
  }
  func.func @transform_7(%arg0: i32) -> (i32, i32) {
    %c0_i32 = arith.constant 0 : i32
    %c0_i32_0 = arith.constant 0 : i32
    return %arg0, %c0_i32 : i32, i32
  }
}

module attributes {stable_mosaic.version = 11 : i64} {
  func.func @_norm_lm_head_kernel(%arg0: i32, %arg1: memref<8x128xbf16, #tpu.memory_space<vmem>>, %arg2: memref<1x128xbf16, #tpu.memory_space<vmem>>, %arg3: memref<128x128xbf16, #tpu.memory_space<vmem>>, %arg4: memref<8x128xf32, #tpu.memory_space<vmem>>) attributes {dimension_semantics = [#tpu.dimension_semantics<parallel>], iteration_bounds = array<i64: 2>, scalar_prefetch = 0 : i64, scratch_operands = 0 : i64, tpu.core_type = #tpu.core_type<tc>, window_params = [{transform_indices = @transform_0, window_bounds = array<i64: 8, 128>}, {pipeline_mode = #tpu.pipeline_mode<synchronous>, transform_indices = @transform_1, window_bounds = array<i64: 1, 128>}, {pipeline_mode = #tpu.pipeline_mode<synchronous>, transform_indices = @transform_2, window_bounds = array<i64: 128, 128>}, {transform_indices = @transform_3, window_bounds = array<i64: 8, 128>}]} {
    %c0 = arith.constant 0 : index
    %c0_0 = arith.constant 0 : index
    %0 = vector.load %arg1[%c0, %c0_0] : memref<8x128xbf16, #tpu.memory_space<vmem>>, vector<8x128xbf16>
    %1 = arith.extf %0 : vector<8x128xbf16> to vector<8x128xf32>
    %2 = arith.mulf %1, %1 : vector<8x128xf32>
    %cst = arith.constant dense<0.000000e+00> : vector<8xf32>
    %3 = vector.multi_reduction <add>, %2, %cst [1] : vector<8x128xf32> to vector<8xf32>
    %4 = vector.shape_cast %3 : vector<8xf32> to vector<8x1xf32>
    %cst_1 = arith.constant 1.280000e+02 : f32
    %5 = vector.broadcast %cst_1 : f32 to vector<8x1xf32>
    %6 = arith.divf %4, %5 : vector<8x1xf32>
    %cst_2 = arith.constant 9.99999997E-7 : f32
    %7 = vector.broadcast %cst_2 : f32 to vector<8x1xf32>
    %8 = arith.addf %6, %7 : vector<8x1xf32>
    %9 = math.rsqrt %8 : vector<8x1xf32>
    %10 = vector.broadcast %9 : vector<8x1xf32> to vector<8x128xf32>
    %11 = arith.mulf %1, %10 : vector<8x128xf32>
    %c0_3 = arith.constant 0 : index
    %c0_4 = arith.constant 0 : index
    %12 = vector.load %arg2[%c0_3, %c0_4] : memref<1x128xbf16, #tpu.memory_space<vmem>>, vector<1x128xbf16>
    %13 = arith.extf %12 : vector<1x128xbf16> to vector<1x128xf32>
    %14 = vector.broadcast %13 : vector<1x128xf32> to vector<8x128xf32>
    %15 = arith.mulf %11, %14 : vector<8x128xf32>
    %16 = arith.truncf %15 : vector<8x128xf32> to vector<8x128xbf16>
    %c0_5 = arith.constant 0 : index
    %c0_6 = arith.constant 0 : index
    %17 = vector.load %arg3[%c0_5, %c0_6] : memref<128x128xbf16, #tpu.memory_space<vmem>>, vector<128x128xbf16>
    %cst_7 = arith.constant dense<0.000000e+00> : vector<8x128xf32>
    %18 = tpu.matmul %16, %17, %cst_7 {dimension_numbers = #tpu.dot_dimension_numbers<[1], [0], [0], [1], [0, 0, 1, 1], [], []>} : vector<8x128xbf16>, vector<128x128xbf16>, vector<8x128xf32> -> vector<8x128xf32>
    %c0_8 = arith.constant 0 : index
    %c0_9 = arith.constant 0 : index
    %19 = vector.load %arg4[%c0_8, %c0_9] : memref<8x128xf32, #tpu.memory_space<vmem>>, vector<8x128xf32>
    tpu.vector_store %arg4[%c0_8, %c0_9], %18 {strides = array<i32>} : memref<8x128xf32, #tpu.memory_space<vmem>>, vector<8x128xf32>,
    return
  }
  func.func @transform_0(%arg0: i32) -> (i32, i32) {
    %c0_i32 = arith.constant 0 : i32
    %c0_i32_0 = arith.constant 0 : i32
    return %arg0, %c0_i32 : i32, i32
  }
  func.func @transform_1(%arg0: i32) -> (i32, i32) {
    %c0_i32 = arith.constant 0 : i32
    %c0_i32_0 = arith.constant 0 : i32
    %c0_i32_1 = arith.constant 0 : i32
    return %c0_i32, %c0_i32_0 : i32, i32
  }
  func.func @transform_2(%arg0: i32) -> (i32, i32) {
    %c0_i32 = arith.constant 0 : i32
    %c0_i32_0 = arith.constant 0 : i32
    %c0_i32_1 = arith.constant 0 : i32
    return %c0_i32, %c0_i32_0 : i32, i32
  }
  func.func @transform_3(%arg0: i32) -> (i32, i32) {
    %c0_i32 = arith.constant 0 : i32
    %c0_i32_0 = arith.constant 0 : i32
    return %arg0, %c0_i32 : i32, i32
  }
}

module attributes {stable_mosaic.version = 11 : i64} {
  func.func @_attn_block_kernel(%arg0: i32, %arg1: memref<8x128xbf16, #tpu.memory_space<vmem>>, %arg2: memref<1x128xbf16, #tpu.memory_space<vmem>>, %arg3: memref<128x256xbf16, #tpu.memory_space<vmem>>, %arg4: memref<1x256xbf16, #tpu.memory_space<vmem>>, %arg5: memref<8x32xf32, #tpu.memory_space<vmem>>, %arg6: memref<8x32xf32, #tpu.memory_space<vmem>>, %arg7: memref<128x128xbf16, #tpu.memory_space<vmem>>, %arg8: memref<8x128xbf16, #tpu.memory_space<vmem>>) attributes {dimension_semantics = [#tpu.dimension_semantics<parallel>], iteration_bounds = array<i64: 2>, scalar_prefetch = 0 : i64, scratch_operands = 0 : i64, tpu.core_type = #tpu.core_type<tc>, window_params = [{transform_indices = @transform_0, window_bounds = array<i64: 8, 128>}, {pipeline_mode = #tpu.pipeline_mode<synchronous>, transform_indices = @transform_1, window_bounds = array<i64: 1, 128>}, {pipeline_mode = #tpu.pipeline_mode<synchronous>, transform_indices = @transform_2, window_bounds = array<i64: 128, 256>}, {pipeline_mode = #tpu.pipeline_mode<synchronous>, transform_indices = @transform_3, window_bounds = array<i64: 1, 256>}, {pipeline_mode = #tpu.pipeline_mode<synchronous>, transform_indices = @transform_4, window_bounds = array<i64: 8, 32>}, {pipeline_mode = #tpu.pipeline_mode<synchronous>, transform_indices = @transform_5, window_bounds = array<i64: 8, 32>}, {pipeline_mode = #tpu.pipeline_mode<synchronous>, transform_indices = @transform_6, window_bounds = array<i64: 128, 128>}, {transform_indices = @transform_7, window_bounds = array<i64: 8, 128>}]} {
    %c0 = arith.constant 0 : index
    %c0_0 = arith.constant 0 : index
    %0 = vector.load %arg1[%c0, %c0_0] : memref<8x128xbf16, #tpu.memory_space<vmem>>, vector<8x128xbf16>
    %1 = arith.extf %0 : vector<8x128xbf16> to vector<8x128xf32>
    %2 = arith.mulf %1, %1 : vector<8x128xf32>
    %cst = arith.constant dense<0.000000e+00> : vector<8xf32>
    %3 = vector.multi_reduction <add>, %2, %cst [1] : vector<8x128xf32> to vector<8xf32>
    %4 = vector.shape_cast %3 : vector<8xf32> to vector<8x1xf32>
    %cst_1 = arith.constant 1.280000e+02 : f32
    %5 = vector.broadcast %cst_1 : f32 to vector<8x1xf32>
    %6 = arith.divf %4, %5 : vector<8x1xf32>
    %cst_2 = arith.constant 9.99999997E-7 : f32
    %7 = vector.broadcast %cst_2 : f32 to vector<8x1xf32>
    %8 = arith.addf %6, %7 : vector<8x1xf32>
    %9 = math.rsqrt %8 : vector<8x1xf32>
    %10 = vector.broadcast %9 : vector<8x1xf32> to vector<8x128xf32>
    %11 = arith.mulf %1, %10 : vector<8x128xf32>
    %c0_3 = arith.constant 0 : index
    %c0_4 = arith.constant 0 : index
    %12 = vector.load %arg2[%c0_3, %c0_4] : memref<1x128xbf16, #tpu.memory_space<vmem>>, vector<1x128xbf16>
    %13 = arith.extf %12 : vector<1x128xbf16> to vector<1x128xf32>
    %14 = vector.broadcast %13 : vector<1x128xf32> to vector<8x128xf32>
    %15 = arith.mulf %11, %14 : vector<8x128xf32>
    %16 = arith.truncf %15 : vector<8x128xf32> to vector<8x128xbf16>
    %c0_5 = arith.constant 0 : index
    %c0_6 = arith.constant 0 : index
    %17 = vector.load %arg3[%c0_5, %c0_6] : memref<128x256xbf16, #tpu.memory_space<vmem>>, vector<128x256xbf16>
    %cst_7 = arith.constant dense<0.000000e+00> : vector<8x256xf32>
    %18 = tpu.matmul %16, %17, %cst_7 {dimension_numbers = #tpu.dot_dimension_numbers<[1], [0], [0], [1], [0, 0, 1, 1], [], []>} : vector<8x128xbf16>, vector<128x256xbf16>, vector<8x256xf32> -> vector<8x256xf32>
    %c0_8 = arith.constant 0 : index
    %c0_9 = arith.constant 0 : index
    %19 = vector.load %arg4[%c0_8, %c0_9] : memref<1x256xbf16, #tpu.memory_space<vmem>>, vector<1x256xbf16>
    %20 = arith.extf %19 : vector<1x256xbf16> to vector<1x256xf32>
    %21 = vector.broadcast %20 : vector<1x256xf32> to vector<8x256xf32>
    %22 = arith.addf %18, %21 : vector<8x256xf32>
    %c0_10 = arith.constant 0 : index
    %c0_11 = arith.constant 0 : index
    %23 = vector.load %arg5[%c0_10, %c0_11] : memref<8x32xf32, #tpu.memory_space<vmem>>, vector<8x32xf32>
    %24 = vector.shape_cast %23 : vector<8x32xf32> to vector<8x1x32xf32>
    %c0_12 = arith.constant 0 : index
    %c0_13 = arith.constant 0 : index
    %25 = vector.load %arg6[%c0_12, %c0_13] : memref<8x32xf32, #tpu.memory_space<vmem>>, vector<8x32xf32>
    %26 = vector.shape_cast %25 : vector<8x32xf32> to vector<8x1x32xf32>
    %27 = vector.extract_strided_slice %22 {offsets = [0, 0], sizes = [8, 128], strides = [1, 1]} : vector<8x256xf32> to vector<8x128xf32>
    %28 = vector.shape_cast %27 : vector<8x128xf32> to vector<8x4x32xf32>
    %29 = vector.extract_strided_slice %22 {offsets = [0, 128], sizes = [8, 64], strides = [1, 1]} : vector<8x256xf32> to vector<8x64xf32>
    %30 = vector.shape_cast %29 : vector<8x64xf32> to vector<8x2x32xf32>
    %31 = vector.extract_strided_slice %22 {offsets = [0, 192], sizes = [8, 64], strides = [1, 1]} : vector<8x256xf32> to vector<8x64xf32>
    %32 = vector.shape_cast %31 : vector<8x64xf32> to vector<8x2x32xf32>
    %33 = vector.extract_strided_slice %28 {offsets = [0, 0, 0], sizes = [8, 4, 16], strides = [1, 1, 1]} : vector<8x4x32xf32> to vector<8x4x16xf32>
    %34 = vector.extract_strided_slice %28 {offsets = [0, 0, 16], sizes = [8, 4, 16], strides = [1, 1, 1]} : vector<8x4x32xf32> to vector<8x4x16xf32>
    %35 = vector.broadcast %24 : vector<8x1x32xf32> to vector<8x4x32xf32>
    %36 = arith.mulf %28, %35 : vector<8x4x32xf32>
    %cst_14 = arith.constant 0.000000e+00 : f32
    %37 = vector.broadcast %cst_14 : f32 to vector<8x4x16xf32>
    %38 = arith.subf %37, %34 : vector<8x4x16xf32>
    %39 = tpu.concatenate %38, %33 in 2 : vector<8x4x16xf32>, vector<8x4x16xf32> -> vector<8x4x32xf32>
    %40 = vector.broadcast %26 : vector<8x1x32xf32> to vector<8x4x32xf32>
    %41 = arith.mulf %39, %40 : vector<8x4x32xf32>
    %42 = arith.addf %36, %41 : vector<8x4x32xf32>
    %cst_15 = arith.constant 0.176776692 : f32
    %43 = vector.broadcast %cst_15 : f32 to vector<8x4x32xf32>
    %44 = arith.mulf %42, %43 : vector<8x4x32xf32>
    %45 = arith.truncf %44 : vector<8x4x32xf32> to vector<8x4x32xbf16>
    %46 = vector.extract_strided_slice %30 {offsets = [0, 0, 0], sizes = [8, 2, 16], strides = [1, 1, 1]} : vector<8x2x32xf32> to vector<8x2x16xf32>
    %47 = vector.extract_strided_slice %30 {offsets = [0, 0, 16], sizes = [8, 2, 16], strides = [1, 1, 1]} : vector<8x2x32xf32> to vector<8x2x16xf32>
    %48 = vector.broadcast %24 : vector<8x1x32xf32> to vector<8x2x32xf32>
    %49 = arith.mulf %30, %48 : vector<8x2x32xf32>
    %cst_16 = arith.constant 0.000000e+00 : f32
    %50 = vector.broadcast %cst_16 : f32 to vector<8x2x16xf32>
    %51 = arith.subf %50, %47 : vector<8x2x16xf32>
    %52 = tpu.concatenate %51, %46 in 2 : vector<8x2x16xf32>, vector<8x2x16xf32> -> vector<8x2x32xf32>
    %53 = vector.broadcast %26 : vector<8x1x32xf32> to vector<8x2x32xf32>
    %54 = arith.mulf %52, %53 : vector<8x2x32xf32>
    %55 = arith.addf %49, %54 : vector<8x2x32xf32>
    %56 = arith.truncf %55 : vector<8x2x32xf32> to vector<8x2x32xbf16>
    %57 = arith.truncf %32 : vector<8x2x32xf32> to vector<8x2x32xbf16>
    %58 = tpu.transpose %45, [1, 0, 2] : vector<8x4x32xbf16> -> vector<4x8x32xbf16>
    %59 = vector.shape_cast %56 : vector<8x2x32xbf16> to vector<8x2x1x32xbf16>
    %60 = vector.shape_cast %59 : vector<8x2x1x32xbf16> to vector<8x2x1x32xbf16>
    %61 = vector.broadcast %60 : vector<8x2x1x32xbf16> to vector<8x2x2x32xbf16>
    %62 = vector.shape_cast %61 : vector<8x2x2x32xbf16> to vector<8x4x32xbf16>
    %63 = tpu.transpose %62, [1, 0, 2] : vector<8x4x32xbf16> -> vector<4x8x32xbf16>
    %64 = vector.shape_cast %57 : vector<8x2x32xbf16> to vector<8x2x1x32xbf16>
    %65 = vector.shape_cast %64 : vector<8x2x1x32xbf16> to vector<8x2x1x32xbf16>
    %66 = vector.broadcast %65 : vector<8x2x1x32xbf16> to vector<8x2x2x32xbf16>
    %67 = vector.shape_cast %66 : vector<8x2x2x32xbf16> to vector<8x4x32xbf16>
    %68 = tpu.transpose %67, [1, 0, 2] : vector<8x4x32xbf16> -> vector<4x8x32xbf16>
    "tpu.trace_start"() <{level = 10 : i32, message = "hqd,hkd->hqk"}> : () -> ()
    %cst_17 = arith.constant dense<0.000000e+00> : vector<4x8x8xf32>
    %69 = tpu.matmul %58, %63, %cst_17 {dimension_numbers = #tpu.dot_dimension_numbers<[2], [2], [1], [1], [0, 0, 0, 1, 1, 1], [0], [0]>} : vector<4x8x32xbf16>, vector<4x8x32xbf16>, vector<4x8x8xf32> -> vector<4x8x8xf32>
    "tpu.trace_stop"() : () -> ()
    %70 = tpu.iota {dimensions = array<i32: 0>} : vector<8x8xi32>
    %71 = tpu.iota {dimensions = array<i32: 1>} : vector<8x8xi32>
    %72 = arith.cmpi sle, %71, %70 : vector<8x8xi32>
    %73 = vector.shape_cast %72 : vector<8x8xi1> to vector<1x8x8xi1>
    %cst_18 = arith.constant -3.40282347E+38 : f32
    %74 = vector.shape_cast %73 : vector<1x8x8xi1> to vector<1x8x8xi1>
    %75 = vector.broadcast %74 : vector<1x8x8xi1> to vector<4x8x8xi1>
    %76 = vector.broadcast %cst_18 : f32 to vector<4x8x8xf32>
    %77 = arith.select %75, %69, %76 : vector<4x8x8xi1>, vector<4x8x8xf32>
    %cst_19 = arith.constant dense<0xFF800000> : vector<4x8xf32>
    %78 = vector.multi_reduction <maximumf>, %77, %cst_19 [2] : vector<4x8x8xf32> to vector<4x8xf32>
    %79 = vector.shape_cast %78 : vector<4x8xf32> to vector<4x8x1xf32>
    %80 = vector.broadcast %79 : vector<4x8x1xf32> to vector<4x8x8xf32>
    %81 = arith.subf %77, %80 : vector<4x8x8xf32>
    %82 = math.exp %81 : vector<4x8x8xf32>
    %cst_20 = arith.constant dense<0.000000e+00> : vector<4x8xf32>
    %83 = vector.multi_reduction <add>, %82, %cst_20 [2] : vector<4x8x8xf32> to vector<4x8xf32>
    %84 = vector.shape_cast %83 : vector<4x8xf32> to vector<4x8x1xf32>
    %85 = tpu.reciprocal %84 {approx = true} : vector<4x8x1xf32> -> vector<4x8x1xf32>
    %86 = vector.broadcast %85 : vector<4x8x1xf32> to vector<4x8x8xf32>
    %87 = arith.mulf %82, %86 : vector<4x8x8xf32>
    %88 = arith.truncf %87 : vector<4x8x8xf32> to vector<4x8x8xbf16>
    "tpu.trace_start"() <{level = 10 : i32, message = "hqk,hkd->hqd"}> : () -> ()
    %cst_21 = arith.constant dense<0.000000e+00> : vector<4x8x32xf32>
    %89 = tpu.matmul %88, %68, %cst_21 {dimension_numbers = #tpu.dot_dimension_numbers<[2], [1], [1], [2], [0, 0, 0, 1, 1, 2], [0], [0]>} : vector<4x8x8xbf16>, vector<4x8x32xbf16>, vector<4x8x32xf32> -> vector<4x8x32xf32>
    "tpu.trace_stop"() : () -> ()
    %90 = tpu.transpose %89, [1, 0, 2] : vector<4x8x32xf32> -> vector<8x4x32xf32>
    %91 = vector.shape_cast %90 : vector<8x4x32xf32> to vector<8x128xf32>
    %92 = arith.truncf %91 : vector<8x128xf32> to vector<8x128xbf16>
    %c0_22 = arith.constant 0 : index
    %c0_23 = arith.constant 0 : index
    %93 = vector.load %arg7[%c0_22, %c0_23] : memref<128x128xbf16, #tpu.memory_space<vmem>>, vector<128x128xbf16>
    %cst_24 = arith.constant dense<0.000000e+00> : vector<8x128xf32>
    %94 = tpu.matmul %92, %93, %cst_24 {dimension_numbers = #tpu.dot_dimension_numbers<[1], [0], [0], [1], [0, 0, 1, 1], [], []>} : vector<8x128xbf16>, vector<128x128xbf16>, vector<8x128xf32> -> vector<8x128xf32>
    %95 = arith.addf %1, %94 : vector<8x128xf32>
    %96 = arith.truncf %95 : vector<8x128xf32> to vector<8x128xbf16>
    %c0_25 = arith.constant 0 : index
    %c0_26 = arith.constant 0 : index
    %97 = vector.load %arg8[%c0_25, %c0_26] : memref<8x128xbf16, #tpu.memory_space<vmem>>, vector<8x128xbf16>
    tpu.vector_store %arg8[%c0_25, %c0_26], %96 {strides = array<i32>} : memref<8x128xbf16, #tpu.memory_space<vmem>>, vector<8x128xbf16>,
    return
  }
  func.func @transform_0(%arg0: i32) -> (i32, i32) {
    %c0_i32 = arith.constant 0 : i32
    %c0_i32_0 = arith.constant 0 : i32
    return %arg0, %c0_i32 : i32, i32
  }
  func.func @transform_1(%arg0: i32) -> (i32, i32) {
    %c0_i32 = arith.constant 0 : i32
    %c0_i32_0 = arith.constant 0 : i32
    %c0_i32_1 = arith.constant 0 : i32
    return %c0_i32, %c0_i32_0 : i32, i32
  }
  func.func @transform_2(%arg0: i32) -> (i32, i32) {
    %c0_i32 = arith.constant 0 : i32
    %c0_i32_0 = arith.constant 0 : i32
    %c0_i32_1 = arith.constant 0 : i32
    return %c0_i32, %c0_i32_0 : i32, i32
  }
  func.func @transform_3(%arg0: i32) -> (i32, i32) {
    %c0_i32 = arith.constant 0 : i32
    %c0_i32_0 = arith.constant 0 : i32
    %c0_i32_1 = arith.constant 0 : i32
    return %c0_i32, %c0_i32_0 : i32, i32
  }
  func.func @transform_4(%arg0: i32) -> (i32, i32) {
    %c0_i32 = arith.constant 0 : i32
    %c0_i32_0 = arith.constant 0 : i32
    %c0_i32_1 = arith.constant 0 : i32
    return %c0_i32, %c0_i32_0 : i32, i32
  }
  func.func @transform_5(%arg0: i32) -> (i32, i32) {
    %c0_i32 = arith.constant 0 : i32
    %c0_i32_0 = arith.constant 0 : i32
    %c0_i32_1 = arith.constant 0 : i32
    return %c0_i32, %c0_i32_0 : i32, i32
  }
  func.func @transform_6(%arg0: i32) -> (i32, i32) {
    %c0_i32 = arith.constant 0 : i32
    %c0_i32_0 = arith.constant 0 : i32
    %c0_i32_1 = arith.constant 0 : i32
    return %c0_i32, %c0_i32_0 : i32, i32
  }
  func.func @transform_7(%arg0: i32) -> (i32, i32) {
    %c0_i32 = arith.constant 0 : i32
    %c0_i32_0 = arith.constant 0 : i32
    return %arg0, %c0_i32 : i32, i32
  }
}

module attributes {stable_mosaic.version = 11 : i64} {
  func.func @_mlp_block_kernel(%arg0: i32, %arg1: memref<8x128xbf16, #tpu.memory_space<vmem>>, %arg2: memref<1x128xbf16, #tpu.memory_space<vmem>>, %arg3: memref<128x512xbf16, #tpu.memory_space<vmem>>, %arg4: memref<256x128xbf16, #tpu.memory_space<vmem>>, %arg5: memref<8x128xbf16, #tpu.memory_space<vmem>>) attributes {dimension_semantics = [#tpu.dimension_semantics<parallel>], iteration_bounds = array<i64: 2>, scalar_prefetch = 0 : i64, scratch_operands = 0 : i64, tpu.core_type = #tpu.core_type<tc>, window_params = [{transform_indices = @transform_0, window_bounds = array<i64: 8, 128>}, {pipeline_mode = #tpu.pipeline_mode<synchronous>, transform_indices = @transform_1, window_bounds = array<i64: 1, 128>}, {pipeline_mode = #tpu.pipeline_mode<synchronous>, transform_indices = @transform_2, window_bounds = array<i64: 128, 512>}, {pipeline_mode = #tpu.pipeline_mode<synchronous>, transform_indices = @transform_3, window_bounds = array<i64: 256, 128>}, {transform_indices = @transform_4, window_bounds = array<i64: 8, 128>}]} {
    %c0 = arith.constant 0 : index
    %c0_0 = arith.constant 0 : index
    %0 = vector.load %arg1[%c0, %c0_0] : memref<8x128xbf16, #tpu.memory_space<vmem>>, vector<8x128xbf16>
    %1 = arith.extf %0 : vector<8x128xbf16> to vector<8x128xf32>
    %2 = arith.mulf %1, %1 : vector<8x128xf32>
    %cst = arith.constant dense<0.000000e+00> : vector<8xf32>
    %3 = vector.multi_reduction <add>, %2, %cst [1] : vector<8x128xf32> to vector<8xf32>
    %4 = vector.shape_cast %3 : vector<8xf32> to vector<8x1xf32>
    %cst_1 = arith.constant 1.280000e+02 : f32
    %5 = vector.broadcast %cst_1 : f32 to vector<8x1xf32>
    %6 = arith.divf %4, %5 : vector<8x1xf32>
    %cst_2 = arith.constant 9.99999997E-7 : f32
    %7 = vector.broadcast %cst_2 : f32 to vector<8x1xf32>
    %8 = arith.addf %6, %7 : vector<8x1xf32>
    %9 = math.rsqrt %8 : vector<8x1xf32>
    %10 = vector.broadcast %9 : vector<8x1xf32> to vector<8x128xf32>
    %11 = arith.mulf %1, %10 : vector<8x128xf32>
    %c0_3 = arith.constant 0 : index
    %c0_4 = arith.constant 0 : index
    %12 = vector.load %arg2[%c0_3, %c0_4] : memref<1x128xbf16, #tpu.memory_space<vmem>>, vector<1x128xbf16>
    %13 = arith.extf %12 : vector<1x128xbf16> to vector<1x128xf32>
    %14 = vector.broadcast %13 : vector<1x128xf32> to vector<8x128xf32>
    %15 = arith.mulf %11, %14 : vector<8x128xf32>
    %16 = arith.truncf %15 : vector<8x128xf32> to vector<8x128xbf16>
    %c0_5 = arith.constant 0 : index
    %c0_6 = arith.constant 0 : index
    %17 = vector.load %arg3[%c0_5, %c0_6] : memref<128x512xbf16, #tpu.memory_space<vmem>>, vector<128x512xbf16>
    %cst_7 = arith.constant dense<0.000000e+00> : vector<8x512xf32>
    %18 = tpu.matmul %16, %17, %cst_7 {dimension_numbers = #tpu.dot_dimension_numbers<[1], [0], [0], [1], [0, 0, 1, 1], [], []>} : vector<8x128xbf16>, vector<128x512xbf16>, vector<8x512xf32> -> vector<8x512xf32>
    %19 = vector.extract_strided_slice %18 {offsets = [0, 0], sizes = [8, 256], strides = [1, 1]} : vector<8x512xf32> to vector<8x256xf32>
    %20 = vector.extract_strided_slice %18 {offsets = [0, 256], sizes = [8, 256], strides = [1, 1]} : vector<8x512xf32> to vector<8x256xf32>
    %21 = arith.negf %19 : vector<8x256xf32>
    %22 = math.exp %21 : vector<8x256xf32>
    %cst_8 = arith.constant 1.000000e+00 : f32
    %23 = vector.broadcast %cst_8 : f32 to vector<8x256xf32>
    %24 = arith.addf %23, %22 : vector<8x256xf32>
    %25 = arith.divf %23, %24 : vector<8x256xf32>
    %26 = arith.mulf %19, %25 : vector<8x256xf32>
    %27 = arith.mulf %26, %20 : vector<8x256xf32>
    %28 = arith.truncf %27 : vector<8x256xf32> to vector<8x256xbf16>
    %c0_9 = arith.constant 0 : index
    %c0_10 = arith.constant 0 : index
    %29 = vector.load %arg4[%c0_9, %c0_10] : memref<256x128xbf16, #tpu.memory_space<vmem>>, vector<256x128xbf16>
    %cst_11 = arith.constant dense<0.000000e+00> : vector<8x128xf32>
    %30 = tpu.matmul %28, %29, %cst_11 {dimension_numbers = #tpu.dot_dimension_numbers<[1], [0], [0], [1], [0, 0, 1, 1], [], []>} : vector<8x256xbf16>, vector<256x128xbf16>, vector<8x128xf32> -> vector<8x128xf32>
    %31 = arith.addf %1, %30 : vector<8x128xf32>
    %32 = arith.truncf %31 : vector<8x128xf32> to vector<8x128xbf16>
    %c0_12 = arith.constant 0 : index
    %c0_13 = arith.constant 0 : index
    %33 = vector.load %arg5[%c0_12, %c0_13] : memref<8x128xbf16, #tpu.memory_space<vmem>>, vector<8x128xbf16>
    tpu.vector_store %arg5[%c0_12, %c0_13], %32 {strides = array<i32>} : memref<8x128xbf16, #tpu.memory_space<vmem>>, vector<8x128xbf16>,
    return
  }
  func.func @transform_0(%arg0: i32) -> (i32, i32) {
    %c0_i32 = arith.constant 0 : i32
    %c0_i32_0 = arith.constant 0 : i32
    return %arg0, %c0_i32 : i32, i32
  }
  func.func @transform_1(%arg0: i32) -> (i32, i32) {
    %c0_i32 = arith.constant 0 : i32
    %c0_i32_0 = arith.constant 0 : i32
    %c0_i32_1 = arith.constant 0 : i32
    return %c0_i32, %c0_i32_0 : i32, i32
  }
  func.func @transform_2(%arg0: i32) -> (i32, i32) {
    %c0_i32 = arith.constant 0 : i32
    %c0_i32_0 = arith.constant 0 : i32
    %c0_i32_1 = arith.constant 0 : i32
    return %c0_i32, %c0_i32_0 : i32, i32
  }
  func.func @transform_3(%arg0: i32) -> (i32, i32) {
    %c0_i32 = arith.constant 0 : i32
    %c0_i32_0 = arith.constant 0 : i32
    %c0_i32_1 = arith.constant 0 : i32
    return %c0_i32, %c0_i32_0 : i32, i32
  }
  func.func @transform_4(%arg0: i32) -> (i32, i32) {
    %c0_i32 = arith.constant 0 : i32
    %c0_i32_0 = arith.constant 0 : i32
    return %arg0, %c0_i32 : i32, i32
  }
}

</mosaic_0001>

<bundles_post_ra>
// kernel: tpu_custom_call.1
= control target key start
LH: loop header
LB: loop body
LE: loop exit
PB: predicated region body
PF: predicated region fallthrough
CT: control target
= control target key end

     0   :  { %6 = vsyncpa [#allocation3], 0  ;;  %s482_s0 = inlined_call_operand.hbm [shape: f32[8,128], index: 0, kind: input, shape index: {}]   ;;  %s483_s1 = inlined_call_operand.hbm [shape: f32[16,128], index: 1, kind: output, shape index: {}]  }
   0x1   :  { %7 = vsyncpa [#allocation4], 0 }
   0x2   :  { %9 = vsyncpa [#allocation4 + $0x1], 0  ;;  %s352_s6 = smov 0   ;;  %s354_s7 = smov 0  }
   0x3   :  { %s356_s8 = smov 0   ;;  %s358_s9 = smov 0  }
   0x4 LB: > { %s373_s10 = sadd.s32 4294967295, %s338_s9   ;;  %s184_s11 = sadd.s32 4294967294, %s338_s9   ;;  %s338_s9 = sphi %s358_s9, %s499_s9   ;;  %s334_s8 = sphi %s356_s8, %s498_s8   ;;  %s330_s7 = sphi %s354_s7, %s497_s7   ;;  %s326_s6 = sphi %s352_s6, %s496_s6  }
   0x5   : > { %s377_s12 = sadd.s32 1, %s338_s9   ;;  %s43_s13 = sadd.s32 1, %s334_s8 }
   0x6   : > { %s40_s14 = ssub.s32 %s338_s9, %s377_s12  ;;  %p53_p0 = scmp.ne.s32.totalorder %s334_s8, %s330_s7 }
   0x7   : > { %p41_p1 = scmp.eq.s32.totalorder %s40_s14, 0  ;;  %p54_p2 = scmp.eq.s32.totalorder %s373_s10, 1 }
   0x8   : > { %p59_p3 = scmp.ne.s32.totalorder %s330_s7, %s326_s6  ;;  %p60_p4 = scmp.eq.s32.totalorder %s184_s11, 1 }
   0x9   : > { %s388_s15 = scalar_select %p41_p1, %s334_s8, %s43_s13  }
   0xa   : > { %p390_p5 = por %p54_p2, %p53_p0  ;;  %p394_p6 = por %p60_p4, %p59_p3 }
   0xb   : > { %p185_p7 = scmp.ge.s32.totalorder %s338_s9, 1  ;;  %p67_p8 = scmp.lt.s32.totalorder %s338_s9, 3 }
   0xc   : > { %s487_s16 = scalar_select %p390_p5, 1, 0 }
   0xd   : > { %s488_s17 = scalar_select %p394_p6, 1, 0 }
   0xe   : > { %p484_p9 = scmp.eq.s32.totalorder %s373_s10, 0  ;;  %p401_p10 = pnand %p185_p7, %p67_p8 }
   0xf   : > { %s340_s19 = smov [#allocation2]   ;;  %s244_s24 = scalar_lea.hbm %s482_s0, 128 }
  0x10   : > { %s489_s18 = scalar_select %p401_p10, 1, 0 }
  0x11   : > { %s80_s20 = sshll.u32 %s340_s19, 4  ;;  %p200_p11 = pneg %p401_p10  ;;  %s81_s20 = int_to_ptr.vmem [resolvable:$true] %s80_s20 }
  0x12   : > { %p245_p13 = scmp.ne.s32.totalorder %s482_s0, %s244_s24  ;;  %p251_p3 = scmp.lt.u32.totalorder %s244_s24, %s482_s0 }
  0x13   : > { %p409_p12 = pnand %p484_p9, %p200_p11 }
  0x15   : > { %p246_p0 = pneg %p409_p12 }
  0x17   : > { %p247_p1 = pnand %p246_p0, %p245_p13 }
  0x19   : > { %p248_p2 = pneg %p247_p1 }
  0x1b   : > { %p253_p4 = pnand %p251_p3, %p248_p2 }
  0x1d   : > { %256 = shalt.err (!%p253_p4)
}
  0x1e   : > { %s257_s29 = scalar_lea.vmem %s81_s20, 128  ;;  %p265_p9 = scmp.lt.s32.totalorder %s81_s20, %s81_s20 }
  0x1f   : > { %p258_p7 = scmp.ne.s32.totalorder %s81_s20, %s257_s29  ;;  %p266_p6 = scmp.lt.s32.totalorder %s257_s29, %s257_s29 }
  0x21   : > { %p260_p8 = pnand %p258_p7, %p246_p0  ;;  %p267_p5 = por %p266_p6, %p265_p9 }
  0x23   : > { %p261_p11 = pneg %p260_p8 }
  0x25   : > { %p268_p10 = pnand %p267_p5, %p261_p11 }
  0x27   : > { %271 = shalt.err (!%p268_p10)
}
  0x28   : > { %203 = dma.hbm_to_vmem [thread:$0]  (!%p409_p12), %s482_s0, 128, %s81_s20, [#allocation3]  }
  0x29   : > { %p491_p13 = scmp.ne.s32.totalorder %s489_s18, 0 }
  0x2a   : > { %p492_p1 = scmp.eq.s32.totalorder (!%p491_p13), %s373_s10, 0 }
  0x2b   : > { %93 = sbr.rel (%p491_p13) target bundleno = 77 (0x4d), region = 24 }
  0x32   : > { %317 = dma.done.wait (%p492_p1), [#allocation3], 128   ;;  %p493_p0 = pmov %p492_p1 }
  0x33   : > { %s105_s3 = sand.u32 1, %s330_s7   ;;  %s191_s13 = sshll.u32 %s373_s10, 7  ;;  %v108_v0 = vld [vmem:[#allocation2] sm:$0xff] }
  0x34   : > { %319 = vsyncadd (%p493_p0), [#allocation3], 4294967168  ;;  %s189_s4 = sshll.u32 %s105_s3, 3  ;;  %v109_v1 = vadd.f32 1.0, %v108_v0  ;;  %s442_s19 = scalar_lea.hbm %s483_s1, %s191_s13 }
  0x35   : > { %s107_s5 = scalar_lea.vmem [#allocation5], %s189_s4  ;;  %s112_s20 = scalar_lea.sflag [#allocation4], %s105_s3 }
  0x36   : > { %s125_s11 = sshll.u32 %s107_s5, 4  ;;  %110 = vst [vmem:[%s107_s5] sm:$0xff] %v109_v1  ;;  %p494_p6 = scmp.ne.s32.totalorder %s487_s16, 0  ;;  %s437_s11 = int_to_ptr.vmem [resolvable:$true] %s125_s11 }
  0x37   : > { %s272_s21 = scalar_lea.vmem %s437_s11, 128  ;;  %s341_s10 = smov [#allocation5]  }
  0x38   : > { %p273_p5 = scmp.ne.s32.totalorder %s437_s11, %s272_s21  ;;  %s276_s22 = sshll.u32 %s341_s10, 4  ;;  %s277_s22 = int_to_ptr.vmem [resolvable:$false] %s276_s22 }
  0x39   : > { %s278_s23 = scalar_lea.vmem %s277_s22, 256  ;;  %p279_p12 = scmp.lt.s32.totalorder %s437_s11, %s277_s22 }
  0x3a   : > { %p274_p9 = pnand %p273_p5, %p494_p6  ;;  %p280_p2 = scmp.lt.s32.totalorder %s278_s23, %s272_s21 }
  0x3c   : > { %p275_p10 = pneg %p274_p9  ;;  %p281_p3 = por %p280_p2, %p279_p12 }
  0x3e   : > { %p282_p4 = pnand %p281_p3, %p275_p10 }
  0x40   : > { %285 = shalt.err (!%p282_p4)
}
  0x41   : > { %s286_s24 = scalar_lea.hbm %s442_s19, 128  ;;  %s290_s27 = scalar_lea.hbm %s483_s1, 256 }
  0x42   : > { %p287_p7 = scmp.ne.s32.totalorder %s442_s19, %s286_s24  ;;  %p291_p13 = scmp.lt.u32.totalorder %s442_s19, %s483_s1 }
  0x43   : > { %p292_p1 = scmp.lt.u32.totalorder %s290_s27, %s286_s24  ;;  %p294_p5 = scmp.lt.u32.totalorder %s286_s24, %s442_s19 }
  0x44   : > { %p288_p8 = pnand %p287_p7, %p494_p6 }
  0x45   : > { %p293_p0 = por %p292_p1, %p291_p13 }
  0x46   : > { %p289_p11 = pneg %p288_p8 }
  0x47   : > { %p295_p9 = por %p294_p5, %p293_p0 }
  0x49   : > { %p296_p10 = pnand %p295_p9, %p289_p11 }
  0x4b   : > { %299 = shalt.err (!%p296_p10)
}
  0x4c   : > { %198 = dma.vmem_to_hbm [thread:$0]  (%p494_p6), %s437_s11, 128, %s442_s19, %s112_s20  }
  0x4d PF: > { %p210_p12 = scmp.ge.s32.totalorder %s338_s9, 2  ;;  %s137_s30 = sand.u32 1, %s326_s6  }
  0x4e   : > { %p495_p2 = scmp.ne.s32.totalorder %s488_s17, 0  ;;  %s138_s2 = scalar_lea.sflag [#allocation4], %s137_s30 }
  0x50   : > { %p205_p3 = pnand %p210_p12, %p495_p2 }
  0x52   : > { %321 = dma.done.wait (!%p205_p3), %s138_s2, 128  }
  0x53   : > { %323 = vsyncadd (!%p205_p3), %s138_s2, 4294967168  ;;  %p12_p4 = scmp.ge.s32.totalorder %s377_s12, 4   ;;  %s496_s6 = smov %s330_s7 }
  0x54   : > { %s497_s7 = smov %s334_s8  ;;  %s498_s8 = smov %s388_s15 }
  0x55   : > { %s499_s9 = smov %s377_s12  ;;  %14 = sbr.rel (!%p12_p4) target bundleno = 4 (0x4), region = 61 }
  0x5c   :  { %143 = vsyncpa [#allocation3], 1 }
  0x5d   :  { %145 = vsyncpa [#allocation3 + $0x1], 1 }
  0x5e   :  { %146 = vsyncpa [#allocation4], 1 }
  0x5f   :  { %148 = vsyncpa [#allocation4 + $0x1], 1 }

// kernel: qwen_detection_forward.9
= control target key start
LH: loop header
LB: loop body
LE: loop exit
PB: predicated region body
PF: predicated region fallthrough
CT: control target
= control target key end

     0   :  { %8 = vsyncpa [#allocation3], 0  ;;  %s675_s0 = inlined_call_operand.vmem [shape: bf16[16,128], index: 0, kind: input, shape index: {}]   ;;  %s676_s1 = inlined_call_operand.vmem [shape: bf16[1,128], index: 1, kind: input, shape index: {}]   ;;  %s677_s2 = inlined_call_operand.vmem [shape: bf16[128,128], index: 2, kind: input, shape index: {}]   ;;  %s678_s3 = inlined_call_operand.hbm [shape: f32[16,128], index: 3, kind: output, shape index: {}]  }
   0x1   :  { %10 = vsyncpa [#allocation3 + $0x1], 0  ;;  %s548_s12 = smov 0   ;;  %s550_s13 = smov 0  }
   0x2   :  { %s552_s14 = smov 0   ;;  %s554_s15 = smov 0  }
   0x3 LB: > { %s569_s16 = sadd.s32 4294967295, %s523_s15   ;;  %s363_s17 = sadd.s32 4294967294, %s523_s15   ;;  %s523_s15 = sphi %s554_s15, %s684_s15   ;;  %s519_s14 = sphi %s552_s14, %s683_s14   ;;  %s515_s13 = sphi %s550_s13, %s682_s13   ;;  %s511_s12 = sphi %s548_s12, %s681_s12  }
   0x4   : > { %s573_s18 = sadd.s32 1, %s523_s15   ;;  %s91_s19 = sadd.s32 1, %s519_s14 }
   0x5   : > { %s88_s20 = ssub.s32 %s523_s15, %s573_s18  ;;  %p101_p0 = scmp.ne.s32.totalorder %s519_s14, %s515_s13 }
   0x6   : > { %p89_p1 = scmp.eq.s32.totalorder %s88_s20, 0  ;;  %p102_p2 = scmp.eq.s32.totalorder %s569_s16, 1 }
   0x7   : > { %p107_p3 = scmp.ne.s32.totalorder %s515_s13, %s511_s12  ;;  %p108_p4 = scmp.eq.s32.totalorder %s363_s17, 1 }
   0x8   : > { %s584_s21 = scalar_select %p89_p1, %s519_s14, %s91_s19  }
   0x9   : > { %p586_p5 = por %p102_p2, %p101_p0  ;;  %p590_p6 = por %p108_p4, %p107_p3 }
   0xa   : > { %p366_p7 = scmp.ge.s32.totalorder %s523_s15, 1  ;;  %p139_p8 = scmp.lt.s32.totalorder %s523_s15, 3 }
   0xc   : > { %p140_p9 = pnand %p366_p7, %p139_p8 }
   0xd   : > { %p162_p10 = scmp.lt.s32.totalorder (!%p140_p9), %s569_s16, 1  ;;  %v525_v0 = vmov (!%p140_p9), 0.0   ;;  %v451_v1 = vld [vmem:[%s677_s2] sm:$0xff] (!%p140_p9)   ;;  %v452_v2 = vld [vmem:[%s677_s2 + $0x8] sm:$0xff] (!%p140_p9)   ;;  %v453_v5 = vld [vmem:[%s677_s2 + $0x10] sm:$0xff] (!%p140_p9)   ;;  %vm526_vm0 = vmmov (!%p140_p9), 0   ;;  %v179_v14 = vlaneseq (!%p140_p9) }
   0xe   : > { %143 = sbr.rel (%p140_p9) target bundleno = 420 (0x1a4), region = 32  ;;  %390 = vmatprep.subr.bf16.mxu0 (!%p140_p9), %v525_v0  ;;  %v454_v7 = vld [vmem:[%s677_s2 + $0x18] sm:$0xff] (!%p140_p9)   ;;  %v455_v8 = vld [vmem:[%s677_s2 + $0x20] sm:$0xff] (!%p140_p9)   ;;  %406 = vmatprep.mubr.msk.bf16.mxu0 (!%p140_p9), %vm526_vm0, %v525_v0  ;;  %v456_v9 = vld [vmem:[%s677_s2 + $0x28] sm:$0xff] (!%p140_p9)   ;;  %s378_s6 = sshll.u32 (!%p140_p9), %s569_s16, 7 }
   0xf   : > { %391 = vmatpush3.bf16.msra.mxu0 (!%p140_p9), %v451_v1  ;;  %v457_v10 = vld [vmem:[%s677_s2 + $0x30] sm:$0xff] (!%p140_p9)   ;;  %v458_v11 = vld [vmem:[%s677_s2 + $0x38] sm:$0xff] (!%p140_p9)   ;;  %v180_v16 = vshrl.u32 (!%p140_p9), %v179_v14, 7  ;;  %v177_v17 = vld [vmem:[%s676_s1] sm:$0x1] (!%p140_p9)  ;;  %s635_s9 = scalar_lea.hbm (!%p140_p9), %s678_s3, %s378_s6 }
  0x10   : > { %392 = vmatprep.subr.bf16.mxu0 (!%p140_p9), %v525_v0  ;;  %v178_v18 = vunpack.c.l.bf16 (!%p140_p9), %v177_v17 }
  0x11   : > { %v181_v19 = vsub.s32 (!%p140_p9), 0, %v180_v16 }
  0x13   : > { %393 = vmatpush3.bf16.msra.mxu0 (!%p140_p9), %v452_v2  ;;  %v182_v20 = vrot.slane (!%p140_p9), %v178_v18, %v181_v19 }
  0x14   : > { %394 = vmatprep.subr.bf16.mxu0 (!%p140_p9), %v525_v0 }
  0x15   : > { %s163_s26 = scalar_select %p162_p10, %s569_s16, 1 }
  0x16   : > { %s527_s16 = smov [#allocation2]  }
  0x17   : > { %s368_s29 = sshll.u32 %s163_s26, 2  ;;  %395 = vmatpush3.bf16.msra.mxu0 %v453_v5  ;;  %s465_s17 = sshll.u32 %s527_s16, 4  ;;  %s466_s17 = int_to_ptr.vmem [resolvable:$false] %s465_s17 }
  0x18   : > { %s165_s5 = scalar_lea.vmem %s675_s0, %s368_s29  ;;  %396 = vmatprep.subr.bf16.mxu0 %v525_v0  ;;  %s159_s29 = sand.u32 1, %s515_s13  }
  0x19   : > { %v167_v3 = vld [vmem:[%s165_s5] sm:$0xf]  ;;  %s367_s30 = sshll.u32 %s159_s29, 3  ;;  %s291_s10 = scalar_lea.sflag [#allocation3], %s159_s29 }
  0x1a   : > { %v168_v4 = vunpack.c.l.bf16 %v167_v3  ;;  %s161_s4 = scalar_lea.vmem [#allocation2], %s367_s30  ;;  %s467_s19 = scalar_lea.vmem %s466_s17, 256 }
  0x1b   : > { %397 = vmatpush3.bf16.msra.mxu0 %v454_v7  ;;  %s304_s5 = sshll.u32 %s161_s4, 4  ;;  %s630_s5 = int_to_ptr.vmem [resolvable:$true] %s304_s5 }
  0x1c   : > { %v169_v6 = vmul.f32 %v168_v4, %v168_v4  ;;  %398 = vmatprep.subr.bf16.mxu0 %v525_v0  ;;  %s461_s11 = scalar_lea.vmem %s630_s5, 128  ;;  %p468_p0 = scmp.lt.s32.totalorder %s630_s5, %s466_s17 }
  0x1d   : > { %p462_p11 = scmp.ne.s32.totalorder %s630_s5, %s461_s11  ;;  %p469_p1 = scmp.lt.s32.totalorder %s467_s19, %s461_s11 }
  0x1e   : > { %170 = vadd.xlane.f32.xlu0 %v169_v6 }
  0x1f   : > { %399 = vmatpush3.bf16.msra.mxu0 %v455_v8  ;;  %p463_p12 = pnand %p462_p11, %p586_p5  ;;  %p470_p2 = por %p469_p1, %p468_p0 }
  0x20   : > { %400 = vmatprep.subr.bf16.mxu0 %v525_v0 }
  0x21   : > { %p464_p13 = pneg %p463_p12 }
  0x23   : > { %401 = vmatpush3.bf16.msra.mxu0 %v456_v9  ;;  %p471_p3 = pnand %p470_p2, %p464_p13 }
  0x24   : > { %402 = vmatprep.subr.bf16.mxu0 %v525_v0 }
  0x27   : > { %403 = vmatpush3.bf16.msra.mxu0 %v457_v10 }
  0x28   : > { %404 = vmatprep.subr.bf16.mxu0 %v525_v0 }
  0x2b   : > { %405 = vmatpush3.bf16.msra.mxu0 %v458_v11 }
  0xab   : > { %v171_v12 = vpop.xlane.xlu0 %170 }
  0xac   : > { %v173_v13 = vmul.f32 0.0078125, %v171_v12 }
  0xae   : > { %v174_v15 = vadd.f32 1e-06, %v173_v13 }
  0xb0   : > { %459 = vrsqrt.f32 %v174_v15 }
  0xba   : > { %v460_v21 = vpop.eup %459 }
  0xbb   : > { %v176_v22 = vmul.f32 %v460_v21, %v168_v4 }
  0xbd   : > { %v183_v23 = vmul.f32 %v182_v20, %v176_v22 }
  0xbf   : > { %v184_v24 = vpack.c.bf16 %v183_v23, %v183_v23 }
  0xc1   : > { %407 = vmatmul.mubr.bf16.vlgmr.msra.gmra.mrb[0].mxu0 %v184_v24 }
 0x194   : > { %v283_v25 = vpop.f32.mrb[0].mxu0 }
 0x195   : > { %289 = vst [vmem:[%s161_s4] sm:$0xff] %v283_v25  ;;  %v408_v26 = vpop.f32.mrb[1].mxu0 }
 0x196   : > { %v286_v27 = vpop.f32.mrb[2].mxu0 }
 0x197   : > { %474 = shalt.err (!%p471_p3)
}
 0x198   : > { %s475_s20 = scalar_lea.hbm %s635_s9, 128  ;;  %s479_s26 = scalar_lea.hbm %s678_s3, 256 }
 0x199   : > { %p476_p4 = scmp.ne.s32.totalorder %s635_s9, %s475_s20  ;;  %p480_p9 = scmp.lt.u32.totalorder %s635_s9, %s678_s3 }
 0x19a   : > { %p481_p10 = scmp.lt.u32.totalorder %s479_s26, %s475_s20  ;;  %p483_p12 = scmp.lt.u32.totalorder %s475_s20, %s635_s9 }
 0x19b   : > { %p477_p7 = pnand %p476_p4, %p586_p5 }
 0x19c   : > { %p482_p11 = por %p481_p10, %p480_p9 }
 0x19d   : > { %p478_p8 = pneg %p477_p7 }
 0x19e   : > { %p484_p13 = por %p483_p12, %p482_p11 }
 0x1a0   : > { %p485_p0 = pnand %p484_p13, %p478_p8 }
 0x1a2   : > { %488 = shalt.err (!%p485_p0)
}
 0x1a3   : > { %410 = dma.vmem_to_hbm [thread:$0]  (%p586_p5), %s630_s5, 128, %s635_s9, %s291_s10   ;;  %v409_v28 = vpop.f32.mrb[3].mxu0 }
 0x1a4 PF: > { %p416_p1 = scmp.ge.s32.totalorder %s523_s15, 2  ;;  %s316_s29 = sand.u32 1, %s511_s12  }
 0x1a5   : > { %s317_s30 = scalar_lea.sflag [#allocation3], %s316_s29 }
 0x1a6   : > { %p413_p2 = pnand %p416_p1, %p590_p6 }
 0x1a8   : > { %506 = dma.done.wait (!%p413_p2), %s317_s30, 128  }
 0x1a9   : > { %508 = vsyncadd (!%p413_p2), %s317_s30, 4294967168  ;;  %p13_p3 = scmp.ge.s32.totalorder %s573_s18, 4   ;;  %s681_s12 = smov %s515_s13 }
 0x1aa   : > { %s682_s13 = smov %s519_s14  ;;  %s683_s14 = smov %s584_s21 }
 0x1ab   : > { %s684_s15 = smov %s573_s18  ;;  %15 = sbr.rel (!%p13_p3) target bundleno = 3 (0x3), region = 67 }
 0x1b2   :  { %322 = vsyncpa [#allocation3], 1 }
 0x1b3   :  { %324 = vsyncpa [#allocation3 + $0x1], 1 }

// kernel: qwen_detection_forward.6
= control target key start
LH: loop header
LB: loop body
LE: loop exit
PB: predicated region body
PF: predicated region fallthrough
CT: control target
= control target key end

     0   :  { %s926_s15 = smov 0   ;;  %s1103_s0 = inlined_call_operand.vmem [shape: bf16[16,128], index: 0, kind: input, shape index: {}, may-alias: {0,4}]   ;;  %s1104_s1 = inlined_call_operand.vmem [shape: bf16[1,128], index: 1, kind: input, shape index: {}]   ;;  %s1105_s2 = inlined_call_operand.vmem [shape: bf16[128,512], index: 2, kind: input, shape index: {}]   ;;  %s1106_s3 = inlined_call_operand.vmem [shape: bf16[256,128], index: 3, kind: input, shape index: {}]   ;;  %s1107_s4 = inlined_call_operand.vmem [shape: bf16[16,128], index: 4, kind: output, shape index: {}, may-alias: {0,4}]  }
   0x1 LB: > { %s728_s16 = sadd.s32 4294967295, %s898_s15   ;;  %p732_p0 = scmp.ge.s32.totalorder %s898_s15, 1  ;;  %s898_s15 = sphi %s926_s15, %s14_s15  }
   0x2   : > { %p161_p1 = scmp.lt.s32.totalorder %s898_s15, 3 }
   0x4   : > { %p162_p2 = pnand %p732_p0, %p161_p1 }
   0x5   : > { %p185_p3 = scmp.lt.s32.totalorder (!%p162_p2), %s728_s16, 1  ;;  %v818_v0 = vld [vmem:[%s1105_s2 + $0x4] ss:$16 sps:$4 sm:$0xff] (!%p162_p2)   ;;  %v820_v1 = vld [vmem:[%s1105_s2 + $0xc] ss:$16 sps:$4 sm:$0xff] (!%p162_p2)   ;;  %v900_v29 = vmov (!%p162_p2), 0   ;;  %v206_v38 = vlaneseq (!%p162_p2) }
   0x6   : > { %165 = sbr.rel (%p162_p2) target bundleno = 650 (0x28a), region = 36  ;;  %404 = vmatprep.subr.bf16.mxu0 (!%p162_p2), %v818_v0  ;;  %v822_v2 = vld [vmem:[%s1105_s2] ss:$16 sps:$4 sm:$0xff] (!%p162_p2)   ;;  %v823_v3 = vld [vmem:[%s1105_s2 + $0x8] ss:$16 sps:$4 sm:$0xff] (!%p162_p2)   ;;  %445 = vmatprep.subr.bf16.mxu1 (!%p162_p2), %v820_v1 }
   0x7   : > { %v824_v4 = vld [vmem:[%s1105_s2 + $0x24] ss:$16 sps:$4 sm:$0xff] (!%p162_p2)   ;;  %405 = vmatpush1.bf16.msra.mxu0 (!%p162_p2), %v822_v2  ;;  %446 = vmatpush1.bf16.msra.mxu1 (!%p162_p2), %v823_v3  ;;  %v826_v5 = vld [vmem:[%s1105_s2 + $0x2c] ss:$16 sps:$4 sm:$0xff] (!%p162_p2)   ;;  %v828_v6 = vld [vmem:[%s1105_s2 + $0x20] ss:$16 sps:$4 sm:$0xff] (!%p162_p2)  }
   0x8   : > { %406 = vmatprep.subr.bf16.mxu0 (!%p162_p2), %v824_v4  ;;  %v829_v7 = vld [vmem:[%s1105_s2 + $0x28] ss:$16 sps:$4 sm:$0xff] (!%p162_p2)   ;;  %447 = vmatprep.subr.bf16.mxu1 (!%p162_p2), %v826_v5  ;;  %v830_v9 = vld [vmem:[%s1105_s2 + $0x44] ss:$16 sps:$4 sm:$0xff] (!%p162_p2)   ;;  %v832_v11 = vld [vmem:[%s1105_s2 + $0x4c] ss:$16 sps:$4 sm:$0xff] (!%p162_p2)  }
   0x9   : > { %v834_v12 = vld [vmem:[%s1105_s2 + $0x40] ss:$16 sps:$4 sm:$0xff] (!%p162_p2)   ;;  %v835_v13 = vld [vmem:[%s1105_s2 + $0x48] ss:$16 sps:$4 sm:$0xff] (!%p162_p2)   ;;  %v836_v15 = vld [vmem:[%s1105_s2 + $0x64] ss:$16 sps:$4 sm:$0xff] (!%p162_p2)   ;;  %436 = vmatprep.mubr.bf16.mxu0 (!%p162_p2), %v900_v29  ;;  %477 = vmatprep.mubr.bf16.mxu1 (!%p162_p2), %v900_v29 }
   0xa   : > { %v838_v16 = vld [vmem:[%s1105_s2 + $0x6c] ss:$16 sps:$4 sm:$0xff] (!%p162_p2)   ;;  %v840_v17 = vld [vmem:[%s1105_s2 + $0x60] ss:$16 sps:$4 sm:$0xff] (!%p162_p2)   ;;  %v841_v18 = vld [vmem:[%s1105_s2 + $0x68] ss:$16 sps:$4 sm:$0xff] (!%p162_p2)  }
   0xb   : > { %407 = vmatpush1.bf16.msra.mxu0 (!%p162_p2), %v828_v6  ;;  %448 = vmatpush1.bf16.msra.mxu1 (!%p162_p2), %v829_v7  ;;  %v842_v19 = vld [vmem:[%s1105_s2 + $0x84] ss:$16 sps:$4 sm:$0xff] (!%p162_p2)   ;;  %v844_v20 = vld [vmem:[%s1105_s2 + $0x8c] ss:$16 sps:$4 sm:$0xff] (!%p162_p2)   ;;  %v846_v21 = vld [vmem:[%s1105_s2 + $0x80] ss:$16 sps:$4 sm:$0xff] (!%p162_p2)  }
   0xc   : > { %408 = vmatprep.subr.bf16.mxu0 (!%p162_p2), %v830_v9  ;;  %449 = vmatprep.subr.bf16.mxu1 (!%p162_p2), %v832_v11  ;;  %v847_v22 = vld [vmem:[%s1105_s2 + $0x88] ss:$16 sps:$4 sm:$0xff] (!%p162_p2)   ;;  %v848_v23 = vld [vmem:[%s1105_s2 + $0xa4] ss:$16 sps:$4 sm:$0xff] (!%p162_p2)   ;;  %v850_v24 = vld [vmem:[%s1105_s2 + $0xac] ss:$16 sps:$4 sm:$0xff] (!%p162_p2)  }
   0xd   : > { %s1109_s16 = smov (!%p185_p3, %s728_s16), 1  ;;  %v852_v25 = vld [vmem:[%s1105_s2 + $0xa0] ss:$16 sps:$4 sm:$0xff]   ;;  %v853_v26 = vld [vmem:[%s1105_s2 + $0xa8] ss:$16 sps:$4 sm:$0xff]   ;;  %v207_v40 = vshrl.u32 %v206_v38, 7 }
   0xe   : > { %s733_s27 = sshll.u32 %s1109_s16, 2  ;;  %v854_v27 = vld [vmem:[%s1105_s2 + $0xc4] ss:$16 sps:$4 sm:$0xff]   ;;  %v856_v28 = vld [vmem:[%s1105_s2 + $0xcc] ss:$16 sps:$4 sm:$0xff]  }
   0xf   : > { %s188_s8 = scalar_lea.vmem %s1103_s0, %s733_s27  ;;  %409 = vmatpush1.bf16.msra.mxu0 %v834_v12  ;;  %450 = vmatpush1.bf16.msra.mxu1 %v835_v13  ;;  %v858_v30 = vld [vmem:[%s1105_s2 + $0xc0] ss:$16 sps:$4 sm:$0xff]   ;;  %v859_v31 = vld [vmem:[%s1105_s2 + $0xc8] ss:$16 sps:$4 sm:$0xff]   ;;  %v860_v32 = vld [vmem:[%s1105_s2 + $0xe4] ss:$16 sps:$4 sm:$0xff]   ;;  %s192_s29 = scalar_lea.vmem %s1107_s4, %s733_s27 }
  0x10   : > { %v194_v8 = vld [vmem:[%s188_s8] sm:$0xf]  ;;  %410 = vmatprep.subr.bf16.mxu0 %v836_v15  ;;  %451 = vmatprep.subr.bf16.mxu1 %v838_v16  ;;  %v862_v33 = vld [vmem:[%s1105_s2 + $0xec] ss:$16 sps:$4 sm:$0xff]   ;;  %v865_v35 = vld [vmem:[%s1105_s2 + $0xe8] ss:$16 sps:$4 sm:$0xff]  }
  0x11   : > { %v969_v10 = vunpack.c.l.bf16 %v194_v8  ;;  %v864_v34 = vld [vmem:[%s1105_s2 + $0xe0] ss:$16 sps:$4 sm:$0xff]   ;;  %v208_v43 = vsub.s32 0, %v207_v40  ;;  %v868_v51 = vld [vmem:[%s1106_s3 + $0x48] sm:$0xff]   ;;  %v872_v55 = vld [vmem:[%s1106_s3 + $0x58] sm:$0xff]  }
  0x12   : > { %v204_v41 = vld [vmem:[%s1104_s1] sm:$0x1]  ;;  %v869_v52 = vld [vmem:[%s1106_s3 + $0x8] sm:$0xff]   ;;  %v870_v53 = vld [vmem:[%s1106_s3 + $0x50] sm:$0xff]  }
  0x13   : > { %v196_v14 = vmul.f32 %v969_v10, %v969_v10  ;;  %411 = vmatpush1.bf16.msra.mxu0 %v840_v17  ;;  %452 = vmatpush1.bf16.msra.mxu1 %v841_v18  ;;  %v205_v42 = vunpack.c.l.bf16 %v204_v41  ;;  %v866_v49 = vld [vmem:[%s1106_s3 + $0x40] sm:$0xff]   ;;  %v871_v54 = vld [vmem:[%s1106_s3 + $0x10] sm:$0xff]   ;;  %v873_v56 = vld [vmem:[%s1106_s3 + $0x18] sm:$0xff]  }
  0x14   : > { %412 = vmatprep.subr.bf16.mxu0 %v842_v19  ;;  %453 = vmatprep.subr.bf16.mxu1 %v844_v20  ;;  %v867_v50 = vld [vmem:[%s1106_s3] sm:$0xff]   ;;  %v876_v59 = vld [vmem:[%s1106_s3 + $0x68] sm:$0xff]   ;;  %v878_v61 = vld [vmem:[%s1106_s3 + $0x70] sm:$0xff]  }
  0x15   : > { %197 = vadd.xlane.f32.xlu0 %v196_v14  ;;  %v209_v44 = vrot.slane %v205_v42, %v208_v43  ;;  %v874_v57 = vld [vmem:[%s1106_s3 + $0x60] sm:$0xff]   ;;  %v877_v60 = vld [vmem:[%s1106_s3 + $0x28] sm:$0xff]   ;;  %v879_v62 = vld [vmem:[%s1106_s3 + $0x30] sm:$0xff]  }
  0x16   : > { %v875_v58 = vld [vmem:[%s1106_s3 + $0x20] sm:$0xff]   ;;  %v880_v63 = vld [vmem:[%s1106_s3 + $0x78] sm:$0xff]  }
  0x17   : > { %413 = vmatpush1.bf16.msra.mxu0 %v846_v21  ;;  %454 = vmatpush1.bf16.msra.mxu1 %v847_v22  ;;  %v881_v0 = vld [vmem:[%s1106_s3 + $0x38] sm:$0xff]  }
  0x18   : > { %414 = vmatprep.subr.bf16.mxu0 %v848_v23  ;;  %455 = vmatprep.subr.bf16.mxu1 %v850_v24 }
  0x1b   : > { %415 = vmatpush1.bf16.msra.mxu0 %v852_v25  ;;  %456 = vmatpush1.bf16.msra.mxu1 %v853_v26 }
  0x1c   : > { %416 = vmatprep.subr.bf16.mxu0 %v854_v27  ;;  %457 = vmatprep.subr.bf16.mxu1 %v856_v28 }
  0x1f   : > { %417 = vmatpush1.bf16.msra.mxu0 %v858_v30  ;;  %458 = vmatpush1.bf16.msra.mxu1 %v859_v31 }
  0x20   : > { %418 = vmatprep.subr.bf16.mxu0 %v860_v32  ;;  %459 = vmatprep.subr.bf16.mxu1 %v862_v33 }
  0x23   : > { %419 = vmatpush1.bf16.msra.mxu0 %v864_v34  ;;  %460 = vmatpush1.bf16.msra.mxu1 %v865_v35 }
  0x24   : > { %787 = vmatprep.subr.bf16.mxu0 %v866_v49 }
  0xa2   : > { %v198_v36 = vpop.xlane.xlu0 %197 }
  0xa3   : > { %v200_v37 = vmul.f32 0.0078125, %v198_v36 }
  0xa5   : > { %v201_v39 = vadd.f32 1e-06, %v200_v37 }
  0xa7   : > { %882 = vrsqrt.f32 %v201_v39 }
  0xb1   : > { %v883_v45 = vpop.eup %882 }
  0xb2   : > { %v203_v46 = vmul.f32 %v883_v45, %v969_v10 }
  0xb4   : > { %v210_v47 = vmul.f32 %v209_v44, %v203_v46 }
  0xb6   : > { %v211_v48 = vpack.c.bf16 %v210_v47, %v210_v47 }
  0xb8   : > { %437 = vmatmul.mubr.bf16.vlgmr.msra.gmra.mrb[0].mxu0 %v211_v48  ;;  %478 = vmatmul.mubr.bf16.vlgmr.msra.gmra.mrb[0].mxu1 %v211_v48 }
  0xb9   : > { %788 = vmatpush3.bf16.msra.mxu0 %v867_v50 }
  0xba   : > { %789 = vmatprep.subr.bf16.mxu0 %v868_v51 }
  0xbd   : > { %790 = vmatpush3.bf16.msra.mxu0 %v869_v52 }
  0xbe   : > { %791 = vmatprep.subr.bf16.mxu0 %v870_v53 }
  0xc1   : > { %792 = vmatpush3.bf16.msra.mxu0 %v871_v54 }
  0xc2   : > { %793 = vmatprep.subr.bf16.mxu0 %v872_v55 }
  0xc5   : > { %794 = vmatpush3.bf16.msra.mxu0 %v873_v56 }
  0xc6   : > { %795 = vmatprep.subr.bf16.mxu0 %v874_v57 }
  0xc9   : > { %796 = vmatpush3.bf16.msra.mxu0 %v875_v58 }
  0xca   : > { %797 = vmatprep.subr.bf16.mxu0 %v876_v59 }
  0xcd   : > { %798 = vmatpush3.bf16.msra.mxu0 %v877_v60 }
  0xce   : > { %799 = vmatprep.subr.bf16.mxu0 %v878_v61 }
  0xd1   : > { %800 = vmatpush3.bf16.msra.mxu0 %v879_v62 }
  0xd2   : > { %801 = vmatprep.subr.bf16.mxu0 %v880_v63 }
  0xd5   : > { %802 = vmatpush3.bf16.msra.mxu0 %v881_v0 }
 0x18b   : > { %v438_v1 = vpop.f32.mrb[0].mxu0  ;;  %v479_v2 = vpop.f32.mrb[0].mxu1 }
 0x18c   : > { %v767_v3 = vmul.f32 -1.442695, %v438_v1  ;;  %v440_v4 = vpop.f32.mrb[1].mxu0  ;;  %v481_v5 = vpop.f32.mrb[1].mxu1 }
 0x18d   : > { %v768_v6 = vmul.f32 -1.442695, %v440_v4  ;;  %v442_v7 = vpop.f32.mrb[2].mxu0  ;;  %v483_v8 = vpop.f32.mrb[2].mxu1 }
 0x18e   : > { %884 = vpow2.f32 %v767_v3  ;;  %v443_v9 = vpop.f32.mrb[3].mxu0  ;;  %v484_v11 = vpop.f32.mrb[3].mxu1 }
 0x18f   : > { %886 = vpow2.f32 %v768_v6 }
 0x198   : > { %v885_v12 = vpop.eup %884 }
 0x199   : > { %v887_v13 = vpop.eup %886  ;;  %v492_v14 = vadd.f32 1.0, %v885_v12 }
 0x19a   : > { %v493_v15 = vadd.f32 1.0, %v887_v13 }
 0x19b   : > { %888 = vrcp.f32 %v492_v14 }
 0x19c   : > { %890 = vrcp.f32 %v493_v15 }
 0x1a5   : > { %v889_v16 = vpop.eup %888 }
 0x1a6   : > { %v891_v17 = vpop.eup %890  ;;  %v498_v18 = vmul.f32 %v889_v16, %v438_v1 }
 0x1a7   : > { %v499_v19 = vmul.f32 %v891_v17, %v440_v4 }
 0x1a8   : > { %v500_v20 = vmul.f32 %v498_v18, %v479_v2 }
 0x1a9   : > { %v501_v21 = vmul.f32 %v499_v19, %v481_v5 }
 0x1aa   : > { %v502_v23 = vpack.c.bf16 %v500_v20, %v500_v20 }
 0x1ab   : > { %v503_v22 = vpack.c.bf16 %v501_v21, %v501_v21 }
 0x1ad   : > { %664 = vmatprep.mubr.bf16.mxu0 %v503_v22 }
 0x1ae   : > { %665 = vmatmul.mubr.bf16.vlgmr.msra.gmra.mrb[4].mxu0 %v502_v23 }
 0x281   : > { %v803_v24 = vpop.f32.mrb[4].mxu0 }
 0x282   : > { %v804_v25 = vpop.f32.mrb[5].mxu0 }
 0x283   : > { %v805_v26 = vadd.f32 %v804_v25, %v803_v24  ;;  %v806_v27 = vpop.f32.mrb[6].mxu0 }
 0x284   : > { %v807_v28 = vpop.f32.mrb[7].mxu0 }
 0x285   : > { %v672_v29 = vadd.f32 %v805_v26, %v969_v10 }
 0x287   : > { %v673_v30 = vpack.c.bf16 %v672_v29, %v672_v29 }
 0x289   : > { %674 = vst [vmem:[%s192_s29] sm:$0xf] %v673_v30 }
 0x28a PF: > { %s14_s15 = sadd.s32 1, %s898_s15  }
 0x28b   : > { %p11_p4 = scmp.ge.s32.totalorder %s14_s15, 4  }
 0x28d   :  { %13 = sbr.rel (!%p11_p4) target bundleno = 1 (0x1), region = 66 }

// kernel: qwen_detection_forward.7
= control target key start
LH: loop header
LB: loop body
LE: loop exit
PB: predicated region body
PF: predicated region fallthrough
CT: control target
= control target key end

     0   :  { %s3130_s24 = smov 0   ;;  %s3876_s0 = inlined_call_operand.vmem [shape: bf16[16,128], index: 0, kind: input, shape index: {}, may-alias: {0,7}]   ;;  %s3877_s1 = inlined_call_operand.vmem [shape: bf16[1,128], index: 1, kind: input, shape index: {}]   ;;  %s3878_s2 = inlined_call_operand.vmem [shape: bf16[128,256], index: 2, kind: input, shape index: {}]   ;;  %s3879_s3 = inlined_call_operand.vmem [shape: bf16[1,256], index: 3, kind: input, shape index: {}]   ;;  %s3880_s4 = inlined_call_operand.vmem [shape: f32[8,32], index: 4, kind: input, shape index: {}]   ;;  %s3881_s5 = inlined_call_operand.vmem [shape: f32[8,32], index: 5, kind: input, shape index: {}]   ;;  %s3882_s6 = inlined_call_operand.vmem [shape: bf16[128,128], index: 6, kind: input, shape index: {}]   ;;  %s3883_s7 = inlined_call_operand.vmem [shape: bf16[16,128], index: 7, kind: output, shape index: {}, may-alias: {0,7}]  }
   0x1 LB: > { %s2844_s25 = sadd.s32 4294967295, %s3077_s24   ;;  %p2848_p0 = scmp.ge.s32.totalorder %s3077_s24, 1  ;;  %s3077_s24 = sphi %s3130_s24, %s17_s24  }
   0x2   : > { %p236_p1 = scmp.lt.s32.totalorder %s3077_s24, 3 }
   0x4   : > { %p237_p2 = pnand %p2848_p0, %p236_p1 }
   0x6   : > { %240 = sbr.rel (%p237_p2) target bundleno = 1860 (0x744), region = 48 }
   0xd   : > { %p266_p3 = scmp.lt.s32.totalorder %s2844_s25, 1  ;;  %v3019_v0 = vld [vmem:[%s3878_s2 + $0x4] ss:$8 sps:$4 sm:$0xff]   ;;  %v3021_v1 = vld [vmem:[%s3878_s2] ss:$8 sps:$4 sm:$0xff]   ;;  %v3885_v16 = vmov 0   ;;  %v3884_v22 = vlaneseq }
   0xe   : > { %410 = vmatprep.subr.bf16.mxu0 %v3019_v0  ;;  %v3022_v2 = vld [vmem:[%s3878_s2 + $0x14] ss:$8 sps:$4 sm:$0xff]   ;;  %v3024_v3 = vld [vmem:[%s3878_s2 + $0x10] ss:$8 sps:$4 sm:$0xff]   ;;  %v3025_v4 = vld [vmem:[%s3878_s2 + $0x24] ss:$8 sps:$4 sm:$0xff]   ;;  %442 = vmatprep.mubr.bf16.mxu0 %v3885_v16 }
   0xf   : > { %s3896_s25 = smov (!%p266_p3, %s2844_s25), 1  ;;  %411 = vmatpush1.bf16.msra.mxu0 %v3021_v1  ;;  %v3027_v5 = vld [vmem:[%s3878_s2 + $0x20] ss:$8 sps:$4 sm:$0xff]   ;;  %v3028_v9 = vld [vmem:[%s3878_s2 + $0x34] ss:$8 sps:$4 sm:$0xff]   ;;  %v3200_v24 = vshrl.u32 %v3884_v22, 7 }
  0x10   : > { %s2849_s13 = sshll.u32 %s3896_s25, 2  ;;  %412 = vmatprep.subr.bf16.mxu0 %v3022_v2  ;;  %v3030_v10 = vld [vmem:[%s3878_s2 + $0x30] ss:$8 sps:$4 sm:$0xff]   ;;  %v3031_v11 = vld [vmem:[%s3878_s2 + $0x44] ss:$8 sps:$4 sm:$0xff]   ;;  %v3887_v33 = vmov 0.0  }
  0x11   : > { %s269_s16 = scalar_lea.vmem %s3876_s0, %s2849_s13  ;;  %v3033_v12 = vld [vmem:[%s3878_s2 + $0x40] ss:$8 sps:$4 sm:$0xff]   ;;  %v3034_v13 = vld [vmem:[%s3878_s2 + $0x54] ss:$8 sps:$4 sm:$0xff]   ;;  %v3036_v14 = vld [vmem:[%s3878_s2 + $0x50] ss:$8 sps:$4 sm:$0xff]   ;;  %2932 = vmatprep.subr.bf16.mxu1 %v3887_v33 }
  0x12   : > { %v275_v6 = vld [vmem:[%s269_s16] sm:$0xf]  ;;  %v3037_v15 = vld [vmem:[%s3878_s2 + $0x64] ss:$8 sps:$4 sm:$0xff]   ;;  %v3040_v18 = vld [vmem:[%s3878_s2 + $0x74] ss:$8 sps:$4 sm:$0xff]  }
  0x13   : > { %v3164_v7 = vunpack.c.l.bf16 %v275_v6  ;;  %413 = vmatpush1.bf16.msra.mxu0 %v3024_v3  ;;  %v3039_v17 = vld [vmem:[%s3878_s2 + $0x60] ss:$8 sps:$4 sm:$0xff]   ;;  %v3042_v19 = vld [vmem:[%s3878_s2 + $0x70] ss:$8 sps:$4 sm:$0xff]   ;;  %v3206_v27 = vsub.s32 0, %v3200_v24  ;;  %v318_v36 = vsub.s32 2, %v3200_v24 }
  0x14   : > { %414 = vmatprep.subr.bf16.mxu0 %v3025_v4  ;;  %v285_v25 = vld [vmem:[%s3877_s1] sm:$0x1]  ;;  %s3081_s23 = smov 96   ;;  %s3082_s26 = smov 64   ;;  %v3084_v47 = vmov 1983009808  }
  0x15   : > { %3890 = vst [vmem:[#allocation2_spill] sm:$0xff] %v3164_v7  ;;  %v277_v8 = vmul.f32 %v3164_v7, %v3164_v7  ;;  %v286_v26 = vunpack.c.l.bf16 %v285_v25  ;;  %v309_v34 = vld [vmem:[%s3879_s3] sm:$0x3]  ;;  %s3083_s27 = smov 32   ;;  %v566_v48 = vunpack.c.l.s4 %v3084_v47  ;;  %v3085_v50 = vmov 1934713408  }
  0x16   : > { %v310_v35 = vunpack.c.l.bf16 %v309_v34  ;;  %v598_v51 = vunpack.c.l.s4 %v3085_v50  ;;  %s3086_s28 = smov 16   ;;  %s3087_s29 = smov 112   ;;  %vm3088_vm0 = vmmov 0   ;;  %vm893_vm1 = vcmask 130048  }
  0x17   : > { %278 = vadd.xlane.f32.xlu0 %v277_v8  ;;  %415 = vmatpush1.bf16.msra.mxu0 %v3027_v5  ;;  %v290_v28 = vrot.slane %v286_v26, %v3206_v27  ;;  %v567_v49 = vunpack.c.0.s8 %v566_v48  ;;  %vm1932_vm2 = vcmask 261120   ;;  %vm2200_vm4 = vcmask 64512  }
  0x18   : > { %416 = vmatprep.subr.bf16.mxu0 %v3028_v9  ;;  %v315_v37 = vrot.slane %v310_v35, %v3206_v27  ;;  %v319_v38 = vrot.slane %v310_v35, %v318_v36  ;;  %v599_v53 = vunpack.c.0.s8 %v598_v51  ;;  %2934 = vmatprep.mubr.msk.bf16.mxu1 %vm3088_vm0, %v3887_v33  ;;  %vm2276_vm5 = vcmask 1043456  }
  0x19   : > { %v3227_v52 = vsub.s32 %v567_v49, %v3200_v24  ;;  %vm2679_vm6 = vcmask 523264   ;;  %vm2681_vm7 = vcmask 785408  }
  0x1a   : > { %v325_v39 = vrot.slane %v315_v37, %v3206_v27  ;;  %v329_v40 = vrot.slane %v319_v38, %v3206_v27  ;;  %v3238_v59 = vsub.s32 %v599_v53, %v3200_v24 }
  0x1b   : > { %417 = vmatpush1.bf16.msra.mxu0 %v3030_v10 }
  0x1c   : > { %418 = vmatprep.subr.bf16.mxu0 %v3031_v11 }
  0x1f   : > { %419 = vmatpush1.bf16.msra.mxu0 %v3033_v12 }
  0x20   : > { %420 = vmatprep.subr.bf16.mxu0 %v3034_v13 }
  0x23   : > { %421 = vmatpush1.bf16.msra.mxu0 %v3036_v14 }
  0x24   : > { %422 = vmatprep.subr.bf16.mxu0 %v3037_v15 }
  0x27   : > { %423 = vmatpush1.bf16.msra.mxu0 %v3039_v17 }
  0x28   : > { %424 = vmatprep.subr.bf16.mxu0 %v3040_v18 }
  0x2b   : > { %425 = vmatpush1.bf16.msra.mxu0 %v3042_v19 }
  0x2c   : > { %2980 = vmatprep.subr.bf16.mxu0 %v3887_v33 }
  0xa4   : > { %v279_v20 = vpop.xlane.xlu0 %278 }
  0xa5   : > { %v281_v21 = vmul.f32 0.0078125, %v279_v20 }
  0xa7   : > { %v282_v23 = vadd.f32 1e-06, %v281_v21 }
  0xa9   : > { %3053 = vrsqrt.f32 %v282_v23 }
  0xb3   : > { %v3054_v29 = vpop.eup %3053 }
  0xb4   : > { %v284_v30 = vmul.f32 %v3054_v29, %v3164_v7 }
  0xb6   : > { %v291_v31 = vmul.f32 %v290_v28, %v284_v30 }
  0xb8   : > { %v292_v32 = vpack.c.bf16 %v291_v31, %v291_v31 }
  0xba   : > { %443 = vmatmul.mubr.bf16.vlgmr.msra.gmra.mrb[0].mxu0 %v292_v32 }
  0xbb   : > { %2996 = vmatprep.mubr.msk.bf16.mxu0 %vm3088_vm0, %v3887_v33 }
 0x18d   : > { %v444_v41 = vpop.f32.mrb[0].mxu0 }
 0x18e   : > { %v445_v42 = vadd.f32 %v444_v41, %v325_v39  ;;  %v446_v43 = vpop.f32.mrb[1].mxu0 }
 0x18f   : > { %v3219_v44 = vadd.f32 %v446_v43, %v329_v40  ;;  %v448_v45 = vpop.f32.mrb[2].mxu0 }
 0x190   : > { %v449_v46 = vpop.f32.mrb[3].mxu0  ;;  %554 = vrot.lane.b32.xlu1 %v445_v42, %s3081_s23 }
 0x191   : > { %632 = vrot.lane.b32.xlu0 %v3219_v44, %s3081_s23  ;;  %v642_v56 = vrot.slane %v3219_v44, %v3227_v52  ;;  %v635_v60 = vcombine.high %v3219_v44, %v3887_v33 }
 0x193   : > { %v649_v2 = vrot.slane %v635_v60, %v3227_v52 }
 0x194   : > { %557 = vrot.lane.b32.xlu1 %v445_v42, %s3082_s26 }
 0x198   : > { %560 = vrot.lane.b32.xlu1 %v445_v42, %s3083_s27 }
 0x202   : > { %v555_v54 = vpop.permute.xlu1 %554 }
 0x203   : > { %v3229_v55 = vpop.permute.xlu0 %632 }
 0x204   : > { %v650_v57 = vcombine.high %v3229_v55, %v3887_v33  ;;  %v657_v58 = vrot.slane %v3229_v55, %v3227_v52 }
 0x206   : > { %v665_v61 = vcombine.low %v642_v56, %v657_v58  ;;  %v666_v62 = vcombine.high %v642_v56, %v657_v58  ;;  %v558_v63 = vpop.permute.xlu1 %557  ;;  %v664_v0 = vrot.slane %v650_v57, %v3227_v52  ;;  %v3089_v58 = vmov 1966171168  }
 0x207   : > { %v563_v3 = vcombine.low %v445_v42, %v558_v63  ;;  %v564_v18 = vcombine.high %v445_v42, %v558_v63  ;;  %v455_v60 = vunpack.c.l.s4 %v3089_v58  ;;  %v451_v63 = vld [vmem:[%s3880_s4] sm:$0xff] }
 0x208   : > { %v3244_v1 = vrot.slane %v665_v61, %v3238_v59  ;;  %v3251_v6 = vrot.slane %v666_v62, %v3238_v59  ;;  %v681_v9 = vcombine.low %v649_v2, %v664_v0  ;;  %v682_v13 = vcombine.high %v649_v2, %v664_v0  ;;  %v502_v0 = vld [vmem:[%s3881_s5] sm:$0xff] }
 0x209   : > { %v571_v11 = vrot.slane %v563_v3, %v3227_v52  ;;  %v578_v26 = vrot.slane %v564_v18, %v3227_v52  ;;  %v456_v61 = vunpack.c.0.s8 %v455_v60  ;;  %v504_v60 = vcombine.high %v502_v0, %v502_v0 }
 0x20a   : > { %1030 = vrot.lane.b32.xlu0 %v3244_v1, %s3086_s28  ;;  %v561_v4 = vpop.permute.xlu1 %560  ;;  %v982_v5 = vsub.f32 0.0, %v3244_v1  ;;  %v984_v12 = vsub.f32 0.0, %v3251_v6  ;;  %v3261_v17 = vrot.slane %v681_v9, %v3238_v59  ;;  %v3267_v19 = vcombine.high %v3244_v1, %v3887_v33 }
 0x20b   : > { %v579_v8 = vcombine.low %v555_v54, %v561_v4  ;;  %v580_v14 = vcombine.high %v555_v54, %v561_v4  ;;  %v3276_v25 = vrot.slane %v682_v13, %v3238_v59  ;;  %v3283_v28 = vcombine.high %v3251_v6, %v3887_v33 }
 0x20c   : > { %998 = vrot.lane.b32.xlu1 %v982_v5, %s3087_s29  ;;  %v983_v32 = vsub.f32 0.0, %v3267_v19  ;;  %v3305_v38 = vcombine.high %v3261_v17, %v3887_v33  ;;  %v986_v40 = vsub.f32 0.0, %v3261_v17  ;;  %v3373_v62 = vsub.s32 %v456_v61, %v3200_v24 }
 0x20d   : > { %v587_v10 = vrot.slane %v579_v8, %v3227_v52  ;;  %v594_v20 = vrot.slane %v580_v14, %v3227_v52  ;;  %v985_v36 = vsub.f32 0.0, %v3283_v28  ;;  %v3313_v41 = vcombine.high %v3276_v25, %v3887_v33 }
 0x20e   : > { %1034 = vrot.lane.b32.xlu0 %v3251_v6, %s3086_s28  ;;  %v988_v45 = vsub.f32 0.0, %v3276_v25  ;;  %v987_v53 = vsub.f32 0.0, %v3305_v38  ;;  %v460_v2 = vrot.slane %v451_v63, %v3373_v62  ;;  %v511_v3 = vrot.slane %v502_v0, %v3373_v62 }
 0x20f   : > { %v595_v15 = vcombine.low %v571_v11, %v587_v10  ;;  %v596_v21 = vcombine.high %v571_v11, %v587_v10  ;;  %v611_v30 = vcombine.low %v578_v26, %v594_v20  ;;  %v612_v39 = vcombine.high %v578_v26, %v594_v20 }
 0x210   : > { %1002 = vrot.lane.b32.xlu1 %v984_v12, %s3087_s29  ;;  %v989_v54 = vsub.f32 0.0, %v3313_v41  ;;  %v476_v4 = vrot.slane %v460_v2, %v3373_v62  ;;  %v527_v5 = vrot.slane %v511_v3, %v3373_v62 }
 0x211   : > { %v3271_v23 = vrot.slane %v595_v15, %v3238_v59  ;;  %v3286_v29 = vrot.slane %v596_v21, %v3238_v59  ;;  %v3294_v34 = vrot.slane %v611_v30, %v3238_v59  ;;  %v3320_v43 = vrot.slane %v612_v39, %v3238_v59 }
 0x212   : > { %1038 = vrot.lane.b32.xlu0 %v3261_v17, %s3086_s28  ;;  %v498_v8 = vcombine.high %v476_v4, %v476_v4  ;;  %v3386_v10 = vrot.slane %v476_v4, %v3206_v27  ;;  %v3389_v11 = vrot.slane %v527_v5, %v3206_v27  ;;  %v549_v12 = vcombine.high %v527_v5, %v527_v5 }
 0x213   : > { %v821_v31 = vsub.f32 0.0, %v3271_v23  ;;  %v823_v35 = vsub.f32 0.0, %v3286_v29  ;;  %v825_v37 = vsub.f32 0.0, %v3294_v34  ;;  %v3317_v42 = vcombine.high %v3271_v23, %v3887_v33 }
 0x214   : > { %1032 = vrot.lane.b32.xlu1 %v3267_v19, %s3086_s28  ;;  %v3329_v47 = vcombine.high %v3286_v29, %v3887_v33  ;;  %v827_v48 = vsub.f32 0.0, %v3320_v43  ;;  %v3337_v50 = vcombine.high %v3294_v34, %v3887_v33  ;;  %v3353_v56 = vcombine.high %v3320_v43, %v3887_v33 }
 0x215   : > { %v822_v46 = vsub.f32 0.0, %v3317_v42  ;;  %v974_v15 = vmul.f32 %v3386_v10, %v3244_v1  ;;  %v3396_v21 = vrot.slane %v498_v8, %v3206_v27  ;;  %v3399_v26 = vrot.slane %v549_v12, %v3206_v27 }
 0x216   : > { %1042 = vrot.lane.b32.xlu0 %v3276_v25, %s3086_s28  ;;  %v824_v49 = vsub.f32 0.0, %v3329_v47  ;;  %v826_v51 = vsub.f32 0.0, %v3337_v50  ;;  %v828_v57 = vsub.f32 0.0, %v3353_v56  ;;  %v3424_v12 = vrot.slane %v504_v60, %v3373_v62 }
 0x218   : > { %1036 = vrot.lane.b32.xlu1 %v3283_v28, %s3086_s28 }
 0x21a   : > { %837 = vrot.lane.b32.xlu0 %v821_v31, %s3087_s29 }
 0x21c   : > { %1000 = vrot.lane.b32.xlu1 %v983_v32, %s3087_s29 }
 0x21e   : > { %841 = vrot.lane.b32.xlu0 %v823_v35, %s3087_s29  ;;  %v468_v35 = vcombine.high %v460_v2, %v460_v2 }
 0x220   : > { %1004 = vrot.lane.b32.xlu1 %v985_v36, %s3087_s29 }
 0x222   : > { %845 = vrot.lane.b32.xlu0 %v825_v37, %s3087_s29  ;;  %v976_v37 = vmul.f32 %v3396_v21, %v3251_v6 }
 0x224   : > { %1040 = vrot.lane.b32.xlu1 %v3305_v38, %s3086_s28 }
 0x226   : > { %1006 = vrot.lane.b32.xlu0 %v986_v40, %s3087_s29  ;;  %v519_v40 = vcombine.high %v511_v3, %v511_v3 }
 0x228   : > { %1044 = vrot.lane.b32.xlu1 %v3313_v41, %s3086_s28 }
 0x22a   : > { %1010 = vrot.lane.b32.xlu0 %v988_v45, %s3087_s29 }
 0x22c   : > { %839 = vrot.lane.b32.xlu1 %v822_v46, %s3087_s29 }
 0x22e   : > { %849 = vrot.lane.b32.xlu0 %v827_v48, %s3087_s29 }
 0x230   : > { %843 = vrot.lane.b32.xlu1 %v824_v49, %s3087_s29  ;;  %v453_v49 = vcombine.high %v451_v63, %v451_v63 }
 0x232   : > { %869 = vrot.lane.b32.xlu0 %v3271_v23, %s3086_s28  ;;  %v467_v61 = vrot.slane %v453_v49, %v3373_v62 }
 0x234   : > { %847 = vrot.lane.b32.xlu1 %v826_v51, %s3087_s29 }
 0x236   : > { %873 = vrot.lane.b32.xlu0 %v3286_v29, %s3086_s28 }
 0x238   : > { %1008 = vrot.lane.b32.xlu1 %v987_v53, %s3087_s29  ;;  %v490_v53 = vrot.slane %v468_v35, %v3373_v62 }
 0x23a   : > { %877 = vrot.lane.b32.xlu0 %v3294_v34, %s3086_s28  ;;  %v3417_v3 = vrot.slane %v490_v53, %v3206_v27  ;;  %v500_v4 = vcombine.high %v490_v53, %v490_v53 }
 0x23c   : > { %1012 = vrot.lane.b32.xlu1 %v989_v54, %s3087_s29  ;;  %v541_v54 = vrot.slane %v519_v40, %v3373_v62 }
 0x23e   : > { %881 = vrot.lane.b32.xlu0 %v3320_v43, %s3086_s28  ;;  %v3420_v63 = vrot.slane %v541_v54, %v3206_v27  ;;  %v551_v5 = vcombine.high %v541_v54, %v541_v54 }
 0x240   : > { %851 = vrot.lane.b32.xlu1 %v828_v57, %s3087_s29 }
 0x244   : > { %871 = vrot.lane.b32.xlu1 %v3317_v42, %s3086_s28 }
 0x248   : > { %875 = vrot.lane.b32.xlu1 %v3329_v47, %s3086_s28 }
 0x24c   : > { %879 = vrot.lane.b32.xlu1 %v3337_v50, %s3086_s28 }
 0x250   : > { %883 = vrot.lane.b32.xlu1 %v3353_v56, %s3086_s28 }
 0x27c   : > { %v1031_v9 = vpop.permute.xlu0 %1030 }
 0x27e   : > { %v999_v13 = vpop.permute.xlu1 %998 }
 0x27f   : > { %v1054_v14 = vsel %vm893_vm1, %v999_v13, %v1031_v9 }
 0x280   : > { %v1062_v18 = vmul.f32 %v1054_v14, %v3389_v11  ;;  %v1035_v20 = vpop.permute.xlu0 %1034  ;;  %v483_v14 = vrot.slane %v467_v61, %v3373_v62 }
 0x282   : > { %v1070_v30 = vadd.f32 %v1062_v18, %v974_v15  ;;  %v1003_v31 = vpop.permute.xlu1 %1002  ;;  %v469_v15 = vcombine.high %v467_v61, %v467_v61  ;;  %v975_v18 = vmul.f32 %v3417_v3, %v3267_v19 }
 0x283   : > { %v1056_v32 = vsel %vm893_vm1, %v1003_v31, %v1035_v20  ;;  %v3434_v31 = vrot.slane %v500_v4, %v3206_v27 }
 0x284   : > { %v1078_v36 = vpack.c.bf16 %v1070_v30, %v1070_v30  ;;  %v1064_v1 = vmul.f32 %v1056_v32, %v3399_v26  ;;  %v3405_v39 = vpop.permute.xlu0 %1038  ;;  %v3437_v32 = vrot.slane %v551_v5, %v3206_v27 }
 0x285   : > { %v977_v49 = vmul.f32 %v3434_v31, %v3283_v28 }
 0x286   : > { %v1072_v45 = vadd.f32 %v1064_v1, %v976_v37  ;;  %v1033_v46 = vpop.permute.xlu1 %1032  ;;  %v1170_v48 = vrot.slane %v1078_v36, %v3373_v62  ;;  %v534_v1 = vrot.slane %v3424_v12, %v3373_v62 }
 0x288   : > { %v3408_v51 = vpop.permute.xlu0 %1042  ;;  %v1080_v57 = vpack.c.bf16 %v1072_v45, %v1072_v45  ;;  %v1177_v6 = vrot.slane %v1170_v48, %v3373_v62 }
 0x28a   : > { %v1037_v58 = vpop.permute.xlu1 %1036  ;;  %v1198_v8 = vrot.slane %v1080_v57, %v3373_v62  ;;  %v2871_v0 = vpack.i.b16 %v1177_v6, %v1177_v6  ;;  %v1277_v40 = vunpack.i.h.s16 %v1177_v6  ;;  %v3450_v57 = vrot.slane %v469_v15, %v3373_v62 }
 0x28b   : > { %v3453_v6 = vrot.slane %v483_v14, %v3206_v27 }
 0x28c   : > { %v3414_v2 = vpop.permute.xlu0 %837  ;;  %v1205_v35 = vrot.slane %v1198_v8, %v3373_v62  ;;  %v1311_v19 = vrot.slane %v2871_v0, %v3206_v27  ;;  %v3459_v8 = vrot.slane %v534_v1, %v3206_v27  ;;  %v1293_v28 = vpack.i.b16 %v1277_v40, %v1277_v40 }
 0x28d   : > { %v550_v0 = vcombine.high %v534_v1, %v534_v1  ;;  %v978_v1 = vmul.f32 %v3453_v6, %v3261_v17 }
 0x28e   : > { %v1001_v9 = vpop.permute.xlu1 %1000  ;;  %v1281_v60 = vunpack.i.h.s16 %v1205_v35  ;;  %v2873_v61 = vpack.i.b16 %v1205_v35, %v1205_v35  ;;  %v501_v35 = vcombine.high %v3450_v57, %v3450_v57 }
 0x28f   : > { %v1055_v13 = vsel %vm893_vm1, %v1001_v9, %v1033_v46  ;;  %v499_v46 = vcombine.high %v483_v14, %v483_v14  ;;  %v1373_v9 = vpack.i.b16 %v1311_v19, %v1311_v19  ;;  %v3467_v14 = vrot.slane %v3450_v57, %v3206_v27 }
 0x290   : > { %v1063_v20 = vmul.f32 %v1055_v13, %v3420_v63  ;;  %v3431_v30 = vpop.permute.xlu0 %841  ;;  %v3482_v57 = vrot.slane %v550_v0, %v3206_v27  ;;  %v520_v0 = vcombine.high %v3424_v12, %v3424_v12  ;;  %v3509_v7 = vrot.slane %v501_v35, %v3206_v27 }
 0x291   : > { %v3462_v13 = vrot.slane %v499_v46, %v3206_v27  ;;  %v1378_v17 = vrot.slane %v1373_v9, %v3206_v27 }
 0x292   : > { %v1071_v36 = vadd.f32 %v1063_v20, %v975_v18  ;;  %v1005_v37 = vpop.permute.xlu1 %1004 }
 0x293   : > { %v1057_v45 = vsel %vm893_vm1, %v1005_v37, %v1037_v58  ;;  %v1327_v37 = vrot.slane %v2873_v61, %v3206_v27 }
 0x294   : > { %v1079_v48 = vpack.c.bf16 %v1071_v36, %v1071_v36  ;;  %v1065_v53 = vmul.f32 %v1057_v45, %v3437_v32  ;;  %v3447_v54 = vpop.permute.xlu0 %845  ;;  %v1297_v36 = vpack.i.b16 %v1281_v60, %v1281_v60  ;;  %v980_v60 = vmul.f32 %v3462_v13, %v3276_v25 }
 0x296   : > { %v1184_v4 = vrot.slane %v1079_v48, %v3373_v62  ;;  %v1073_v58 = vadd.f32 %v1065_v53, %v977_v49  ;;  %v3456_v5 = vpop.permute.xlu1 %1040  ;;  %v1315_v53 = vrot.slane %v1293_v28, %v3206_v27 }
 0x298   : > { %v1191_v15 = vrot.slane %v1184_v4, %v3373_v62  ;;  %v1081_v18 = vpack.c.bf16 %v1073_v58, %v1073_v58  ;;  %v1007_v20 = vpop.permute.xlu0 %1006 }
 0x299   : > { %v1058_v40 = vsel %vm893_vm1, %v1007_v20, %v3405_v39  ;;  %v1401_v20 = vpack.i.b16 %v1327_v37, %v1327_v37 }
 0x29a   : > { %v1279_v19 = vunpack.i.h.s16 %v1191_v15  ;;  %v2872_v45 = vpack.i.b16 %v1191_v15, %v1191_v15  ;;  %v1212_v46 = vrot.slane %v1081_v18, %v3373_v62  ;;  %v1066_v48 = vmul.f32 %v1058_v40, %v3459_v8  ;;  %v3478_v49 = vpop.permute.xlu1 %1044 }
 0x29b   : > { %v1331_v18 = vrot.slane %v1297_v36, %v3206_v27 }
 0x29c   : > { %v1295_v61 = vpack.i.b16 %v1279_v19, %v1279_v19  ;;  %v1319_v39 = vrot.slane %v2872_v45, %v3206_v27  ;;  %v1219_v4 = vrot.slane %v1212_v46, %v3373_v62  ;;  %v1074_v58 = vadd.f32 %v1066_v48, %v978_v1  ;;  %v1011_v15 = vpop.permute.xlu0 %1010 }
 0x29d   : > { %v1060_v28 = vsel %vm893_vm1, %v1011_v15, %v3408_v51  ;;  %v1380_v45 = vpack.i.b16 %v1315_v53, %v1315_v53  ;;  %v1487_v48 = vshrl.u32 %v1378_v17, 16  ;;  %v1408_v15 = vpack.i.b16 %v1331_v18, %v1331_v18 }
 0x29e   : > { %v1323_v25 = vrot.slane %v1295_v61, %v3206_v27  ;;  %v1387_v40 = vpack.i.b16 %v1319_v39, %v1319_v39  ;;  %v1283_v9 = vunpack.i.h.s16 %v1219_v4  ;;  %v2874_v19 = vpack.i.b16 %v1219_v4, %v1219_v4  ;;  %v3495_v22 = vpop.permute.xlu1 %839 }
 0x29f   : > { %v1082_v46 = vpack.c.bf16 %v1074_v58, %v1074_v58  ;;  %v1068_v1 = vmul.f32 %v1060_v28, %v3482_v57  ;;  %v1406_v4 = vrot.slane %v1401_v20, %v3206_v27  ;;  %v3524_v35 = vrot.slane %v1408_v15, %v3206_v27 }
 0x2a0   : > { %v1394_v36 = vpack.i.b16 %v1323_v25, %v1323_v25  ;;  %v1299_v37 = vpack.i.b16 %v1283_v9, %v1283_v9  ;;  %v1335_v16 = vrot.slane %v2874_v19, %v3206_v27  ;;  %v3499_v51 = vpop.permute.xlu0 %849  ;;  %v1392_v12 = vrot.slane %v1387_v40, %v3206_v27 }
 0x2a1   : > { %v1226_v61 = vrot.slane %v1082_v46, %v3373_v62  ;;  %v1076_v39 = vadd.f32 %v1068_v1, %v980_v60  ;;  %v548_v19 = vrot.slane %v520_v0, %v3373_v62  ;;  %v1499_v1 = vshrl.u32 %v1406_v4, 16 }
 0x2a2   : > { %v1339_v53 = vrot.slane %v1299_v37, %v3206_v27  ;;  %v1415_v58 = vpack.i.b16 %v1335_v16, %v1335_v16  ;;  %v3505_v33 = vpop.permute.xlu1 %843  ;;  %v1486_v28 = vpack.i.b16 %v1392_v12, %v1378_v17  ;;  %v1488_v25 = vshrl.u32 %v1392_v12, 16 }
 0x2a3   : > { %v1084_v9 = vpack.c.bf16 %v1076_v39, %v1076_v39  ;;  %v3512_v18 = vrot.slane %v1394_v36, %v3206_v27  ;;  %v3518_v16 = vrot.slane %v1380_v45, %v3206_v27  ;;  %v1233_v36 = vrot.slane %v1226_v61, %v3373_v62 }
 0x2a4   : > { %v1422_v40 = vpack.i.b16 %v1339_v53, %v1339_v53  ;;  %v870_v60 = vpop.permute.xlu0 %869  ;;  %v1420_v20 = vrot.slane %v1415_v58, %v3206_v27  ;;  %v3515_v46 = vpack.i.b16 %v1488_v25, %v1487_v48  ;;  %v979_v53 = vmul.f32 %v3467_v14, %v3305_v38 }
 0x2a5   : > { %v1254_v17 = vrot.slane %v1084_v9, %v3373_v62  ;;  %v894_v0 = vsel %vm893_vm1, %v3414_v2, %v870_v60  ;;  %v1492_v2 = vpack.i.b16 %v3512_v18, %v3518_v16  ;;  %v813_v9 = vmul.f32 %v3386_v10, %v3271_v23 }
 0x2a6   : > { %v3527_v37 = vpop.permute.xlu1 %847  ;;  %v1498_v12 = vpack.i.b16 %v1420_v20, %v1406_v4  ;;  %v1500_v39 = vshrl.u32 %v1420_v20, 16  ;;  %v1427_v48 = vrot.slane %v1422_v40, %v3206_v27  ;;  %v942_v45 = vmul.f32 %v3389_v11, %v894_v0 }
 0x2a7   : > { %v1261_v58 = vrot.slane %v1254_v17, %v3373_v62  ;;  %v815_v11 = vmul.f32 %v3396_v21, %v3286_v29  ;;  %v3546_v38 = vrot.slane %v548_v19, %v3206_v27  ;;  %v552_v40 = vcombine.high %v548_v19, %v548_v19 }
 0x2a8   : > { %v874_v15 = vpop.permute.xlu0 %873  ;;  %v3536_v25 = vcombine.low %v1486_v28, %v1498_v12  ;;  %v3538_v61 = vpack.i.b16 %v1500_v39, %v1499_v1  ;;  %v1504_v4 = vpack.i.b16 %v1427_v48, %v3524_v35  ;;  %v1285_v60 = vunpack.i.h.s16 %v1233_v36 }
 0x2a9   : > { %v817_v28 = vmul.f32 %v3453_v6, %v3294_v34  ;;  %v981_v17 = vmul.f32 %v3509_v7, %v3313_v41  ;;  %v2875_v1 = vpack.i.b16 %v1233_v36, %v1233_v36  ;;  %v950_v23 = vadd.f32 %v942_v45, %v813_v9 }
 0x2aa   : > { %v1009_v20 = vpop.permute.xlu1 %1008  ;;  %v1979_v0 = vcombine.low %v3515_v46, %v3538_v61  ;;  %v896_v29 = vsel %vm893_vm1, %v3431_v30, %v874_v15  ;;  %v819_v10 = vmul.f32 %v3462_v13, %v3320_v43  ;;  %v1289_v21 = vunpack.i.h.s16 %v1261_v58 }
 0x2ab   : > { %v1059_v19 = vsel %vm893_vm1, %v1009_v20, %v3456_v5  ;;  %v3562_v34 = vmul.f32 %v3417_v3, %v3317_v42  ;;  %v3564_v41 = vcombine.low %v1492_v2, %v1504_v4  ;;  %v3568_v36 = vrot.slane %v552_v40, %v3206_v27 }
 0x2ac   : > { %v878_v12 = vpop.permute.xlu0 %877  ;;  %v1067_v6 = vmul.f32 %v1059_v19, %v3546_v38  ;;  %v1493_v30 = vshrl.u32 %v3518_v16, 16  ;;  %v1505_v43 = vshrl.u32 %v3524_v35, 16  ;;  %v1301_v13 = vpack.i.b16 %v1285_v60, %v1285_v60 }
 0x2ad   : > { %v2877_v39 = vpack.i.b16 %v1261_v58, %v1261_v58  ;;  %v944_v5 = vmul.f32 %v3399_v26, %v896_v29  ;;  %v898_v45 = vsel %vm893_vm1, %v3447_v54, %v878_v12  ;;  %v1343_v3 = vrot.slane %v2875_v1, %v3206_v27 }
 0x2ae   : > { %v1013_v42 = vpop.permute.xlu1 %1012  ;;  %v958_v2 = vmul.f32 0.17677669, %v950_v23  ;;  %v1075_v15 = vadd.f32 %v1067_v6, %v979_v53  ;;  %v946_v4 = vmul.f32 %v3459_v8, %v898_v45  ;;  %v1305_v9 = vpack.i.b16 %v1289_v21, %v1289_v21 }
 0x2af   : > { %v1061_v16 = vsel %vm893_vm1, %v1013_v42, %v3478_v49  ;;  %v1494_v35 = vshrl.u32 %v3512_v18, 16  ;;  %v1506_v58 = vshrl.u32 %v1427_v48, 16  ;;  %v1359_v1 = vrot.slane %v2877_v39, %v3206_v27 }
 0x2b0   : > { %v882_v40 = vpop.permute.xlu0 %881  ;;  %v1083_v60 = vpack.c.bf16 %v1075_v15, %v1075_v15  ;;  %v954_v26 = vadd.f32 %v946_v4, %v817_v28  ;;  %v1069_v20 = vmul.f32 %v1061_v16, %v3568_v36  ;;  %v952_v53 = vadd.f32 %v944_v5, %v815_v11 }
 0x2b1   : > { %v900_v54 = vsel %vm893_vm1, %v3499_v51, %v882_v40  ;;  %v3587_v29 = vpack.i.b16 %v1494_v35, %v1493_v30  ;;  %v3590_v21 = vpack.i.b16 %v1506_v58, %v1505_v43  ;;  %v1347_v28 = vrot.slane %v1301_v13, %v3206_v27 }
 0x2b2   : > { %v948_v8 = vmul.f32 %v3482_v57, %v900_v54  ;;  %v3585_v23 = vpop.permute.xlu1 %851  ;;  %v1240_v49 = vrot.slane %v1083_v60, %v3373_v62  ;;  %v962_v18 = vmul.f32 0.17677669, %v954_v26  ;;  %v1077_v48 = vadd.f32 %v1069_v20, %v981_v17 }
 0x2b3   : > { %v1429_v19 = vpack.i.b16 %v1343_v3, %v1343_v3  ;;  %v1363_v51 = vrot.slane %v1305_v9, %v3206_v27  ;;  %v2119_v30 = vcombine.low %v3587_v29, %v3590_v21  ;;  %v1457_v39 = vpack.i.b16 %v1359_v1, %v1359_v1 }
 0x2b4   : > { %v956_v12 = vadd.f32 %v948_v8, %v819_v10  ;;  %v1247_v11 = vrot.slane %v1240_v49, %v3373_v62  ;;  %v2867_v6 = vpack.c.bf16 %v962_v18, %v958_v2  ;;  %v1085_v57 = vpack.c.bf16 %v1077_v48, %v1077_v48 }
 0x2b5   : > { %v960_v5 = vmul.f32 0.17677669, %v952_v53  ;;  %v816_v17 = vmul.f32 %v3434_v31, %v3329_v47  ;;  %v818_v10 = vmul.f32 %v3467_v14, %v3337_v50  ;;  %v1436_v15 = vpack.i.b16 %v1347_v28, %v1347_v28 }
 0x2b6   : > { %v964_v45 = vmul.f32 0.17677669, %v956_v12  ;;  %v872_v42 = vpop.permute.xlu1 %871  ;;  %v1287_v43 = vunpack.i.h.s16 %v1247_v11  ;;  %v2876_v13 = vpack.i.b16 %v1247_v11, %v1247_v11  ;;  %v1268_v3 = vrot.slane %v1085_v57, %v3373_v62 }
 0x2b7   : > { %v895_v4 = vsel %vm893_vm1, %v3495_v22, %v872_v42  ;;  %v1434_v9 = vrot.slane %v1429_v19, %v3206_v27  ;;  %v1464_v16 = vpack.i.b16 %v1363_v51, %v1363_v51  ;;  %v3608_v31 = vrot.slane %v2867_v6, %v3227_v52 }
 0x2b8   : > { %v2868_v2 = vpack.c.bf16 %v964_v45, %v960_v5  ;;  %v1303_v40 = vpack.i.b16 %v1287_v43, %v1287_v43  ;;  %v1351_v35 = vrot.slane %v2876_v13, %v3206_v27  ;;  %v1275_v47 = vrot.slane %v1268_v3, %v3373_v62 }
 0x2b9   : > { %v943_v50 = vmul.f32 %v3420_v63, %v895_v4  ;;  %v1462_v60 = vrot.slane %v1457_v39, %v3206_v27  ;;  %v820_v8 = vmul.f32 %v3509_v7, %v3353_v56  ;;  %v1441_v49 = vrot.slane %v1436_v15, %v3206_v27 }
 0x2ba   : > { %v3611_v58 = vrot.slane %v2868_v2, %v3227_v52  ;;  %v876_v14 = vpop.permute.xlu1 %875  ;;  %v1355_v22 = vrot.slane %v1303_v40, %v3206_v27  ;;  %v1443_v26 = vpack.i.b16 %v1351_v35, %v1351_v35  ;;  %v1291_v20 = vunpack.i.h.s16 %v1275_v47 }
 0x2bb   : > { %v2878_v54 = vpack.i.b16 %v1275_v47, %v1275_v47  ;;  %v897_v53 = vsel %vm893_vm1, %v3505_v33, %v876_v14  ;;  %v1469_v28 = vrot.slane %v1464_v16, %v3206_v27  ;;  %v951_v19 = vadd.f32 %v943_v50, %v3562_v34 }
 0x2bc   : > { %v1110_v1 = vcombine.low %v3608_v31, %v3611_v58  ;;  %v1450_v63 = vpack.i.b16 %v1355_v22, %v1355_v22  ;;  %v1307_v18 = vpack.i.b16 %v1291_v20, %v1291_v20  ;;  %v945_v51 = vmul.f32 %v3437_v32, %v897_v53 }
 0x2bd   : > { %v1367_v48 = vrot.slane %v2878_v54, %v3206_v27  ;;  %v1448_v11 = vrot.slane %v1443_v26, %v3206_v27  ;;  %v1511_v6 = vshrl.u32 %v1434_v9, 16  ;;  %v1523_v56 = vshrl.u32 %v1462_v60, 16 }
 0x2be   : > { %v880_v12 = vpop.permute.xlu1 %879  ;;  %v1371_v33 = vrot.slane %v1307_v18, %v3206_v27  ;;  %v1517_v42 = vshrl.u32 %v1441_v49, 16  ;;  %v1455_v32 = vrot.slane %v1450_v63, %v3206_v27  ;;  %v1529_v13 = vshrl.u32 %v1469_v28, 16 }
 0x2bf   : > { %v1471_v57 = vpack.i.b16 %v1367_v48, %v1367_v48  ;;  %v899_v7 = vsel %vm893_vm1, %v3527_v37, %v880_v12  ;;  %v1510_v5 = vpack.i.b16 %v1448_v11, %v1434_v9  ;;  %v1512_v45 = vshrl.u32 %v1448_v11, 16 }
 0x2c0   : > { %v947_v39 = vmul.f32 %v3546_v38, %v899_v7  ;;  %v1478_v43 = vpack.i.b16 %v1371_v33, %v1371_v33  ;;  %v959_v3 = vmul.f32 0.17677669, %v951_v19  ;;  %v953_v15 = vadd.f32 %v945_v51, %v816_v17 }
 0x2c1   : > { %v1476_v34 = vrot.slane %v1471_v57, %v3206_v27  ;;  %v1513_v16 = vpack.i.b16 %v1512_v45, %v1511_v6  ;;  %v1516_v50 = vpack.i.b16 %v1455_v32, %v1441_v49  ;;  %v1518_v14 = vshrl.u32 %v1455_v32, 16 }
 0x2c2   : > { %v955_v2 = vadd.f32 %v947_v39, %v818_v10  ;;  %v884_v4 = vpop.permute.xlu1 %883  ;;  %v1483_v38 = vrot.slane %v1478_v43, %v3206_v27  ;;  %v1916_v53 = vrot.slane %v3536_v25, %v3373_v62  ;;  %v961_v19 = vmul.f32 0.17677669, %v953_v15 }
 0x2c3   : > { %v901_v37 = vsel %vm893_vm1, %v3585_v23, %v884_v4  ;;  %v1522_v40 = vpack.i.b16 %v1476_v34, %v1462_v60  ;;  %v1524_v35 = vshrl.u32 %v1476_v34, 16  ;;  %v1519_v63 = vpack.i.b16 %v1518_v14, %v1517_v42 }
 0x2c4   : > { %v963_v9 = vmul.f32 0.17677669, %v955_v2  ;;  %v949_v47 = vmul.f32 %v3568_v36, %v901_v37  ;;  %v1528_v20 = vpack.i.b16 %v1483_v38, %v1469_v28  ;;  %v1530_v54 = vshrl.u32 %v1483_v38, 16 }
 0x2c5   : > { %v1909_v22 = vcombine.low %v1510_v5, %v1522_v40  ;;  %v1525_v26 = vpack.i.b16 %v1524_v35, %v1523_v56  ;;  %v1987_v36 = vrot.slane %v1979_v0, %v3373_v62  ;;  %v2057_v49 = vrot.slane %v3564_v41, %v3373_v62 }
 0x2c6   : > { %v2869_v17 = vpack.c.bf16 %v963_v9, %v959_v3  ;;  %v957_v10 = vadd.f32 %v949_v47, %v820_v8  ;;  %v2050_v18 = vcombine.low %v1516_v50, %v1528_v20  ;;  %v1531_v48 = vpack.i.b16 %v1530_v54, %v1529_v13 }
 0x2c7   : > { %v1923_v23 = vrot.slane %v1909_v22, %v3373_v62  ;;  %v1980_v60 = vcombine.low %v1513_v16, %v1525_v26  ;;  %v2127_v6 = vrot.slane %v2119_v30, %v3373_v62  ;;  %v1117_v7 = vrot.slane %v1110_v1, %v3238_v59 }
 0x2c8   : > { %v965_v51 = vmul.f32 0.17677669, %v957_v10  ;;  %v2064_v25 = vrot.slane %v2050_v18, %v3373_v62  ;;  %v2120_v12 = vcombine.low %v1519_v63, %v1531_v48  ;;  %v1126_v41 = vrot.slane %v2869_v17, %v3227_v52 }
 0x2c9   : > { %v1924_v8 = vcombine.low %v1916_v53, %v1923_v23  ;;  %v1994_v28 = vrot.slane %v1980_v60, %v3373_v62  ;;  %v3891_v21 = vmov 0.0   ;;  %v3892_v5 = vmov 0  }
 0x2ca   : > { %v2870_v11 = vpack.c.bf16 %v965_v51, %v961_v19  ;;  %v2065_v61 = vcombine.low %v2057_v49, %v2064_v25  ;;  %v2134_v0 = vrot.slane %v2120_v12, %v3373_v62  ;;  %v1118_v45 = vcombine.high %v1117_v7, %v3892_v5 }
 0x2cb   : > { %v1931_v33 = vrot.slane %v1924_v8, %v3373_v62  ;;  %v1995_v46 = vcombine.low %v1987_v36, %v1994_v28  ;;  %v1147_v34 = vshrl.u32 %v1117_v7, 16  ;;  %v3893_v35 = vlaneseq }
 0x2cc   : > { %v1134_v57 = vrot.slane %v2870_v11, %v3227_v52  ;;  %v2135_v39 = vcombine.low %v2127_v6, %v2134_v0  ;;  %v1153_v1 = vshrl.u32 %v1118_v45, 16  ;;  %v2072_v4 = vrot.slane %v2065_v61, %v3373_v62 }
 0x2cd   : > { %v1937_v56 = vsel %vm1932_vm2, %v1931_v33, 0  ;;  %v2002_v42 = vrot.slane %v1995_v46, %v3373_v62  ;;  %v2192_v38 = vand.u32 127, %v3893_v35 }
 0x2ce   : > { %v1135_v29 = vcombine.low %v1126_v41, %v1134_v57  ;;  %2933 = vmatpush3.bf16.xpose.msra.mxu1 %v1937_v56  ;;  %v2077_v16 = vsel %vm1932_vm2, %v2072_v4, 0  ;;  %v2142_v37 = vrot.slane %v2135_v39, %v3373_v62 }
 0x2cf   : > { %2938 = vmatprep.subr.bf16.mxu1 %v3891_v21  ;;  %v2007_v15 = vsel %vm1932_vm2, %v2002_v42, 0  ;;  %vm2193_vm3 = vcmp.le.s32.totalorder %v2192_v38, %v3200_v24 }
 0x2d0   : > { %v1142_v30 = vrot.slane %v1135_v29, %v3238_v59  ;;  %v2147_v40 = vsel %vm1932_vm2, %v2142_v37, 0 }
 0x2d2   : > { %v1146_v43 = vpack.i.b16 %v1142_v30, %v1117_v7  ;;  %v1148_v32 = vshrl.u32 %v1142_v30, 16  ;;  %v1143_v13 = vcombine.high %v1142_v30, %v3892_v5 }
 0x2d4   : > { %v1149_v31 = vpack.i.b16 %v1148_v32, %v1147_v34  ;;  %v1152_v58 = vpack.i.b16 %v1143_v13, %v1118_v45  ;;  %v1154_v3 = vshrl.u32 %v1143_v13, 16 }
 0x2d5   : > { %2935 = vmatmul.mubr.msk.bf16.vlgmr.msra.gmra.mrb[0].mxu1 %vm1932_vm2, %v1146_v43 }
 0x2d6   : > { %2939 = vmatpush3.bf16.xpose.msra.mxu1 %v2007_v15  ;;  %2940 = vmatprep.mubr.msk.bf16.mxu1 %vm3088_vm0, %v3891_v21  ;;  %v1155_v2 = vpack.i.b16 %v1154_v3, %v1153_v1 }
 0x2d7   : > { %2944 = vmatprep.subr.bf16.mxu1 %v3891_v21 }
 0x2dd   : > { %2941 = vmatmul.mubr.msk.bf16.vlgmr.msra.gmra.mrb[4].mxu1 %vm1932_vm2, %v1149_v31 }
 0x2de   : > { %2945 = vmatpush3.bf16.xpose.msra.mxu1 %v2077_v16  ;;  %2946 = vmatprep.mubr.msk.bf16.mxu1 %vm3088_vm0, %v3891_v21 }
 0x2df   : > { %2950 = vmatprep.subr.bf16.mxu1 %v3891_v21 }
 0x2e5   : > { %2947 = vmatmul.mubr.msk.bf16.vlgmr.msra.gmra.mrb[8].mxu1 %vm1932_vm2, %v1152_v58 }
 0x2e6   : > { %2951 = vmatpush3.bf16.xpose.msra.mxu1 %v2147_v40  ;;  %2952 = vmatprep.mubr.msk.bf16.mxu1 %vm3088_vm0, %v3891_v21 }
 0x2e7   : > { %2956 = vmatprep.subr.bf16.mxu1 %v3891_v21 }
 0x2ed   : > { %2953 = vmatmul.mubr.msk.bf16.vlgmr.msra.gmra.mrb[12].mxu1 %vm1932_vm2, %v1155_v2 }
 0x2ee   : > { %2958 = vmatprep.mubr.msk.bf16.mxu1 %vm3088_vm0, %v3891_v21 }
 0x3a8   : > { %v1973_v9 = vpop.f32.mrb[0].mxu1 }
 0x3a9   : > { %v2196_v47 = vsel %vm2193_vm3, %v1973_v9, -3.4028235e+38  ;;  %v2936_v50 = vpop.f32.mrb[1].mxu1 }
 0x3aa   : > { %v1976_v14 = vpop.f32.mrb[2].mxu1  ;;  %v2201_v22 = vsel %vm2200_vm4, %v2196_v47, -inf }
 0x3ab   : > { %2202 = vmax.xlane.f32.xlu0 %v2201_v22  ;;  %v2937_v26 = vpop.f32.mrb[3].mxu1 }
 0x3b0   : > { %v2043_v20 = vpop.f32.mrb[4].mxu1 }
 0x3b1   : > { %v2197_v54 = vsel %vm2193_vm3, %v2043_v20, -3.4028235e+38  ;;  %v2942_v17 = vpop.f32.mrb[5].mxu1 }
 0x3b2   : > { %v2046_v10 = vpop.f32.mrb[6].mxu1  ;;  %v2204_v53 = vsel %vm2200_vm4, %v2197_v54, -inf }
 0x3b3   : > { %2205 = vmax.xlane.f32.xlu1 %v2204_v53  ;;  %v2943_v63 = vpop.f32.mrb[7].mxu1 }
 0x3b8   : > { %v2113_v23 = vpop.f32.mrb[8].mxu1 }
 0x3b9   : > { %v2198_v60 = vsel %vm2193_vm3, %v2113_v23, -3.4028235e+38  ;;  %v2948_v18 = vpop.f32.mrb[9].mxu1 }
 0x3ba   : > { %v2116_v48 = vpop.f32.mrb[10].mxu1  ;;  %v2207_v19 = vsel %vm2200_vm4, %v2198_v60, -inf }
 0x3bb   : > { %2208 = vmax.xlane.f32.xlu0 %v2207_v19  ;;  %v2949_v51 = vpop.f32.mrb[11].mxu1 }
 0x3c0   : > { %v2183_v36 = vpop.f32.mrb[12].mxu1 }
 0x3c1   : > { %v2199_v49 = vsel %vm2193_vm3, %v2183_v36, -3.4028235e+38  ;;  %v2954_v8 = vpop.f32.mrb[13].mxu1 }
 0x3c2   : > { %v2186_v28 = vpop.f32.mrb[14].mxu1  ;;  %v2210_v25 = vsel %vm2200_vm4, %v2199_v49, -inf }
 0x3c3   : > { %2211 = vmax.xlane.f32.xlu0 %v2210_v25  ;;  %v2955_v12 = vpop.f32.mrb[15].mxu1 }
 0x3c4   : > { %701 = vrot.lane.b32.xlu1 %v3219_v44, %s3082_s26 }
 0x3d9   : > { %703 = vrot.lane.b32.xlu0 %v3229_v55, %s3082_s26 }
 0x438   : > { %v2203_v11 = vpop.xlane.xlu0 %2202 }
 0x439   : > { %v2213_v6 = vsub.f32 %v2196_v47, %v2203_v11 }
 0x43b   : > { %v2217_v33 = vmul.f32 1.442695, %v2213_v6 }
 0x43d   : > { %3055 = vpow2.f32 %v2217_v33 }
 0x440   : > { %v2206_v46 = vpop.xlane.xlu1 %2205 }
 0x441   : > { %v2214_v61 = vsub.f32 %v2197_v54, %v2206_v46 }
 0x443   : > { %v2219_v24 = vmul.f32 1.442695, %v2214_v61 }
 0x444   : > { %v702_v55 = vpop.permute.xlu1 %701 }
 0x445   : > { %3057 = vpow2.f32 %v2219_v24  ;;  %v707_v30 = vcombine.high %v702_v55, %v3891_v21  ;;  %v714_v42 = vrot.slane %v702_v55, %v3227_v52 }
 0x447   : > { %v3705_v0 = vpop.eup %3055  ;;  %v721_v13 = vrot.slane %v707_v30, %v3227_v52 }
 0x448   : > { %v2209_v41 = vpop.xlane.xlu0 %2208  ;;  %v2225_v57 = vsel %vm2200_vm4, %v3705_v0, 0.0 }
 0x449   : > { %v2215_v7 = vsub.f32 %v2198_v60, %v2209_v41  ;;  %2226 = vadd.xlane.f32.xlu1 %v2225_v57 }
 0x44b   : > { %v2221_v44 = vmul.f32 1.442695, %v2215_v7 }
 0x44d   : > { %3059 = vpow2.f32 %v2221_v44 }
 0x44f   : > { %v3709_v56 = vpop.eup %3057 }
 0x450   : > { %v2212_v39 = vpop.xlane.xlu0 %2211  ;;  %v2228_v29 = vsel %vm2200_vm4, %v3709_v56, 0.0 }
 0x451   : > { %2229 = vadd.xlane.f32.xlu0 %v2228_v29  ;;  %v2216_v5 = vsub.f32 %v2199_v49, %v2212_v39 }
 0x453   : > { %v2223_v3 = vmul.f32 1.442695, %v2216_v5 }
 0x454   : > { %v704_v45 = vpop.permute.xlu0 %703 }
 0x455   : > { %v722_v43 = vcombine.high %v704_v45, %v3891_v21  ;;  %v729_v34 = vrot.slane %v704_v45, %v3227_v52  ;;  %3061 = vpow2.f32 %v2223_v3 }
 0x457   : > { %v3717_v32 = vpop.eup %3059  ;;  %v736_v31 = vrot.slane %v722_v43, %v3227_v52  ;;  %v737_v58 = vcombine.low %v714_v42, %v729_v34  ;;  %v738_v1 = vcombine.high %v714_v42, %v729_v34 }
 0x458   : > { %v2231_v15 = vsel %vm2200_vm4, %v3717_v32, 0.0 }
 0x459   : > { %v745_v2 = vrot.slane %v737_v58, %v3238_v59  ;;  %v752_v4 = vrot.slane %v738_v1, %v3238_v59  ;;  %v753_v16 = vcombine.low %v721_v13, %v736_v31  ;;  %v754_v37 = vcombine.high %v721_v13, %v736_v31  ;;  %2232 = vadd.xlane.f32.xlu1 %v2231_v15 }
 0x45b   : > { %v761_v40 = vrot.slane %v753_v16, %v3238_v59  ;;  %v768_v35 = vrot.slane %v754_v37, %v3238_v59  ;;  %v769_v38 = vcombine.high %v745_v2, %v3891_v21  ;;  %v770_v9 = vcombine.high %v752_v4, %v3891_v21 }
 0x45c   : > { %v1086_v47 = vpack.c.bf16 %v745_v2, %v745_v2  ;;  %v1088_v50 = vpack.c.bf16 %v752_v4, %v752_v4 }
 0x45d   : > { %v771_v14 = vcombine.high %v761_v40, %v3891_v21  ;;  %v772_v22 = vcombine.high %v768_v35, %v3891_v21  ;;  %v1087_v26 = vpack.c.bf16 %v769_v38, %v769_v38  ;;  %v1089_v20 = vpack.c.bf16 %v770_v9, %v770_v9 }
 0x45e   : > { %v1090_v54 = vpack.c.bf16 %v761_v40, %v761_v40  ;;  %v1092_v17 = vpack.c.bf16 %v768_v35, %v768_v35  ;;  %v1546_v10 = vrot.slane %v1086_v47, %v3373_v62  ;;  %v1574_v53 = vrot.slane %v1088_v50, %v3373_v62 }
 0x45f   : > { %v1091_v63 = vpack.c.bf16 %v771_v14, %v771_v14  ;;  %v1093_v23 = vpack.c.bf16 %v772_v22, %v772_v22  ;;  %v1560_v60 = vrot.slane %v1087_v26, %v3373_v62  ;;  %v1588_v18 = vrot.slane %v1089_v20, %v3373_v62  ;;  %v3747_v45 = vpop.eup %3061 }
 0x460   : > { %v1553_v48 = vrot.slane %v1546_v10, %v3373_v62  ;;  %v1581_v19 = vrot.slane %v1574_v53, %v3373_v62  ;;  %v1602_v51 = vrot.slane %v1090_v54, %v3373_v62  ;;  %v1630_v36 = vrot.slane %v1092_v17, %v3373_v62 }
 0x461   : > { %v1567_v49 = vrot.slane %v1560_v60, %v3373_v62  ;;  %v1595_v8 = vrot.slane %v1588_v18, %v3373_v62  ;;  %v1616_v28 = vrot.slane %v1091_v63, %v3373_v62  ;;  %v1644_v25 = vrot.slane %v1093_v23, %v3373_v62 }
 0x462   : > { %v1609_v12 = vrot.slane %v1602_v51, %v3373_v62  ;;  %v1637_v11 = vrot.slane %v1630_v36, %v3373_v62  ;;  %v1653_v6 = vunpack.i.h.s16 %v1553_v48  ;;  %v1657_v33 = vunpack.i.h.s16 %v1581_v19 }
 0x463   : > { %v1623_v46 = vrot.slane %v1616_v28, %v3373_v62  ;;  %v1651_v61 = vrot.slane %v1644_v25, %v3373_v62  ;;  %v1655_v24 = vunpack.i.h.s16 %v1567_v49  ;;  %v1659_v41 = vunpack.i.h.s16 %v1595_v8 }
 0x464   : > { %v1661_v57 = vunpack.i.h.s16 %v1609_v12  ;;  %v1665_v7 = vunpack.i.h.s16 %v1637_v11  ;;  %v2879_v44 = vpack.i.b16 %v1553_v48, %v1553_v48  ;;  %v1669_v55 = vpack.i.b16 %v1653_v6, %v1653_v6 }
 0x465   : > { %v1663_v39 = vunpack.i.h.s16 %v1623_v46  ;;  %v1667_v29 = vunpack.i.h.s16 %v1651_v61  ;;  %v2880_v30 = vpack.i.b16 %v1567_v49, %v1567_v49  ;;  %v1671_v5 = vpack.i.b16 %v1655_v24, %v1655_v24 }
 0x466   : > { %v2881_v42 = vpack.i.b16 %v1581_v19, %v1581_v19  ;;  %v1673_v43 = vpack.i.b16 %v1657_v33, %v1657_v33  ;;  %v2882_v34 = vpack.i.b16 %v1595_v8, %v1595_v8  ;;  %v1675_v13 = vpack.i.b16 %v1659_v41, %v1659_v41 }
 0x467   : > { %v2883_v31 = vpack.i.b16 %v1609_v12, %v1609_v12  ;;  %v1677_v58 = vpack.i.b16 %v1661_v57, %v1661_v57  ;;  %v2884_v1 = vpack.i.b16 %v1623_v46, %v1623_v46  ;;  %v1679_v3 = vpack.i.b16 %v1663_v39, %v1663_v39 }
 0x468   : > { %v2885_v15 = vpack.i.b16 %v1637_v11, %v1637_v11  ;;  %v1681_v2 = vpack.i.b16 %v1665_v7, %v1665_v7  ;;  %v2886_v4 = vpack.i.b16 %v1651_v61, %v1651_v61  ;;  %v1683_v16 = vpack.i.b16 %v1667_v29, %v1667_v29 }
 0x469   : > { %v1687_v37 = vrot.slane %v2879_v44, %v3206_v27  ;;  %v1691_v40 = vrot.slane %v1669_v55, %v3206_v27  ;;  %v1695_v35 = vrot.slane %v2880_v30, %v3206_v27  ;;  %v1699_v38 = vrot.slane %v1671_v5, %v3206_v27 }
 0x46a   : > { %v1703_v9 = vrot.slane %v2881_v42, %v3206_v27  ;;  %v1707_v47 = vrot.slane %v1673_v43, %v3206_v27  ;;  %v1711_v50 = vrot.slane %v2882_v34, %v3206_v27  ;;  %v1715_v14 = vrot.slane %v1675_v13, %v3206_v27 }
 0x46b   : > { %v1719_v22 = vrot.slane %v2883_v31, %v3206_v27  ;;  %v1735_v26 = vrot.slane %v2885_v15, %v3206_v27  ;;  %v1749_v20 = vpack.i.b16 %v1687_v37, %v1687_v37  ;;  %v1756_v54 = vpack.i.b16 %v1691_v40, %v1691_v40 }
 0x46c   : > { %v1763_v17 = vpack.i.b16 %v1695_v35, %v1695_v35  ;;  %v1770_v10 = vpack.i.b16 %v1699_v38, %v1699_v38  ;;  %v1777_v53 = vpack.i.b16 %v1703_v9, %v1703_v9  ;;  %v1784_v63 = vpack.i.b16 %v1707_v47, %v1707_v47 }
 0x46d   : > { %v1791_v23 = vpack.i.b16 %v1711_v50, %v1711_v50  ;;  %v1798_v60 = vpack.i.b16 %v1715_v14, %v1715_v14  ;;  %v2234_v18 = vsel %vm2200_vm4, %v3747_v45, 0.0  ;;  %v1727_v48 = vrot.slane %v2884_v1, %v3206_v27 }
 0x46e   : > { %2235 = vadd.xlane.f32.xlu0 %v2234_v18  ;;  %v1743_v19 = vrot.slane %v2886_v4, %v3206_v27  ;;  %v1754_v51 = vrot.slane %v1749_v20, %v3206_v27  ;;  %v1768_v36 = vrot.slane %v1763_v17, %v3206_v27  ;;  %v1782_v49 = vrot.slane %v1777_v53, %v3206_v27 }
 0x46f   : > { %v1796_v8 = vrot.slane %v1791_v23, %v3206_v27  ;;  %v1805_v28 = vpack.i.b16 %v1719_v22, %v1719_v22  ;;  %v1819_v25 = vpack.i.b16 %v1727_v48, %v1727_v48  ;;  %v1833_v12 = vpack.i.b16 %v1735_v26, %v1735_v26 }
 0x470   : > { %v1847_v11 = vpack.i.b16 %v1743_v19, %v1743_v19  ;;  %v1862_v6 = vpack.i.b16 %v1768_v36, %v1754_v51  ;;  %v1863_v33 = vshrl.u32 %v1754_v51, 16  ;;  %v1864_v46 = vshrl.u32 %v1768_v36, 16 }
 0x471   : > { %v1810_v61 = vrot.slane %v1805_v28, %v3206_v27  ;;  %v1824_v24 = vrot.slane %v1819_v25, %v3206_v27  ;;  %v1838_v41 = vrot.slane %v1833_v12, %v3206_v27  ;;  %v1874_v57 = vpack.i.b16 %v1796_v8, %v1782_v49 }
 0x472   : > { %v1852_v7 = vrot.slane %v1847_v11, %v3206_v27  ;;  %v1865_v44 = vpack.i.b16 %v1864_v46, %v1863_v33  ;;  %v1875_v55 = vshrl.u32 %v1782_v49, 16  ;;  %v1876_v39 = vshrl.u32 %v1796_v8, 16 }
 0x473   : > { %v1886_v29 = vpack.i.b16 %v1824_v24, %v1810_v61  ;;  %v2249_v30 = vcombine.low %v1862_v6, %v1874_v57  ;;  %v1887_v5 = vshrl.u32 %v1810_v61, 16  ;;  %v1888_v42 = vshrl.u32 %v1824_v24, 16 }
 0x474   : > { %v1898_v43 = vpack.i.b16 %v1852_v7, %v1838_v41  ;;  %v1877_v34 = vpack.i.b16 %v1876_v39, %v1875_v55  ;;  %v1899_v13 = vshrl.u32 %v1838_v41, 16  ;;  %v1900_v31 = vshrl.u32 %v1852_v7, 16 }
 0x475   : > { %v2257_v1 = vrot.slane %v2249_v30, %v3373_v62  ;;  %v1889_v15 = vpack.i.b16 %v1888_v42, %v1887_v5  ;;  %v1723_v4 = vrot.slane %v1677_v58, %v3206_v27  ;;  %v1731_v37 = vrot.slane %v1679_v3, %v3206_v27 }
 0x476   : > { %v2250_v40 = vcombine.low %v1886_v29, %v1898_v43  ;;  %v1901_v35 = vpack.i.b16 %v1900_v31, %v1899_v13  ;;  %v2320_v38 = vcombine.low %v1865_v44, %v1877_v34  ;;  %v1739_v9 = vrot.slane %v1681_v2, %v3206_v27 }
 0x477   : > { %v1747_v47 = vrot.slane %v1683_v16, %v3206_v27  ;;  %v1761_v50 = vrot.slane %v1756_v54, %v3206_v27  ;;  %v1775_v14 = vrot.slane %v1770_v10, %v3206_v27  ;;  %v1789_v22 = vrot.slane %v1784_v63, %v3206_v27 }
 0x478   : > { %v2264_v26 = vrot.slane %v2250_v40, %v3373_v62  ;;  %v2321_v20 = vcombine.low %v1889_v15, %v1901_v35  ;;  %v2328_v58 = vrot.slane %v2320_v38, %v3373_v62  ;;  %v1803_v3 = vrot.slane %v1798_v60, %v3206_v27 }
 0x479   : > { %v1812_v17 = vpack.i.b16 %v1723_v4, %v1723_v4  ;;  %v1826_v53 = vpack.i.b16 %v1731_v37, %v1731_v37  ;;  %v1840_v23 = vpack.i.b16 %v1739_v9, %v1739_v9  ;;  %v1854_v18 = vpack.i.b16 %v1747_v47, %v1747_v47 }
 0x47a   : > { %v2265_v2 = vcombine.low %v2257_v1, %v2264_v26  ;;  %v2335_v16 = vrot.slane %v2321_v20, %v3373_v62  ;;  %v1868_v48 = vpack.i.b16 %v1775_v14, %v1761_v50  ;;  %v1880_v54 = vpack.i.b16 %v1803_v3, %v1789_v22 }
 0x47b   : > { %v1817_v10 = vrot.slane %v1812_v17, %v3206_v27  ;;  %v1831_v63 = vrot.slane %v1826_v53, %v3206_v27  ;;  %v1845_v19 = vrot.slane %v1840_v23, %v3206_v27  ;;  %v1859_v51 = vrot.slane %v1854_v18, %v3206_v27  ;;  %v3045_v23 = vld [vmem:[%s3882_s6] sm:$0xff]   ;;  %v3047_v18 = vld [vmem:[%s3882_s6 + $0x10] sm:$0xff]  }
 0x47c   : > { %v2272_v36 = vrot.slane %v2265_v2, %v3373_v62  ;;  %v2336_v60 = vcombine.low %v2328_v58, %v2335_v16  ;;  %v2390_v49 = vcombine.low %v1868_v48, %v1880_v54  ;;  %v1869_v25 = vshrl.u32 %v1761_v50, 16  ;;  %2981 = vmatpush3.bf16.msra.mxu0 %v3045_v23  ;;  %v3049_v2 = vld [vmem:[%s3882_s6 + $0x20] sm:$0xff]   ;;  %v3050_v16 = vld [vmem:[%s3882_s6 + $0x28] sm:$0xff]  }
 0x47d   : > { %v1892_v8 = vpack.i.b16 %v1831_v63, %v1817_v10  ;;  %v1904_v28 = vpack.i.b16 %v1859_v51, %v1845_v19  ;;  %v1870_v12 = vshrl.u32 %v1775_v14, 16  ;;  %v1881_v33 = vshrl.u32 %v1789_v22, 16  ;;  %2982 = vmatprep.subr.bf16.mxu0 %v3891_v21 }
 0x47e   : > { %v2278_v11 = vsel %vm2276_vm5, %v2272_v36, 0  ;;  %v2343_v6 = vrot.slane %v2336_v60, %v3373_v62  ;;  %v1882_v46 = vshrl.u32 %v1803_v3, 16  ;;  %v1893_v41 = vshrl.u32 %v1817_v10, 16 }
 0x47f   : > { %2957 = vmatpush3.bf16.msra.mxu1 %v2278_v11  ;;  %v2391_v61 = vcombine.low %v1892_v8, %v1904_v28  ;;  %v1871_v24 = vpack.i.b16 %v1870_v12, %v1869_v25  ;;  %v1894_v57 = vshrl.u32 %v1831_v63, 16  ;;  %v1905_v44 = vshrl.u32 %v1845_v19, 16 }
 0x480   : > { %2962 = vmatprep.subr.bf16.mxu1 %v3891_v21  ;;  %v2348_v27 = vsel %vm2276_vm5, %v2343_v6, 0  ;;  %v1883_v7 = vpack.i.b16 %v1882_v46, %v1881_v33  ;;  %v1906_v55 = vshrl.u32 %v1859_v51, 16  ;;  %v2398_v39 = vrot.slane %v2390_v49, %v3373_v62 }
 0x481   : > { %v2405_v29 = vrot.slane %v2391_v61, %v3373_v62  ;;  %v1895_v30 = vpack.i.b16 %v1894_v57, %v1893_v41 }
 0x482   : > { %v1907_v5 = vpack.i.b16 %v1906_v55, %v1905_v44  ;;  %v2460_v42 = vcombine.low %v1871_v24, %v1883_v7 }
 0x483   : > { %v2406_v43 = vcombine.low %v2398_v39, %v2405_v29 }
 0x484   : > { %v2461_v34 = vcombine.low %v1895_v30, %v1907_v5  ;;  %v2468_v31 = vrot.slane %v2460_v42, %v3373_v62  ;;  %v3051_v5 = vld [vmem:[%s3882_s6 + $0x30] sm:$0xff]  }
 0x485   : > { %v2413_v13 = vrot.slane %v2406_v43, %v3373_v62 }
 0x486   : > { %v2475_v1 = vrot.slane %v2461_v34, %v3373_v62 }
 0x487   : > { %v2418_v15 = vsel %vm2276_vm5, %v2413_v13, 0 }
 0x488   : > { %v2476_v4 = vcombine.low %v2468_v31, %v2475_v1 }
 0x48a   : > { %v2483_v37 = vrot.slane %v2476_v4, %v3373_v62 }
 0x48c   : > { %v2488_v40 = vsel %vm2276_vm5, %v2483_v37, 0 }
 0x4d6   : > { %v2227_v35 = vpop.xlane.xlu1 %2226 }
 0x4d7   : > { %3063 = vrcp.f32 %v2227_v35 }
 0x4de   : > { %v2230_v38 = vpop.xlane.xlu0 %2229 }
 0x4df   : > { %3065 = vrcp.f32 %v2230_v38 }
 0x4e1   : > { %v3064_v9 = vpop.eup %3063 }
 0x4e2   : > { %v2241_v47 = vmul.f32 %v3064_v9, %v3705_v0  ;;  %v3052_v9 = vld [vmem:[%s3882_s6 + $0x38] sm:$0xff]  }
 0x4e4   : > { %v2245_v50 = vpack.c.bf16 %v2241_v47, %v2241_v47 }
 0x4e6   : > { %v2233_v14 = vpop.xlane.xlu1 %2232  ;;  %2959 = vmatmul.mubr.msk.bf16.vlgmr.msra.gmra.mrb[16].mxu1 %vm2200_vm4, %v2245_v50 }
 0x4e7   : > { %3067 = vrcp.f32 %v2233_v14  ;;  %2963 = vmatpush3.bf16.msra.mxu1 %v2348_v27  ;;  %2964 = vmatprep.mubr.msk.bf16.mxu1 %vm3088_vm0, %v3891_v21 }
 0x4e8   : > { %2968 = vmatprep.subr.bf16.mxu1 %v3891_v21 }
 0x4e9   : > { %v3066_v62 = vpop.eup %3065 }
 0x4ea   : > { %v2242_v22 = vmul.f32 %v3066_v62, %v3709_v56 }
 0x4ec   : > { %v2246_v26 = vpack.c.bf16 %v2242_v22, %v2242_v22 }
 0x4ee   : > { %2965 = vmatmul.mubr.msk.bf16.vlgmr.msra.gmra.mrb[20].mxu1 %vm2200_vm4, %v2246_v26 }
 0x4ef   : > { %2969 = vmatpush3.bf16.msra.mxu1 %v2418_v15  ;;  %2970 = vmatprep.mubr.msk.bf16.mxu1 %vm3088_vm0, %v3891_v21 }
 0x4f0   : > { %2974 = vmatprep.subr.bf16.mxu1 %v3891_v21 }
 0x4f1   : > { %v3068_v0 = vpop.eup %3067 }
 0x4f2   : > { %v2243_v20 = vmul.f32 %v3068_v0, %v3717_v32  ;;  %v3046_v32 = vld [vmem:[%s3882_s6 + $0x8] sm:$0xff]  }
 0x4f3   : > { %2983 = vmatpush3.bf16.msra.mxu0 %v3046_v32 }
 0x4f4   : > { %v2247_v58 = vpack.c.bf16 %v2243_v20, %v2243_v20  ;;  %2984 = vmatprep.subr.bf16.mxu0 %v3891_v21 }
 0x4f6   : > { %2971 = vmatmul.mubr.msk.bf16.vlgmr.msra.gmra.mrb[24].mxu1 %vm2200_vm4, %v2247_v58 }
 0x4f7   : > { %2975 = vmatpush3.bf16.msra.mxu1 %v2488_v40  ;;  %2976 = vmatprep.mubr.msk.bf16.mxu1 %vm3088_vm0, %v3891_v21 }
 0x4f8   : > { %2985 = vmatpush3.bf16.msra.mxu0 %v3047_v18 }
 0x4f9   : > { %2986 = vmatprep.subr.bf16.mxu0 %v3891_v21 }
 0x4fb   : > { %v2236_v56 = vpop.xlane.xlu0 %2235 }
 0x4fc   : > { %3069 = vrcp.f32 %v2236_v56 }
 0x506   : > { %v3070_v3 = vpop.eup %3069 }
 0x507   : > { %v2244_v17 = vmul.f32 %v3070_v3, %v3747_v45  ;;  %v3048_v45 = vld [vmem:[%s3882_s6 + $0x18] sm:$0xff]  }
 0x508   : > { %2987 = vmatpush3.bf16.msra.mxu0 %v3048_v45 }
 0x509   : > { %v2248_v53 = vpack.c.bf16 %v2244_v17, %v2244_v17  ;;  %2988 = vmatprep.subr.bf16.mxu0 %v3891_v21 }
 0x50b   : > { %2977 = vmatmul.mubr.msk.bf16.vlgmr.msra.gmra.mrb[28].mxu1 %vm2200_vm4, %v2248_v53 }
 0x50c   : > { %2989 = vmatpush3.bf16.msra.mxu0 %v3049_v2  ;;  %v3894_v2 = vld [vmem:[#allocation2_spill] sm:$0xff] }
 0x50d   : > { %2990 = vmatprep.subr.bf16.mxu0 %v3891_v21 }
 0x510   : > { %2991 = vmatpush3.bf16.msra.mxu0 %v3050_v16 }
 0x511   : > { %2992 = vmatprep.subr.bf16.mxu0 %v3891_v21 }
 0x514   : > { %2993 = vmatpush3.bf16.msra.mxu0 %v3051_v5 }
 0x515   : > { %2994 = vmatprep.subr.bf16.mxu0 %v3891_v21 }
 0x518   : > { %2995 = vmatpush3.bf16.msra.mxu0 %v3052_v9 }
 0x5b9   : > { %v2314_v48 = vpop.f32.mrb[16].mxu1 }
 0x5ba   : > { %v2960_v54 = vpop.f32.mrb[17].mxu1 }
 0x5bb   : > { %v2317_v10 = vpop.f32.mrb[18].mxu1 }
 0x5bc   : > { %v2961_v63 = vpop.f32.mrb[19].mxu1 }
 0x5c1   : > { %v2384_v19 = vpop.f32.mrb[20].mxu1 }
 0x5c2   : > { %v2966_v51 = vpop.f32.mrb[21].mxu1 }
 0x5c3   : > { %v2387_v36 = vpop.f32.mrb[22].mxu1 }
 0x5c4   : > { %v2967_v60 = vpop.f32.mrb[23].mxu1 }
 0x5c9   : > { %v2454_v49 = vpop.f32.mrb[24].mxu1 }
 0x5ca   : > { %v2530_v8 = vcombine.low %v2314_v48, %v2454_v49  ;;  %v2531_v28 = vcombine.high %v2314_v48, %v2454_v49  ;;  %v2972_v25 = vpop.f32.mrb[25].mxu1 }
 0x5cb   : > { %v2457_v12 = vpop.f32.mrb[26].mxu1 }
 0x5cc   : > { %v2973_v11 = vpop.f32.mrb[27].mxu1  ;;  %v2538_v41 = vrot.slane %v2530_v8, %v3227_v52  ;;  %v2545_v57 = vrot.slane %v2531_v28, %v3227_v52 }
 0x5de   : > { %v2524_v6 = vpop.f32.mrb[28].mxu1 }
 0x5df   : > { %v2546_v33 = vcombine.low %v2384_v19, %v2524_v6  ;;  %v2547_v46 = vcombine.high %v2384_v19, %v2524_v6  ;;  %v2978_v61 = vpop.f32.mrb[29].mxu1 }
 0x5e0   : > { %v2527_v24 = vpop.f32.mrb[30].mxu1 }
 0x5e1   : > { %v2554_v27 = vrot.slane %v2546_v33, %v3227_v52  ;;  %v2561_v7 = vrot.slane %v2547_v46, %v3227_v52  ;;  %v2979_v44 = vpop.f32.mrb[31].mxu1 }
 0x5e3   : > { %v2562_v55 = vcombine.low %v2538_v41, %v2554_v27  ;;  %v2563_v39 = vcombine.high %v2538_v41, %v2554_v27  ;;  %v2578_v29 = vcombine.low %v2545_v57, %v2561_v7  ;;  %v2579_v30 = vcombine.high %v2545_v57, %v2561_v7 }
 0x5e5   : > { %v2570_v42 = vrot.slane %v2562_v55, %v3238_v59  ;;  %v2577_v43 = vrot.slane %v2563_v39, %v3238_v59  ;;  %v2586_v34 = vrot.slane %v2578_v29, %v3238_v59  ;;  %v2593_v13 = vrot.slane %v2579_v30, %v3238_v59 }
 0x5e7   : > { %v2598_v31 = vcombine.low %v2570_v42, %v2577_v43  ;;  %v2895_v1 = vcombine.high %v2570_v42, %v2577_v43  ;;  %v2614_v15 = vcombine.low %v2586_v34, %v2593_v13  ;;  %v2896_v4 = vcombine.high %v2586_v34, %v2593_v13 }
 0x5e9   : > { %v2605_v37 = vrot.slane %v2598_v31, %v3227_v52  ;;  %v2613_v40 = vrot.slane %v2895_v1, %v3227_v52  ;;  %v2621_v35 = vrot.slane %v2614_v15, %v3227_v52  ;;  %v2629_v38 = vrot.slane %v2896_v4, %v3227_v52 }
 0x5eb   : > { %v2631_v47 = vcombine.high %v2605_v37, %v2613_v40  ;;  %v2647_v50 = vcombine.high %v2621_v35, %v2629_v38  ;;  %v2630_v14 = vcombine.low %v2605_v37, %v2613_v40  ;;  %v2646_v62 = vcombine.low %v2621_v35, %v2629_v38 }
 0x5ed   : > { %v2645_v22 = vrot.slane %v2631_v47, %v3238_v59  ;;  %v2661_v21 = vrot.slane %v2647_v50, %v3238_v59  ;;  %v2638_v26 = vrot.slane %v2630_v14, %v3238_v59  ;;  %v2654_v0 = vrot.slane %v2646_v62, %v3238_v59 }
 0x5ef   : > { %v2664_v20 = vcombine.low %v2645_v22, %v2661_v21  ;;  %v2663_v58 = vcombine.high %v2638_v26, %v2654_v0  ;;  %v2665_v52 = vcombine.high %v2645_v22, %v2661_v21  ;;  %v2662_v56 = vcombine.low %v2638_v26, %v2654_v0 }
 0x5f1   : > { %2671 = vrot.lane.b32.xlu0 %v2664_v20, %s3082_s26  ;;  %2667 = vrot.lane.b32.xlu1 %v2663_v58, %s3083_s27 }
 0x5f5   : > { %2675 = vrot.lane.b32.xlu1 %v2665_v52, %s3081_s23  ;;  %s273_s23 = scalar_lea.vmem %s3883_s7, %s2849_s13 }
 0x663   : > { %v2668_v3 = vpop.permute.xlu1 %2667  ;;  %v2672_v17 = vpop.permute.xlu0 %2671 }
 0x664   : > { %v2678_v53 = vsel %vm1932_vm2, %v2662_v56, %v2668_v3 }
 0x665   : > { %v2680_v32 = vsel %vm2679_vm6, %v2678_v53, %v2672_v17 }
 0x667   : > { %v2676_v23 = vpop.permute.xlu1 %2675 }
 0x668   : > { %v2682_v59 = vsel %vm2681_vm7, %v2680_v32, %v2676_v23 }
 0x669   : > { %v2683_v18 = vpack.c.bf16 %v2682_v59, %v2682_v59 }
 0x66b   : > { %2997 = vmatmul.mubr.bf16.vlgmr.msra.gmra.mrb[4].mxu0 %v2683_v18 }
 0x73e   : > { %v2782_v45 = vpop.f32.mrb[4].mxu0 }
 0x73f   : > { %v2788_v16 = vadd.f32 %v2782_v45, %v3894_v2  ;;  %v2998_v48 = vpop.f32.mrb[5].mxu0 }
 0x740   : > { %v2785_v54 = vpop.f32.mrb[6].mxu0 }
 0x741   : > { %v2789_v10 = vpack.c.bf16 %v2788_v16, %v2788_v16  ;;  %v2999_v63 = vpop.f32.mrb[7].mxu0 }
 0x743   : > { %2790 = vst [vmem:[%s273_s23] sm:$0xf] %v2789_v10 }
 0x744 PF: > { %s17_s24 = sadd.s32 1, %s3077_s24  }
 0x745   : > { %p14_p4 = scmp.ge.s32.totalorder %s17_s24, 4  }
 0x747   :  { %16 = sbr.rel (!%p14_p4) target bundleno = 1 (0x1), region = 78 }

// kernel: qwen_detection_forward.5
= control target key start
LH: loop header
LB: loop body
LE: loop exit
PB: predicated region body
PF: predicated region fallthrough
CT: control target
= control target key end

     0   :  { %12 = vsyncpa [#allocation3], 0  ;;  %s4031_s0 = inlined_call_operand.vmem [shape: bf16[16,128], index: 0, kind: input, shape index: {}, may-alias: {0,7}]   ;;  %s4032_s1 = inlined_call_operand.vmem [shape: bf16[1,128], index: 1, kind: input, shape index: {}]   ;;  %s4033_s2 = inlined_call_operand.hbm [shape: bf16[128,256], index: 2, kind: input, shape index: {}]   ;;  %s4034_s3 = inlined_call_operand.vmem [shape: bf16[1,256], index: 3, kind: input, shape index: {}]   ;;  %s4035_s4 = inlined_call_operand.vmem [shape: f32[8,32], index: 4, kind: input, shape index: {}]   ;;  %s4036_s5 = inlined_call_operand.vmem [shape: f32[8,32], index: 5, kind: input, shape index: {}]   ;;  %s4037_s6 = inlined_call_operand.hbm [shape: bf16[128,128], index: 6, kind: input, shape index: {}]   ;;  %s4038_s7 = inlined_call_operand.vmem [shape: bf16[16,128], index: 7, kind: output, shape index: {}, may-alias: {0,7}]  }
   0x1   :  { %13 = vsyncpa [#allocation5], 0  ;;  %s3281_s24 = smov 0  }
   0x2 LB: > { %s3224_s25 = smov [#allocation2]   ;;  %s3287_s27 = sadd.s32 4294967295, %s3222_s24   ;;  %s3222_s24 = sphi %s3281_s24, %s19_s24  }
   0x3   : > { %s217_s26 = sshll.u32 %s3224_s25, 4  ;;  %p2898_p0 = scmp.ge.s32.totalorder %s3222_s24, 1  ;;  %s218_s26 = int_to_ptr.vmem [resolvable:$true] %s217_s26 }
   0x4   : > { %p202_p1 = scmp.lt.s32.totalorder %s3222_s24, 3  ;;  %p4039_p3 = scmp.eq.s32.totalorder %s3287_s27, 0 }
   0x5   : > { %s3225_s29 = smov [#allocation4]   ;;  %s3152_s11 = scalar_lea.hbm %s4033_s2, 2048 }
   0x6   : > { %p3291_p2 = pnand %p2898_p0, %p202_p1  ;;  %s239_s30 = sshll.u32 %s3225_s29, 4  ;;  %s3304_s30 = int_to_ptr.vmem [resolvable:$true] %s239_s30 }
   0x7   : > { %p3153_p6 = scmp.ne.s32.totalorder %s4033_s2, %s3152_s11  ;;  %p3159_p10 = scmp.lt.u32.totalorder %s3152_s11, %s4033_s2 }
   0x8   : > { %s4047_s28 = scalar_select %p3291_p2, 1, 0 }
   0x9   : > { %p3064_p4 = pneg %p3291_p2 }
   0xb   : > { %p3300_p5 = pnand %p4039_p3, %p3064_p4 }
   0xd   : > { %p3154_p7 = pneg %p3300_p5 }
   0xf   : > { %p3155_p8 = pnand %p3154_p7, %p3153_p6 }
  0x11   : > { %p3156_p9 = pneg %p3155_p8 }
  0x13   : > { %p3161_p11 = pnand %p3159_p10, %p3156_p9 }
  0x15   : > { %3164 = shalt.err (!%p3161_p11)
}
  0x16   : > { %s3165_s16 = scalar_lea.vmem %s218_s26, 2048  ;;  %p3173_p1 = scmp.lt.s32.totalorder %s218_s26, %s218_s26 }
  0x17   : > { %p3166_p12 = scmp.ne.s32.totalorder %s218_s26, %s3165_s16  ;;  %p3174_p4 = scmp.lt.s32.totalorder %s3165_s16, %s3165_s16 }
  0x19   : > { %p3168_p13 = pnand %p3166_p12, %p3154_p7  ;;  %p3175_p3 = por %p3174_p4, %p3173_p1 }
  0x1b   : > { %p3169_p0 = pneg %p3168_p13 }
  0x1d   : > { %p3176_p2 = pnand %p3175_p3, %p3169_p0 }
  0x1f   : > { %3179 = shalt.err (!%p3176_p2)
}
  0x20   : > { %s3226_s17 = smov 128   ;;  %s3227_s18 = smov 8  }
  0x21   : > { %3067 = dma.hbm_to_vmem [thread:$0]  (!%p3300_p5), %s4033_s2, 2048, %s218_s26, [#allocation3], %s3226_s17, %s3226_s17, %s3227_s18  }
  0x22   : > { %s3180_s23 = scalar_lea.hbm %s4037_s6, 1024 }
  0x23   : > { %p3181_p6 = scmp.ne.s32.totalorder %s4037_s6, %s3180_s23  ;;  %p3187_p8 = scmp.lt.u32.totalorder %s3180_s23, %s4037_s6 }
  0x25   : > { %p3183_p2 = pnand %p3181_p6, %p3154_p7 }
  0x27   : > { %p3184_p3 = pneg %p3183_p2 }
  0x29   : > { %p3189_p9 = pnand %p3187_p8, %p3184_p3 }
  0x2b   : > { %3192 = shalt.err (!%p3189_p9)
}
  0x2c   : > { %s3193_s26 = scalar_lea.vmem %s3304_s30, 1024  ;;  %p3201_p13 = scmp.lt.s32.totalorder %s3304_s30, %s3304_s30 }
  0x2d   : > { %p3194_p10 = scmp.ne.s32.totalorder %s3304_s30, %s3193_s26  ;;  %p3202_p0 = scmp.lt.s32.totalorder %s3193_s26, %s3193_s26 }
  0x2f   : > { %p3196_p11 = pnand %p3194_p10, %p3154_p7  ;;  %p3203_p1 = por %p3202_p0, %p3201_p13 }
  0x31   : > { %p3197_p12 = pneg %p3196_p11 }
  0x33   : > { %p3204_p4 = pnand %p3203_p1, %p3197_p12 }
  0x35   : > { %3207 = shalt.err (!%p3204_p4)
}
  0x36   : > { %s3228_s11 = smov 64   ;;  %s3229_s12 = smov 4  }
  0x37   : > { %3070 = dma.hbm_to_vmem [thread:$0]  (!%p3300_p5), %s4037_s6, 1024, %s3304_s30, [#allocation5], %s3228_s11, %s3228_s11, %s3229_s12  }
  0x38   : > { %p4049_p6 = scmp.ne.s32.totalorder %s4047_s28, 0 }
  0x3a   : > { %262 = sbr.rel (%p4049_p6) target bundleno = 1919 (0x77f), region = 48 }
  0x41   : > { %p4050_p7 = scmp.eq.s32.totalorder %s3287_s27, 0 }
  0x43   : > { %3213 = dma.done.wait (%p4050_p7), [#allocation3], 2048   ;;  %p4051_p2 = pmov %p4050_p7 }
  0x45   : > { %3215 = vsyncadd (%p4051_p2), [#allocation3], 4294965248  ;;  %p4052_p3 = pmov %p4051_p2 }
  0x46   : > { %p4053_p8 = pmov %p4051_p2 }
  0x47   : > { %3217 = dma.done.wait (%p4052_p3), [#allocation5], 1024  }
  0x48   : > { %3219 = vsyncadd (%p4053_p8), [#allocation5], 4294966272  ;;  %p296_p9 = scmp.lt.s32.totalorder %s3287_s27, 1  ;;  %v3100_v2 = vld [vmem:[#allocation2 + $0x4] ss:$8 sps:$4 sm:$0xff]   ;;  %v4042_v16 = vmov 0   ;;  %v4041_v22 = vlaneseq }
  0x49   : > { %v3102_v3 = vld [vmem:[#allocation2] ss:$8 sps:$4 sm:$0xff]   ;;  %v3103_v4 = vld [vmem:[#allocation2 + $0x14] ss:$8 sps:$4 sm:$0xff]   ;;  %440 = vmatprep.subr.bf16.mxu0 %v3100_v2  ;;  %v3105_v6 = vld [vmem:[#allocation2 + $0x10] ss:$8 sps:$4 sm:$0xff]   ;;  %472 = vmatprep.mubr.bf16.mxu0 %v4042_v16 }
  0x4a   : > { %s4060_s27 = smov (!%p296_p9, %s3287_s27), 1  ;;  %441 = vmatpush1.bf16.msra.mxu0 %v3102_v3  ;;  %v3106_v7 = vld [vmem:[#allocation2 + $0x24] ss:$8 sps:$4 sm:$0xff]   ;;  %v3108_v8 = vld [vmem:[#allocation2 + $0x20] ss:$8 sps:$4 sm:$0xff]   ;;  %v3379_v24 = vshrl.u32 %v4041_v22, 7 }
  0x4b   : > { %s2905_s28 = sshll.u32 %s4060_s27, 2  ;;  %442 = vmatprep.subr.bf16.mxu0 %v3103_v4  ;;  %v3109_v9 = vld [vmem:[#allocation2 + $0x34] ss:$8 sps:$4 sm:$0xff]   ;;  %v3111_v10 = vld [vmem:[#allocation2 + $0x30] ss:$8 sps:$4 sm:$0xff]   ;;  %v4044_v33 = vmov 0.0  }
  0x4c   : > { %s299_s15 = scalar_lea.vmem %s4031_s0, %s2905_s28  ;;  %v3112_v11 = vld [vmem:[#allocation2 + $0x44] ss:$8 sps:$4 sm:$0xff]   ;;  %v3114_v12 = vld [vmem:[#allocation2 + $0x40] ss:$8 sps:$4 sm:$0xff]   ;;  %v3115_v13 = vld [vmem:[#allocation2 + $0x54] ss:$8 sps:$4 sm:$0xff]   ;;  %2988 = vmatprep.subr.bf16.mxu1 %v4044_v33  ;;  %s303_s13 = scalar_lea.vmem %s4038_s7, %s2905_s28 }
  0x4d   : > { %v305_v0 = vld [vmem:[%s299_s15] sm:$0xf]  ;;  %v3117_v14 = vld [vmem:[#allocation2 + $0x50] ss:$8 sps:$4 sm:$0xff]   ;;  %v3118_v15 = vld [vmem:[#allocation2 + $0x64] ss:$8 sps:$4 sm:$0xff]  }
  0x4e   : > { %v3373_v1 = vunpack.c.l.bf16 %v305_v0  ;;  %443 = vmatpush1.bf16.msra.mxu0 %v3105_v6  ;;  %v3120_v17 = vld [vmem:[#allocation2 + $0x60] ss:$8 sps:$4 sm:$0xff]   ;;  %v3121_v18 = vld [vmem:[#allocation2 + $0x74] ss:$8 sps:$4 sm:$0xff]   ;;  %v3123_v19 = vld [vmem:[#allocation2 + $0x70] ss:$8 sps:$4 sm:$0xff]  }
  0x4f   : > { %444 = vmatprep.subr.bf16.mxu0 %v3106_v7  ;;  %v315_v25 = vld [vmem:[%s4032_s1] sm:$0x1]  ;;  %v3385_v27 = vsub.s32 0, %v3379_v24  ;;  %v348_v36 = vsub.s32 2, %v3379_v24  ;;  %s3232_s20 = smov 96   ;;  %s3233_s21 = smov 64  }
  0x50   : > { %4054 = vst [vmem:[#allocation8_spill] sm:$0xff] %v3373_v1  ;;  %v307_v5 = vmul.f32 %v3373_v1, %v3373_v1  ;;  %v316_v26 = vunpack.c.l.bf16 %v315_v25  ;;  %v339_v34 = vld [vmem:[%s4034_s3] sm:$0x3]  ;;  %s3234_s22 = smov 32   ;;  %v3235_v47 = vmov 1983009808  }
  0x51   : > { %v340_v35 = vunpack.c.l.bf16 %v339_v34  ;;  %v596_v48 = vunpack.c.l.s4 %v3235_v47  ;;  %v3236_v50 = vmov 1934713408   ;;  %s3237_s23 = smov 16   ;;  %s3238_s25 = smov 112   ;;  %vm3239_vm0 = vmmov 0  }
  0x52   : > { %308 = vadd.xlane.f32.xlu0 %v307_v5  ;;  %445 = vmatpush1.bf16.msra.mxu0 %v3108_v8  ;;  %v320_v28 = vrot.slane %v316_v26, %v3385_v27  ;;  %v628_v51 = vunpack.c.l.s4 %v3236_v50  ;;  %vm923_vm1 = vcmask 130048   ;;  %vm1962_vm2 = vcmask 261120  }
  0x53   : > { %446 = vmatprep.subr.bf16.mxu0 %v3109_v9  ;;  %v345_v37 = vrot.slane %v340_v35, %v3385_v27  ;;  %v349_v38 = vrot.slane %v340_v35, %v348_v36  ;;  %v597_v49 = vunpack.c.0.s8 %v596_v48  ;;  %2990 = vmatprep.mubr.msk.bf16.mxu1 %vm3239_vm0, %v4044_v33  ;;  %vm2230_vm4 = vcmask 64512  }
  0x54   : > { %v629_v53 = vunpack.c.0.s8 %v628_v51  ;;  %vm2306_vm5 = vcmask 1043456   ;;  %vm2709_vm6 = vcmask 523264   ;;  %vm2711_vm7 = vcmask 785408  }
  0x55   : > { %v355_v39 = vrot.slane %v345_v37, %v3385_v27  ;;  %v359_v40 = vrot.slane %v349_v38, %v3385_v27  ;;  %v3406_v52 = vsub.s32 %v597_v49, %v3379_v24 }
  0x56   : > { %447 = vmatpush1.bf16.msra.mxu0 %v3111_v10  ;;  %v3417_v59 = vsub.s32 %v629_v53, %v3379_v24 }
  0x57   : > { %448 = vmatprep.subr.bf16.mxu0 %v3112_v11 }
  0x5a   : > { %449 = vmatpush1.bf16.msra.mxu0 %v3114_v12 }
  0x5b   : > { %450 = vmatprep.subr.bf16.mxu0 %v3115_v13 }
  0x5e   : > { %451 = vmatpush1.bf16.msra.mxu0 %v3117_v14 }
  0x5f   : > { %452 = vmatprep.subr.bf16.mxu0 %v3118_v15 }
  0x62   : > { %453 = vmatpush1.bf16.msra.mxu0 %v3120_v17 }
  0x63   : > { %454 = vmatprep.subr.bf16.mxu0 %v3121_v18 }
  0x66   : > { %455 = vmatpush1.bf16.msra.mxu0 %v3123_v19 }
  0x67   : > { %3036 = vmatprep.subr.bf16.mxu0 %v4044_v33 }
  0xdf   : > { %v309_v20 = vpop.xlane.xlu0 %308 }
  0xe0   : > { %v311_v21 = vmul.f32 0.0078125, %v309_v20 }
  0xe2   : > { %v312_v23 = vadd.f32 1e-06, %v311_v21 }
  0xe4   : > { %3134 = vrsqrt.f32 %v312_v23 }
  0xee   : > { %v3135_v29 = vpop.eup %3134 }
  0xef   : > { %v314_v30 = vmul.f32 %v3135_v29, %v3373_v1 }
  0xf1   : > { %v321_v31 = vmul.f32 %v320_v28, %v314_v30 }
  0xf3   : > { %v322_v32 = vpack.c.bf16 %v321_v31, %v321_v31 }
  0xf5   : > { %473 = vmatmul.mubr.bf16.vlgmr.msra.gmra.mrb[0].mxu0 %v322_v32 }
  0xf6   : > { %3052 = vmatprep.mubr.msk.bf16.mxu0 %vm3239_vm0, %v4044_v33 }
 0x1c8   : > { %v474_v41 = vpop.f32.mrb[0].mxu0 }
 0x1c9   : > { %v475_v42 = vadd.f32 %v474_v41, %v355_v39  ;;  %v476_v43 = vpop.f32.mrb[1].mxu0 }
 0x1ca   : > { %v3398_v44 = vadd.f32 %v476_v43, %v359_v40  ;;  %v478_v45 = vpop.f32.mrb[2].mxu0 }
 0x1cb   : > { %v479_v46 = vpop.f32.mrb[3].mxu0  ;;  %584 = vrot.lane.b32.xlu1 %v475_v42, %s3232_s20 }
 0x1cc   : > { %662 = vrot.lane.b32.xlu0 %v3398_v44, %s3232_s20  ;;  %v672_v56 = vrot.slane %v3398_v44, %v3406_v52  ;;  %v665_v60 = vcombine.high %v3398_v44, %v4044_v33 }
 0x1ce   : > { %v679_v3 = vrot.slane %v665_v60, %v3406_v52 }
 0x1cf   : > { %587 = vrot.lane.b32.xlu1 %v475_v42, %s3233_s21 }
 0x1d3   : > { %590 = vrot.lane.b32.xlu1 %v475_v42, %s3234_s22 }
 0x23d   : > { %v585_v54 = vpop.permute.xlu1 %584 }
 0x23e   : > { %v3408_v55 = vpop.permute.xlu0 %662 }
 0x23f   : > { %v680_v57 = vcombine.high %v3408_v55, %v4044_v33  ;;  %v687_v58 = vrot.slane %v3408_v55, %v3406_v52 }
 0x241   : > { %v695_v61 = vcombine.low %v672_v56, %v687_v58  ;;  %v696_v62 = vcombine.high %v672_v56, %v687_v58  ;;  %v588_v63 = vpop.permute.xlu1 %587  ;;  %v694_v0 = vrot.slane %v680_v57, %v3406_v52  ;;  %v3240_v58 = vmov 1966171168  }
 0x242   : > { %v593_v4 = vcombine.low %v475_v42, %v588_v63  ;;  %v594_v18 = vcombine.high %v475_v42, %v588_v63  ;;  %v485_v60 = vunpack.c.l.s4 %v3240_v58  ;;  %v481_v63 = vld [vmem:[%s4035_s4] sm:$0xff] }
 0x243   : > { %v3423_v2 = vrot.slane %v695_v61, %v3417_v59  ;;  %v3430_v7 = vrot.slane %v696_v62, %v3417_v59  ;;  %v711_v9 = vcombine.low %v679_v3, %v694_v0  ;;  %v712_v13 = vcombine.high %v679_v3, %v694_v0  ;;  %v532_v0 = vld [vmem:[%s4036_s5] sm:$0xff] }
 0x244   : > { %v601_v11 = vrot.slane %v593_v4, %v3406_v52  ;;  %v608_v26 = vrot.slane %v594_v18, %v3406_v52  ;;  %v486_v61 = vunpack.c.0.s8 %v485_v60  ;;  %v534_v60 = vcombine.high %v532_v0, %v532_v0 }
 0x245   : > { %1060 = vrot.lane.b32.xlu0 %v3423_v2, %s3237_s23  ;;  %v591_v5 = vpop.permute.xlu1 %590  ;;  %v1012_v6 = vsub.f32 0.0, %v3423_v2  ;;  %v1014_v12 = vsub.f32 0.0, %v3430_v7  ;;  %v3440_v17 = vrot.slane %v711_v9, %v3417_v59  ;;  %v3446_v19 = vcombine.high %v3423_v2, %v4044_v33 }
 0x246   : > { %v609_v8 = vcombine.low %v585_v54, %v591_v5  ;;  %v610_v14 = vcombine.high %v585_v54, %v591_v5  ;;  %v3455_v25 = vrot.slane %v712_v13, %v3417_v59  ;;  %v3462_v28 = vcombine.high %v3430_v7, %v4044_v33 }
 0x247   : > { %1028 = vrot.lane.b32.xlu1 %v1012_v6, %s3238_s25  ;;  %v1013_v32 = vsub.f32 0.0, %v3446_v19  ;;  %v3484_v38 = vcombine.high %v3440_v17, %v4044_v33  ;;  %v1016_v40 = vsub.f32 0.0, %v3440_v17  ;;  %v3552_v62 = vsub.s32 %v486_v61, %v3379_v24 }
 0x248   : > { %v617_v10 = vrot.slane %v609_v8, %v3406_v52  ;;  %v624_v20 = vrot.slane %v610_v14, %v3406_v52  ;;  %v1015_v36 = vsub.f32 0.0, %v3462_v28  ;;  %v3492_v41 = vcombine.high %v3455_v25, %v4044_v33 }
 0x249   : > { %1064 = vrot.lane.b32.xlu0 %v3430_v7, %s3237_s23  ;;  %v1018_v45 = vsub.f32 0.0, %v3455_v25  ;;  %v1017_v53 = vsub.f32 0.0, %v3484_v38  ;;  %v490_v3 = vrot.slane %v481_v63, %v3552_v62  ;;  %v541_v4 = vrot.slane %v532_v0, %v3552_v62 }
 0x24a   : > { %v625_v15 = vcombine.low %v601_v11, %v617_v10  ;;  %v626_v21 = vcombine.high %v601_v11, %v617_v10  ;;  %v641_v30 = vcombine.low %v608_v26, %v624_v20  ;;  %v642_v39 = vcombine.high %v608_v26, %v624_v20 }
 0x24b   : > { %1032 = vrot.lane.b32.xlu1 %v1014_v12, %s3238_s25  ;;  %v1019_v54 = vsub.f32 0.0, %v3492_v41  ;;  %v506_v5 = vrot.slane %v490_v3, %v3552_v62  ;;  %v557_v6 = vrot.slane %v541_v4, %v3552_v62 }
 0x24c   : > { %v3450_v23 = vrot.slane %v625_v15, %v3417_v59  ;;  %v3465_v29 = vrot.slane %v626_v21, %v3417_v59  ;;  %v3473_v34 = vrot.slane %v641_v30, %v3417_v59  ;;  %v3499_v43 = vrot.slane %v642_v39, %v3417_v59 }
 0x24d   : > { %1068 = vrot.lane.b32.xlu0 %v3440_v17, %s3237_s23  ;;  %v528_v8 = vcombine.high %v506_v5, %v506_v5  ;;  %v3565_v10 = vrot.slane %v506_v5, %v3385_v27  ;;  %v3568_v11 = vrot.slane %v557_v6, %v3385_v27  ;;  %v579_v12 = vcombine.high %v557_v6, %v557_v6 }
 0x24e   : > { %v851_v31 = vsub.f32 0.0, %v3450_v23  ;;  %v853_v35 = vsub.f32 0.0, %v3465_v29  ;;  %v855_v37 = vsub.f32 0.0, %v3473_v34  ;;  %v3496_v42 = vcombine.high %v3450_v23, %v4044_v33 }
 0x24f   : > { %1062 = vrot.lane.b32.xlu1 %v3446_v19, %s3237_s23  ;;  %v3508_v47 = vcombine.high %v3465_v29, %v4044_v33  ;;  %v857_v48 = vsub.f32 0.0, %v3499_v43  ;;  %v3516_v50 = vcombine.high %v3473_v34, %v4044_v33  ;;  %v3532_v56 = vcombine.high %v3499_v43, %v4044_v33 }
 0x250   : > { %v852_v46 = vsub.f32 0.0, %v3496_v42  ;;  %v1004_v15 = vmul.f32 %v3565_v10, %v3423_v2  ;;  %v3575_v21 = vrot.slane %v528_v8, %v3385_v27  ;;  %v3578_v26 = vrot.slane %v579_v12, %v3385_v27 }
 0x251   : > { %1072 = vrot.lane.b32.xlu0 %v3455_v25, %s3237_s23  ;;  %v854_v49 = vsub.f32 0.0, %v3508_v47  ;;  %v856_v51 = vsub.f32 0.0, %v3516_v50  ;;  %v858_v57 = vsub.f32 0.0, %v3532_v56  ;;  %v3603_v12 = vrot.slane %v534_v60, %v3552_v62 }
 0x253   : > { %1066 = vrot.lane.b32.xlu1 %v3462_v28, %s3237_s23 }
 0x255   : > { %867 = vrot.lane.b32.xlu0 %v851_v31, %s3238_s25 }
 0x257   : > { %1030 = vrot.lane.b32.xlu1 %v1013_v32, %s3238_s25 }
 0x259   : > { %871 = vrot.lane.b32.xlu0 %v853_v35, %s3238_s25  ;;  %v498_v35 = vcombine.high %v490_v3, %v490_v3 }
 0x25b   : > { %1034 = vrot.lane.b32.xlu1 %v1015_v36, %s3238_s25 }
 0x25d   : > { %875 = vrot.lane.b32.xlu0 %v855_v37, %s3238_s25  ;;  %v1006_v37 = vmul.f32 %v3575_v21, %v3430_v7 }
 0x25f   : > { %1070 = vrot.lane.b32.xlu1 %v3484_v38, %s3237_s23 }
 0x261   : > { %1036 = vrot.lane.b32.xlu0 %v1016_v40, %s3238_s25  ;;  %v549_v40 = vcombine.high %v541_v4, %v541_v4 }
 0x263   : > { %1074 = vrot.lane.b32.xlu1 %v3492_v41, %s3237_s23 }
 0x265   : > { %1040 = vrot.lane.b32.xlu0 %v1018_v45, %s3238_s25 }
 0x267   : > { %869 = vrot.lane.b32.xlu1 %v852_v46, %s3238_s25 }
 0x269   : > { %879 = vrot.lane.b32.xlu0 %v857_v48, %s3238_s25 }
 0x26b   : > { %873 = vrot.lane.b32.xlu1 %v854_v49, %s3238_s25  ;;  %v483_v49 = vcombine.high %v481_v63, %v481_v63 }
 0x26d   : > { %899 = vrot.lane.b32.xlu0 %v3450_v23, %s3237_s23  ;;  %v497_v61 = vrot.slane %v483_v49, %v3552_v62 }
 0x26f   : > { %877 = vrot.lane.b32.xlu1 %v856_v51, %s3238_s25 }
 0x271   : > { %903 = vrot.lane.b32.xlu0 %v3465_v29, %s3237_s23 }
 0x273   : > { %1038 = vrot.lane.b32.xlu1 %v1017_v53, %s3238_s25  ;;  %v520_v53 = vrot.slane %v498_v35, %v3552_v62 }
 0x275   : > { %907 = vrot.lane.b32.xlu0 %v3473_v34, %s3237_s23  ;;  %v3596_v4 = vrot.slane %v520_v53, %v3385_v27  ;;  %v530_v5 = vcombine.high %v520_v53, %v520_v53 }
 0x277   : > { %1042 = vrot.lane.b32.xlu1 %v1019_v54, %s3238_s25  ;;  %v571_v54 = vrot.slane %v549_v40, %v3552_v62 }
 0x279   : > { %911 = vrot.lane.b32.xlu0 %v3499_v43, %s3237_s23  ;;  %v3599_v63 = vrot.slane %v571_v54, %v3385_v27  ;;  %v581_v6 = vcombine.high %v571_v54, %v571_v54 }
 0x27b   : > { %881 = vrot.lane.b32.xlu1 %v858_v57, %s3238_s25 }
 0x27f   : > { %901 = vrot.lane.b32.xlu1 %v3496_v42, %s3237_s23 }
 0x283   : > { %905 = vrot.lane.b32.xlu1 %v3508_v47, %s3237_s23 }
 0x287   : > { %909 = vrot.lane.b32.xlu1 %v3516_v50, %s3237_s23 }
 0x28b   : > { %913 = vrot.lane.b32.xlu1 %v3532_v56, %s3237_s23 }
 0x2b7   : > { %v1061_v9 = vpop.permute.xlu0 %1060 }
 0x2b9   : > { %v1029_v13 = vpop.permute.xlu1 %1028 }
 0x2ba   : > { %v1084_v14 = vsel %vm923_vm1, %v1029_v13, %v1061_v9 }
 0x2bb   : > { %v1092_v18 = vmul.f32 %v1084_v14, %v3568_v11  ;;  %v1065_v20 = vpop.permute.xlu0 %1064  ;;  %v513_v14 = vrot.slane %v497_v61, %v3552_v62 }
 0x2bd   : > { %v1100_v30 = vadd.f32 %v1092_v18, %v1004_v15  ;;  %v1033_v31 = vpop.permute.xlu1 %1032  ;;  %v499_v15 = vcombine.high %v497_v61, %v497_v61  ;;  %v1005_v18 = vmul.f32 %v3596_v4, %v3446_v19 }
 0x2be   : > { %v1086_v32 = vsel %vm923_vm1, %v1033_v31, %v1065_v20  ;;  %v3613_v31 = vrot.slane %v530_v5, %v3385_v27 }
 0x2bf   : > { %v1108_v36 = vpack.c.bf16 %v1100_v30, %v1100_v30  ;;  %v1094_v2 = vmul.f32 %v1086_v32, %v3578_v26  ;;  %v3584_v39 = vpop.permute.xlu0 %1068  ;;  %v3616_v32 = vrot.slane %v581_v6, %v3385_v27 }
 0x2c0   : > { %v1007_v49 = vmul.f32 %v3613_v31, %v3462_v28 }
 0x2c1   : > { %v1102_v45 = vadd.f32 %v1094_v2, %v1006_v37  ;;  %v1063_v46 = vpop.permute.xlu1 %1062  ;;  %v1200_v48 = vrot.slane %v1108_v36, %v3552_v62  ;;  %v564_v2 = vrot.slane %v3603_v12, %v3552_v62 }
 0x2c3   : > { %v3587_v51 = vpop.permute.xlu0 %1072  ;;  %v1110_v57 = vpack.c.bf16 %v1102_v45, %v1102_v45  ;;  %v1207_v7 = vrot.slane %v1200_v48, %v3552_v62 }
 0x2c5   : > { %v1067_v58 = vpop.permute.xlu1 %1066  ;;  %v1228_v8 = vrot.slane %v1110_v57, %v3552_v62  ;;  %v2927_v0 = vpack.i.b16 %v1207_v7, %v1207_v7  ;;  %v1307_v40 = vunpack.i.h.s16 %v1207_v7  ;;  %v3629_v57 = vrot.slane %v499_v15, %v3552_v62 }
 0x2c6   : > { %v3632_v7 = vrot.slane %v513_v14, %v3385_v27 }
 0x2c7   : > { %v3593_v3 = vpop.permute.xlu0 %867  ;;  %v1235_v35 = vrot.slane %v1228_v8, %v3552_v62  ;;  %v1341_v19 = vrot.slane %v2927_v0, %v3385_v27  ;;  %v3638_v8 = vrot.slane %v564_v2, %v3385_v27  ;;  %v1323_v28 = vpack.i.b16 %v1307_v40, %v1307_v40 }
 0x2c8   : > { %v580_v0 = vcombine.high %v564_v2, %v564_v2  ;;  %v1008_v2 = vmul.f32 %v3632_v7, %v3440_v17 }
 0x2c9   : > { %v1031_v9 = vpop.permute.xlu1 %1030  ;;  %v1311_v60 = vunpack.i.h.s16 %v1235_v35  ;;  %v2929_v61 = vpack.i.b16 %v1235_v35, %v1235_v35  ;;  %v531_v35 = vcombine.high %v3629_v57, %v3629_v57 }
 0x2ca   : > { %v1085_v13 = vsel %vm923_vm1, %v1031_v9, %v1063_v46  ;;  %v529_v46 = vcombine.high %v513_v14, %v513_v14  ;;  %v1403_v9 = vpack.i.b16 %v1341_v19, %v1341_v19  ;;  %v3646_v14 = vrot.slane %v3629_v57, %v3385_v27 }
 0x2cb   : > { %v1093_v20 = vmul.f32 %v1085_v13, %v3599_v63  ;;  %v3610_v30 = vpop.permute.xlu0 %871  ;;  %v3661_v57 = vrot.slane %v580_v0, %v3385_v27  ;;  %v550_v0 = vcombine.high %v3603_v12, %v3603_v12  ;;  %v3688_v1 = vrot.slane %v531_v35, %v3385_v27 }
 0x2cc   : > { %v3641_v13 = vrot.slane %v529_v46, %v3385_v27  ;;  %v1408_v17 = vrot.slane %v1403_v9, %v3385_v27 }
 0x2cd   : > { %v1101_v36 = vadd.f32 %v1093_v20, %v1005_v18  ;;  %v1035_v37 = vpop.permute.xlu1 %1034 }
 0x2ce   : > { %v1087_v45 = vsel %vm923_vm1, %v1035_v37, %v1067_v58  ;;  %v1357_v37 = vrot.slane %v2929_v61, %v3385_v27 }
 0x2cf   : > { %v1109_v48 = vpack.c.bf16 %v1101_v36, %v1101_v36  ;;  %v1095_v53 = vmul.f32 %v1087_v45, %v3616_v32  ;;  %v3626_v54 = vpop.permute.xlu0 %875  ;;  %v1327_v36 = vpack.i.b16 %v1311_v60, %v1311_v60  ;;  %v1010_v60 = vmul.f32 %v3641_v13, %v3455_v25 }
 0x2d1   : > { %v1214_v5 = vrot.slane %v1109_v48, %v3552_v62  ;;  %v1103_v58 = vadd.f32 %v1095_v53, %v1007_v49  ;;  %v3635_v6 = vpop.permute.xlu1 %1070  ;;  %v1345_v53 = vrot.slane %v1323_v28, %v3385_v27 }
 0x2d3   : > { %v1221_v15 = vrot.slane %v1214_v5, %v3552_v62  ;;  %v1111_v18 = vpack.c.bf16 %v1103_v58, %v1103_v58  ;;  %v1037_v20 = vpop.permute.xlu0 %1036 }
 0x2d4   : > { %v1088_v40 = vsel %vm923_vm1, %v1037_v20, %v3584_v39  ;;  %v1431_v20 = vpack.i.b16 %v1357_v37, %v1357_v37 }
 0x2d5   : > { %v1309_v19 = vunpack.i.h.s16 %v1221_v15  ;;  %v2928_v45 = vpack.i.b16 %v1221_v15, %v1221_v15  ;;  %v1242_v46 = vrot.slane %v1111_v18, %v3552_v62  ;;  %v1096_v48 = vmul.f32 %v1088_v40, %v3638_v8  ;;  %v3657_v49 = vpop.permute.xlu1 %1074 }
 0x2d6   : > { %v1361_v18 = vrot.slane %v1327_v36, %v3385_v27 }
 0x2d7   : > { %v1325_v61 = vpack.i.b16 %v1309_v19, %v1309_v19  ;;  %v1349_v39 = vrot.slane %v2928_v45, %v3385_v27  ;;  %v1249_v5 = vrot.slane %v1242_v46, %v3552_v62  ;;  %v1104_v58 = vadd.f32 %v1096_v48, %v1008_v2  ;;  %v1041_v15 = vpop.permute.xlu0 %1040 }
 0x2d8   : > { %v1090_v28 = vsel %vm923_vm1, %v1041_v15, %v3587_v51  ;;  %v1410_v45 = vpack.i.b16 %v1345_v53, %v1345_v53  ;;  %v1517_v48 = vshrl.u32 %v1408_v17, 16  ;;  %v1438_v15 = vpack.i.b16 %v1361_v18, %v1361_v18 }
 0x2d9   : > { %v1353_v25 = vrot.slane %v1325_v61, %v3385_v27  ;;  %v1417_v40 = vpack.i.b16 %v1349_v39, %v1349_v39  ;;  %v1313_v9 = vunpack.i.h.s16 %v1249_v5  ;;  %v2930_v19 = vpack.i.b16 %v1249_v5, %v1249_v5  ;;  %v3674_v22 = vpop.permute.xlu1 %869 }
 0x2da   : > { %v1112_v46 = vpack.c.bf16 %v1104_v58, %v1104_v58  ;;  %v1098_v2 = vmul.f32 %v1090_v28, %v3661_v57  ;;  %v1436_v5 = vrot.slane %v1431_v20, %v3385_v27  ;;  %v3703_v35 = vrot.slane %v1438_v15, %v3385_v27 }
 0x2db   : > { %v1424_v36 = vpack.i.b16 %v1353_v25, %v1353_v25  ;;  %v1329_v37 = vpack.i.b16 %v1313_v9, %v1313_v9  ;;  %v1365_v16 = vrot.slane %v2930_v19, %v3385_v27  ;;  %v3678_v51 = vpop.permute.xlu0 %879  ;;  %v1422_v12 = vrot.slane %v1417_v40, %v3385_v27 }
 0x2dc   : > { %v1256_v61 = vrot.slane %v1112_v46, %v3552_v62  ;;  %v1106_v39 = vadd.f32 %v1098_v2, %v1010_v60  ;;  %v578_v19 = vrot.slane %v550_v0, %v3552_v62  ;;  %v1529_v2 = vshrl.u32 %v1436_v5, 16 }
 0x2dd   : > { %v1369_v53 = vrot.slane %v1329_v37, %v3385_v27  ;;  %v1445_v58 = vpack.i.b16 %v1365_v16, %v1365_v16  ;;  %v3684_v33 = vpop.permute.xlu1 %873  ;;  %v1516_v28 = vpack.i.b16 %v1422_v12, %v1408_v17  ;;  %v1518_v25 = vshrl.u32 %v1422_v12, 16 }
 0x2de   : > { %v1114_v9 = vpack.c.bf16 %v1106_v39, %v1106_v39  ;;  %v3691_v18 = vrot.slane %v1424_v36, %v3385_v27  ;;  %v3697_v16 = vrot.slane %v1410_v45, %v3385_v27  ;;  %v1263_v36 = vrot.slane %v1256_v61, %v3552_v62 }
 0x2df   : > { %v1452_v40 = vpack.i.b16 %v1369_v53, %v1369_v53  ;;  %v900_v60 = vpop.permute.xlu0 %899  ;;  %v1450_v20 = vrot.slane %v1445_v58, %v3385_v27  ;;  %v3694_v46 = vpack.i.b16 %v1518_v25, %v1517_v48  ;;  %v1009_v53 = vmul.f32 %v3646_v14, %v3484_v38 }
 0x2e0   : > { %v1284_v17 = vrot.slane %v1114_v9, %v3552_v62  ;;  %v924_v0 = vsel %vm923_vm1, %v3593_v3, %v900_v60  ;;  %v1522_v3 = vpack.i.b16 %v3691_v18, %v3697_v16  ;;  %v843_v9 = vmul.f32 %v3565_v10, %v3450_v23 }
 0x2e1   : > { %v3706_v37 = vpop.permute.xlu1 %877  ;;  %v1528_v12 = vpack.i.b16 %v1450_v20, %v1436_v5  ;;  %v1530_v39 = vshrl.u32 %v1450_v20, 16  ;;  %v1457_v48 = vrot.slane %v1452_v40, %v3385_v27  ;;  %v972_v45 = vmul.f32 %v3568_v11, %v924_v0 }
 0x2e2   : > { %v1291_v58 = vrot.slane %v1284_v17, %v3552_v62  ;;  %v845_v11 = vmul.f32 %v3575_v21, %v3465_v29  ;;  %v3725_v38 = vrot.slane %v578_v19, %v3385_v27  ;;  %v582_v40 = vcombine.high %v578_v19, %v578_v19 }
 0x2e3   : > { %v904_v15 = vpop.permute.xlu0 %903  ;;  %v3715_v25 = vcombine.low %v1516_v28, %v1528_v12  ;;  %v3717_v61 = vpack.i.b16 %v1530_v39, %v1529_v2  ;;  %v1534_v5 = vpack.i.b16 %v1457_v48, %v3703_v35  ;;  %v1315_v60 = vunpack.i.h.s16 %v1263_v36 }
 0x2e4   : > { %v847_v28 = vmul.f32 %v3632_v7, %v3473_v34  ;;  %v1011_v17 = vmul.f32 %v3688_v1, %v3492_v41  ;;  %v2931_v2 = vpack.i.b16 %v1263_v36, %v1263_v36  ;;  %v980_v23 = vadd.f32 %v972_v45, %v843_v9 }
 0x2e5   : > { %v1039_v20 = vpop.permute.xlu1 %1038  ;;  %v2009_v0 = vcombine.low %v3694_v46, %v3717_v61  ;;  %v926_v29 = vsel %vm923_vm1, %v3610_v30, %v904_v15  ;;  %v849_v10 = vmul.f32 %v3641_v13, %v3499_v43  ;;  %v1319_v21 = vunpack.i.h.s16 %v1291_v58 }
 0x2e6   : > { %v1089_v19 = vsel %vm923_vm1, %v1039_v20, %v3635_v6  ;;  %v3741_v34 = vmul.f32 %v3596_v4, %v3496_v42  ;;  %v3743_v41 = vcombine.low %v1522_v3, %v1534_v5  ;;  %v3747_v36 = vrot.slane %v582_v40, %v3385_v27 }
 0x2e7   : > { %v908_v12 = vpop.permute.xlu0 %907  ;;  %v1097_v7 = vmul.f32 %v1089_v19, %v3725_v38  ;;  %v1523_v30 = vshrl.u32 %v3697_v16, 16  ;;  %v1535_v43 = vshrl.u32 %v3703_v35, 16  ;;  %v1331_v13 = vpack.i.b16 %v1315_v60, %v1315_v60 }
 0x2e8   : > { %v2933_v39 = vpack.i.b16 %v1291_v58, %v1291_v58  ;;  %v974_v6 = vmul.f32 %v3578_v26, %v926_v29  ;;  %v928_v45 = vsel %vm923_vm1, %v3626_v54, %v908_v12  ;;  %v1373_v4 = vrot.slane %v2931_v2, %v3385_v27 }
 0x2e9   : > { %v1043_v42 = vpop.permute.xlu1 %1042  ;;  %v988_v3 = vmul.f32 0.17677669, %v980_v23  ;;  %v1105_v15 = vadd.f32 %v1097_v7, %v1009_v53  ;;  %v976_v5 = vmul.f32 %v3638_v8, %v928_v45  ;;  %v1335_v9 = vpack.i.b16 %v1319_v21, %v1319_v21 }
 0x2ea   : > { %v1091_v16 = vsel %vm923_vm1, %v1043_v42, %v3657_v49  ;;  %v1524_v35 = vshrl.u32 %v3691_v18, 16  ;;  %v1536_v58 = vshrl.u32 %v1457_v48, 16  ;;  %v1389_v2 = vrot.slane %v2933_v39, %v3385_v27 }
 0x2eb   : > { %v912_v40 = vpop.permute.xlu0 %911  ;;  %v1113_v60 = vpack.c.bf16 %v1105_v15, %v1105_v15  ;;  %v984_v26 = vadd.f32 %v976_v5, %v847_v28  ;;  %v1099_v20 = vmul.f32 %v1091_v16, %v3747_v36  ;;  %v982_v53 = vadd.f32 %v974_v6, %v845_v11 }
 0x2ec   : > { %v930_v54 = vsel %vm923_vm1, %v3678_v51, %v912_v40  ;;  %v3766_v29 = vpack.i.b16 %v1524_v35, %v1523_v30  ;;  %v3769_v21 = vpack.i.b16 %v1536_v58, %v1535_v43  ;;  %v1377_v28 = vrot.slane %v1331_v13, %v3385_v27 }
 0x2ed   : > { %v978_v8 = vmul.f32 %v3661_v57, %v930_v54  ;;  %v3764_v23 = vpop.permute.xlu1 %881  ;;  %v1270_v49 = vrot.slane %v1113_v60, %v3552_v62  ;;  %v992_v18 = vmul.f32 0.17677669, %v984_v26  ;;  %v1107_v48 = vadd.f32 %v1099_v20, %v1011_v17 }
 0x2ee   : > { %v1459_v19 = vpack.i.b16 %v1373_v4, %v1373_v4  ;;  %v1393_v51 = vrot.slane %v1335_v9, %v3385_v27  ;;  %v2149_v30 = vcombine.low %v3766_v29, %v3769_v21  ;;  %v1487_v39 = vpack.i.b16 %v1389_v2, %v1389_v2 }
 0x2ef   : > { %v986_v12 = vadd.f32 %v978_v8, %v849_v10  ;;  %v1277_v11 = vrot.slane %v1270_v49, %v3552_v62  ;;  %v2923_v7 = vpack.c.bf16 %v992_v18, %v988_v3  ;;  %v1115_v57 = vpack.c.bf16 %v1107_v48, %v1107_v48 }
 0x2f0   : > { %v990_v6 = vmul.f32 0.17677669, %v982_v53  ;;  %v846_v17 = vmul.f32 %v3613_v31, %v3508_v47  ;;  %v848_v10 = vmul.f32 %v3646_v14, %v3516_v50  ;;  %v1466_v15 = vpack.i.b16 %v1377_v28, %v1377_v28 }
 0x2f1   : > { %v994_v45 = vmul.f32 0.17677669, %v986_v12  ;;  %v902_v42 = vpop.permute.xlu1 %901  ;;  %v1317_v43 = vunpack.i.h.s16 %v1277_v11  ;;  %v2932_v13 = vpack.i.b16 %v1277_v11, %v1277_v11  ;;  %v1298_v4 = vrot.slane %v1115_v57, %v3552_v62 }
 0x2f2   : > { %v925_v5 = vsel %vm923_vm1, %v3674_v22, %v902_v42  ;;  %v1464_v9 = vrot.slane %v1459_v19, %v3385_v27  ;;  %v1494_v16 = vpack.i.b16 %v1393_v51, %v1393_v51  ;;  %v3787_v31 = vrot.slane %v2923_v7, %v3406_v52 }
 0x2f3   : > { %v2924_v3 = vpack.c.bf16 %v994_v45, %v990_v6  ;;  %v1333_v40 = vpack.i.b16 %v1317_v43, %v1317_v43  ;;  %v1381_v35 = vrot.slane %v2932_v13, %v3385_v27  ;;  %v1305_v47 = vrot.slane %v1298_v4, %v3552_v62 }
 0x2f4   : > { %v973_v50 = vmul.f32 %v3599_v63, %v925_v5  ;;  %v1492_v60 = vrot.slane %v1487_v39, %v3385_v27  ;;  %v850_v8 = vmul.f32 %v3688_v1, %v3532_v56  ;;  %v1471_v49 = vrot.slane %v1466_v15, %v3385_v27 }
 0x2f5   : > { %v3790_v58 = vrot.slane %v2924_v3, %v3406_v52  ;;  %v906_v14 = vpop.permute.xlu1 %905  ;;  %v1385_v22 = vrot.slane %v1333_v40, %v3385_v27  ;;  %v1473_v26 = vpack.i.b16 %v1381_v35, %v1381_v35  ;;  %v1321_v20 = vunpack.i.h.s16 %v1305_v47 }
 0x2f6   : > { %v2934_v54 = vpack.i.b16 %v1305_v47, %v1305_v47  ;;  %v927_v53 = vsel %vm923_vm1, %v3684_v33, %v906_v14  ;;  %v1499_v28 = vrot.slane %v1494_v16, %v3385_v27  ;;  %v981_v19 = vadd.f32 %v973_v50, %v3741_v34 }
 0x2f7   : > { %v1140_v2 = vcombine.low %v3787_v31, %v3790_v58  ;;  %v1480_v63 = vpack.i.b16 %v1385_v22, %v1385_v22  ;;  %v1337_v18 = vpack.i.b16 %v1321_v20, %v1321_v20  ;;  %v975_v51 = vmul.f32 %v3616_v32, %v927_v53 }
 0x2f8   : > { %v1397_v48 = vrot.slane %v2934_v54, %v3385_v27  ;;  %v1478_v11 = vrot.slane %v1473_v26, %v3385_v27  ;;  %v1541_v7 = vshrl.u32 %v1464_v9, 16  ;;  %v1553_v56 = vshrl.u32 %v1492_v60, 16 }
 0x2f9   : > { %v910_v12 = vpop.permute.xlu1 %909  ;;  %v1401_v33 = vrot.slane %v1337_v18, %v3385_v27  ;;  %v1547_v42 = vshrl.u32 %v1471_v49, 16  ;;  %v1485_v32 = vrot.slane %v1480_v63, %v3385_v27  ;;  %v1559_v13 = vshrl.u32 %v1499_v28, 16 }
 0x2fa   : > { %v1501_v57 = vpack.i.b16 %v1397_v48, %v1397_v48  ;;  %v929_v1 = vsel %vm923_vm1, %v3706_v37, %v910_v12  ;;  %v1540_v6 = vpack.i.b16 %v1478_v11, %v1464_v9  ;;  %v1542_v45 = vshrl.u32 %v1478_v11, 16 }
 0x2fb   : > { %v977_v39 = vmul.f32 %v3725_v38, %v929_v1  ;;  %v1508_v43 = vpack.i.b16 %v1401_v33, %v1401_v33  ;;  %v989_v4 = vmul.f32 0.17677669, %v981_v19  ;;  %v983_v15 = vadd.f32 %v975_v51, %v846_v17 }
 0x2fc   : > { %v1506_v34 = vrot.slane %v1501_v57, %v3385_v27  ;;  %v1543_v16 = vpack.i.b16 %v1542_v45, %v1541_v7  ;;  %v1546_v50 = vpack.i.b16 %v1485_v32, %v1471_v49  ;;  %v1548_v14 = vshrl.u32 %v1485_v32, 16 }
 0x2fd   : > { %v985_v3 = vadd.f32 %v977_v39, %v848_v10  ;;  %v914_v5 = vpop.permute.xlu1 %913  ;;  %v1513_v38 = vrot.slane %v1508_v43, %v3385_v27  ;;  %v1946_v53 = vrot.slane %v3715_v25, %v3552_v62  ;;  %v991_v19 = vmul.f32 0.17677669, %v983_v15 }
 0x2fe   : > { %v931_v37 = vsel %vm923_vm1, %v3764_v23, %v914_v5  ;;  %v1552_v40 = vpack.i.b16 %v1506_v34, %v1492_v60  ;;  %v1554_v35 = vshrl.u32 %v1506_v34, 16  ;;  %v1549_v63 = vpack.i.b16 %v1548_v14, %v1547_v42 }
 0x2ff   : > { %v993_v9 = vmul.f32 0.17677669, %v985_v3  ;;  %v979_v47 = vmul.f32 %v3747_v36, %v931_v37  ;;  %v1558_v20 = vpack.i.b16 %v1513_v38, %v1499_v28  ;;  %v1560_v54 = vshrl.u32 %v1513_v38, 16 }
 0x300   : > { %v1939_v22 = vcombine.low %v1540_v6, %v1552_v40  ;;  %v1555_v26 = vpack.i.b16 %v1554_v35, %v1553_v56  ;;  %v2017_v36 = vrot.slane %v2009_v0, %v3552_v62  ;;  %v2087_v49 = vrot.slane %v3743_v41, %v3552_v62 }
 0x301   : > { %v2925_v17 = vpack.c.bf16 %v993_v9, %v989_v4  ;;  %v987_v10 = vadd.f32 %v979_v47, %v850_v8  ;;  %v2080_v18 = vcombine.low %v1546_v50, %v1558_v20  ;;  %v1561_v48 = vpack.i.b16 %v1560_v54, %v1559_v13 }
 0x302   : > { %v1953_v23 = vrot.slane %v1939_v22, %v3552_v62  ;;  %v2010_v60 = vcombine.low %v1543_v16, %v1555_v26  ;;  %v2157_v7 = vrot.slane %v2149_v30, %v3552_v62  ;;  %v1147_v1 = vrot.slane %v1140_v2, %v3417_v59 }
 0x303   : > { %v995_v51 = vmul.f32 0.17677669, %v987_v10  ;;  %v2094_v25 = vrot.slane %v2080_v18, %v3552_v62  ;;  %v2150_v12 = vcombine.low %v1549_v63, %v1561_v48  ;;  %v1156_v41 = vrot.slane %v2925_v17, %v3406_v52 }
 0x304   : > { %v1954_v8 = vcombine.low %v1946_v53, %v1953_v23  ;;  %v2024_v28 = vrot.slane %v2010_v60, %v3552_v62  ;;  %v4055_v21 = vmov 0.0   ;;  %v4056_v6 = vmov 0  }
 0x305   : > { %v2926_v11 = vpack.c.bf16 %v995_v51, %v991_v19  ;;  %v2095_v61 = vcombine.low %v2087_v49, %v2094_v25  ;;  %v2164_v0 = vrot.slane %v2150_v12, %v3552_v62  ;;  %v1148_v45 = vcombine.high %v1147_v1, %v4056_v6 }
 0x306   : > { %v1961_v33 = vrot.slane %v1954_v8, %v3552_v62  ;;  %v2025_v46 = vcombine.low %v2017_v36, %v2024_v28  ;;  %v1177_v34 = vshrl.u32 %v1147_v1, 16  ;;  %v4057_v35 = vlaneseq }
 0x307   : > { %v1164_v57 = vrot.slane %v2926_v11, %v3406_v52  ;;  %v2165_v39 = vcombine.low %v2157_v7, %v2164_v0  ;;  %v1183_v2 = vshrl.u32 %v1148_v45, 16  ;;  %v2102_v5 = vrot.slane %v2095_v61, %v3552_v62 }
 0x308   : > { %v1967_v56 = vsel %vm1962_vm2, %v1961_v33, 0  ;;  %v2032_v42 = vrot.slane %v2025_v46, %v3552_v62  ;;  %v2222_v38 = vand.u32 127, %v4057_v35 }
 0x309   : > { %v1165_v29 = vcombine.low %v1156_v41, %v1164_v57  ;;  %2989 = vmatpush3.bf16.xpose.msra.mxu1 %v1967_v56  ;;  %v2107_v16 = vsel %vm1962_vm2, %v2102_v5, 0  ;;  %v2172_v37 = vrot.slane %v2165_v39, %v3552_v62 }
 0x30a   : > { %2994 = vmatprep.subr.bf16.mxu1 %v4055_v21  ;;  %v2037_v15 = vsel %vm1962_vm2, %v2032_v42, 0  ;;  %vm2223_vm3 = vcmp.le.s32.totalorder %v2222_v38, %v3379_v24 }
 0x30b   : > { %v1172_v30 = vrot.slane %v1165_v29, %v3417_v59  ;;  %v2177_v40 = vsel %vm1962_vm2, %v2172_v37, 0 }
 0x30d   : > { %v1176_v43 = vpack.i.b16 %v1172_v30, %v1147_v1  ;;  %v1178_v32 = vshrl.u32 %v1172_v30, 16  ;;  %v1173_v13 = vcombine.high %v1172_v30, %v4056_v6 }
 0x30f   : > { %v1179_v31 = vpack.i.b16 %v1178_v32, %v1177_v34  ;;  %v1182_v58 = vpack.i.b16 %v1173_v13, %v1148_v45  ;;  %v1184_v4 = vshrl.u32 %v1173_v13, 16 }
 0x310   : > { %2991 = vmatmul.mubr.msk.bf16.vlgmr.msra.gmra.mrb[0].mxu1 %vm1962_vm2, %v1176_v43 }
 0x311   : > { %2995 = vmatpush3.bf16.xpose.msra.mxu1 %v2037_v15  ;;  %2996 = vmatprep.mubr.msk.bf16.mxu1 %vm3239_vm0, %v4055_v21  ;;  %v1185_v3 = vpack.i.b16 %v1184_v4, %v1183_v2 }
 0x312   : > { %3000 = vmatprep.subr.bf16.mxu1 %v4055_v21 }
 0x318   : > { %2997 = vmatmul.mubr.msk.bf16.vlgmr.msra.gmra.mrb[4].mxu1 %vm1962_vm2, %v1179_v31 }
 0x319   : > { %3001 = vmatpush3.bf16.xpose.msra.mxu1 %v2107_v16  ;;  %3002 = vmatprep.mubr.msk.bf16.mxu1 %vm3239_vm0, %v4055_v21 }
 0x31a   : > { %3006 = vmatprep.subr.bf16.mxu1 %v4055_v21 }
 0x320   : > { %3003 = vmatmul.mubr.msk.bf16.vlgmr.msra.gmra.mrb[8].mxu1 %vm1962_vm2, %v1182_v58 }
 0x321   : > { %3007 = vmatpush3.bf16.xpose.msra.mxu1 %v2177_v40  ;;  %3008 = vmatprep.mubr.msk.bf16.mxu1 %vm3239_vm0, %v4055_v21 }
 0x322   : > { %3012 = vmatprep.subr.bf16.mxu1 %v4055_v21 }
 0x328   : > { %3009 = vmatmul.mubr.msk.bf16.vlgmr.msra.gmra.mrb[12].mxu1 %vm1962_vm2, %v1185_v3 }
 0x329   : > { %3014 = vmatprep.mubr.msk.bf16.mxu1 %vm3239_vm0, %v4055_v21 }
 0x3e3   : > { %v2003_v9 = vpop.f32.mrb[0].mxu1 }
 0x3e4   : > { %v2226_v47 = vsel %vm2223_vm3, %v2003_v9, -3.4028235e+38  ;;  %v2992_v50 = vpop.f32.mrb[1].mxu1 }
 0x3e5   : > { %v2006_v14 = vpop.f32.mrb[2].mxu1  ;;  %v2231_v22 = vsel %vm2230_vm4, %v2226_v47, -inf }
 0x3e6   : > { %2232 = vmax.xlane.f32.xlu0 %v2231_v22  ;;  %v2993_v26 = vpop.f32.mrb[3].mxu1 }
 0x3eb   : > { %v2073_v20 = vpop.f32.mrb[4].mxu1 }
 0x3ec   : > { %v2227_v54 = vsel %vm2223_vm3, %v2073_v20, -3.4028235e+38  ;;  %v2998_v17 = vpop.f32.mrb[5].mxu1 }
 0x3ed   : > { %v2076_v10 = vpop.f32.mrb[6].mxu1  ;;  %v2234_v53 = vsel %vm2230_vm4, %v2227_v54, -inf }
 0x3ee   : > { %2235 = vmax.xlane.f32.xlu1 %v2234_v53  ;;  %v2999_v63 = vpop.f32.mrb[7].mxu1 }
 0x3f3   : > { %v2143_v23 = vpop.f32.mrb[8].mxu1 }
 0x3f4   : > { %v2228_v60 = vsel %vm2223_vm3, %v2143_v23, -3.4028235e+38  ;;  %v3004_v18 = vpop.f32.mrb[9].mxu1 }
 0x3f5   : > { %v2146_v48 = vpop.f32.mrb[10].mxu1  ;;  %v2237_v19 = vsel %vm2230_vm4, %v2228_v60, -inf }
 0x3f6   : > { %2238 = vmax.xlane.f32.xlu0 %v2237_v19  ;;  %v3005_v51 = vpop.f32.mrb[11].mxu1 }
 0x3fb   : > { %v2213_v36 = vpop.f32.mrb[12].mxu1 }
 0x3fc   : > { %v2229_v49 = vsel %vm2223_vm3, %v2213_v36, -3.4028235e+38  ;;  %v3010_v8 = vpop.f32.mrb[13].mxu1 }
 0x3fd   : > { %v2216_v28 = vpop.f32.mrb[14].mxu1  ;;  %v2240_v25 = vsel %vm2230_vm4, %v2229_v49, -inf }
 0x3fe   : > { %2241 = vmax.xlane.f32.xlu0 %v2240_v25  ;;  %v3011_v12 = vpop.f32.mrb[15].mxu1 }
 0x3ff   : > { %731 = vrot.lane.b32.xlu1 %v3398_v44, %s3233_s21 }
 0x414   : > { %733 = vrot.lane.b32.xlu0 %v3408_v55, %s3233_s21 }
 0x473   : > { %v2233_v11 = vpop.xlane.xlu0 %2232 }
 0x474   : > { %v2243_v7 = vsub.f32 %v2226_v47, %v2233_v11 }
 0x476   : > { %v2247_v33 = vmul.f32 1.442695, %v2243_v7 }
 0x478   : > { %3136 = vpow2.f32 %v2247_v33 }
 0x47b   : > { %v2236_v46 = vpop.xlane.xlu1 %2235 }
 0x47c   : > { %v2244_v61 = vsub.f32 %v2227_v54, %v2236_v46 }
 0x47e   : > { %v2249_v24 = vmul.f32 1.442695, %v2244_v61 }
 0x47f   : > { %v732_v55 = vpop.permute.xlu1 %731 }
 0x480   : > { %3138 = vpow2.f32 %v2249_v24  ;;  %v737_v30 = vcombine.high %v732_v55, %v4055_v21  ;;  %v744_v42 = vrot.slane %v732_v55, %v3406_v52 }
 0x482   : > { %v3884_v0 = vpop.eup %3136  ;;  %v751_v13 = vrot.slane %v737_v30, %v3406_v52 }
 0x483   : > { %v2239_v41 = vpop.xlane.xlu0 %2238  ;;  %v2255_v57 = vsel %vm2230_vm4, %v3884_v0, 0.0 }
 0x484   : > { %v2245_v1 = vsub.f32 %v2228_v60, %v2239_v41  ;;  %2256 = vadd.xlane.f32.xlu1 %v2255_v57 }
 0x486   : > { %v2251_v44 = vmul.f32 1.442695, %v2245_v1 }
 0x488   : > { %3140 = vpow2.f32 %v2251_v44 }
 0x48a   : > { %v3888_v56 = vpop.eup %3138 }
 0x48b   : > { %v2242_v39 = vpop.xlane.xlu0 %2241  ;;  %v2258_v29 = vsel %vm2230_vm4, %v3888_v56, 0.0 }
 0x48c   : > { %2259 = vadd.xlane.f32.xlu0 %v2258_v29  ;;  %v2246_v6 = vsub.f32 %v2229_v49, %v2242_v39 }
 0x48e   : > { %v2253_v4 = vmul.f32 1.442695, %v2246_v6 }
 0x48f   : > { %v734_v45 = vpop.permute.xlu0 %733 }
 0x490   : > { %v752_v43 = vcombine.high %v734_v45, %v4055_v21  ;;  %v759_v34 = vrot.slane %v734_v45, %v3406_v52  ;;  %3142 = vpow2.f32 %v2253_v4 }
 0x492   : > { %v3896_v32 = vpop.eup %3140  ;;  %v766_v31 = vrot.slane %v752_v43, %v3406_v52  ;;  %v767_v58 = vcombine.low %v744_v42, %v759_v34  ;;  %v768_v2 = vcombine.high %v744_v42, %v759_v34 }
 0x493   : > { %v2261_v15 = vsel %vm2230_vm4, %v3896_v32, 0.0 }
 0x494   : > { %v775_v3 = vrot.slane %v767_v58, %v3417_v59  ;;  %v782_v5 = vrot.slane %v768_v2, %v3417_v59  ;;  %v783_v16 = vcombine.low %v751_v13, %v766_v31  ;;  %v784_v37 = vcombine.high %v751_v13, %v766_v31  ;;  %2262 = vadd.xlane.f32.xlu1 %v2261_v15 }
 0x496   : > { %v791_v40 = vrot.slane %v783_v16, %v3417_v59  ;;  %v798_v35 = vrot.slane %v784_v37, %v3417_v59  ;;  %v799_v38 = vcombine.high %v775_v3, %v4055_v21  ;;  %v800_v9 = vcombine.high %v782_v5, %v4055_v21 }
 0x497   : > { %v1116_v47 = vpack.c.bf16 %v775_v3, %v775_v3  ;;  %v1118_v50 = vpack.c.bf16 %v782_v5, %v782_v5 }
 0x498   : > { %v801_v14 = vcombine.high %v791_v40, %v4055_v21  ;;  %v802_v22 = vcombine.high %v798_v35, %v4055_v21  ;;  %v1117_v26 = vpack.c.bf16 %v799_v38, %v799_v38  ;;  %v1119_v20 = vpack.c.bf16 %v800_v9, %v800_v9 }
 0x499   : > { %v1120_v54 = vpack.c.bf16 %v791_v40, %v791_v40  ;;  %v1122_v17 = vpack.c.bf16 %v798_v35, %v798_v35  ;;  %v1576_v10 = vrot.slane %v1116_v47, %v3552_v62  ;;  %v1604_v53 = vrot.slane %v1118_v50, %v3552_v62 }
 0x49a   : > { %v1121_v63 = vpack.c.bf16 %v801_v14, %v801_v14  ;;  %v1123_v23 = vpack.c.bf16 %v802_v22, %v802_v22  ;;  %v1590_v60 = vrot.slane %v1117_v26, %v3552_v62  ;;  %v1618_v18 = vrot.slane %v1119_v20, %v3552_v62  ;;  %v3926_v45 = vpop.eup %3142 }
 0x49b   : > { %v1583_v48 = vrot.slane %v1576_v10, %v3552_v62  ;;  %v1611_v19 = vrot.slane %v1604_v53, %v3552_v62  ;;  %v1632_v51 = vrot.slane %v1120_v54, %v3552_v62  ;;  %v1660_v36 = vrot.slane %v1122_v17, %v3552_v62 }
 0x49c   : > { %v1597_v49 = vrot.slane %v1590_v60, %v3552_v62  ;;  %v1625_v8 = vrot.slane %v1618_v18, %v3552_v62  ;;  %v1646_v28 = vrot.slane %v1121_v63, %v3552_v62  ;;  %v1674_v25 = vrot.slane %v1123_v23, %v3552_v62 }
 0x49d   : > { %v1639_v12 = vrot.slane %v1632_v51, %v3552_v62  ;;  %v1667_v11 = vrot.slane %v1660_v36, %v3552_v62  ;;  %v1683_v7 = vunpack.i.h.s16 %v1583_v48  ;;  %v1687_v33 = vunpack.i.h.s16 %v1611_v19 }
 0x49e   : > { %v1653_v46 = vrot.slane %v1646_v28, %v3552_v62  ;;  %v1681_v61 = vrot.slane %v1674_v25, %v3552_v62  ;;  %v1685_v24 = vunpack.i.h.s16 %v1597_v49  ;;  %v1689_v41 = vunpack.i.h.s16 %v1625_v8 }
 0x49f   : > { %v1691_v57 = vunpack.i.h.s16 %v1639_v12  ;;  %v1695_v1 = vunpack.i.h.s16 %v1667_v11  ;;  %v2935_v44 = vpack.i.b16 %v1583_v48, %v1583_v48  ;;  %v1699_v55 = vpack.i.b16 %v1683_v7, %v1683_v7 }
 0x4a0   : > { %v1693_v39 = vunpack.i.h.s16 %v1653_v46  ;;  %v1697_v29 = vunpack.i.h.s16 %v1681_v61  ;;  %v2936_v30 = vpack.i.b16 %v1597_v49, %v1597_v49  ;;  %v1701_v6 = vpack.i.b16 %v1685_v24, %v1685_v24 }
 0x4a1   : > { %v2937_v42 = vpack.i.b16 %v1611_v19, %v1611_v19  ;;  %v1703_v43 = vpack.i.b16 %v1687_v33, %v1687_v33  ;;  %v2938_v34 = vpack.i.b16 %v1625_v8, %v1625_v8  ;;  %v1705_v13 = vpack.i.b16 %v1689_v41, %v1689_v41 }
 0x4a2   : > { %v2939_v31 = vpack.i.b16 %v1639_v12, %v1639_v12  ;;  %v1707_v58 = vpack.i.b16 %v1691_v57, %v1691_v57  ;;  %v2940_v2 = vpack.i.b16 %v1653_v46, %v1653_v46  ;;  %v1709_v4 = vpack.i.b16 %v1693_v39, %v1693_v39 }
 0x4a3   : > { %v2941_v15 = vpack.i.b16 %v1667_v11, %v1667_v11  ;;  %v1711_v3 = vpack.i.b16 %v1695_v1, %v1695_v1  ;;  %v2942_v5 = vpack.i.b16 %v1681_v61, %v1681_v61  ;;  %v1713_v16 = vpack.i.b16 %v1697_v29, %v1697_v29 }
 0x4a4   : > { %v1717_v37 = vrot.slane %v2935_v44, %v3385_v27  ;;  %v1721_v40 = vrot.slane %v1699_v55, %v3385_v27  ;;  %v1725_v35 = vrot.slane %v2936_v30, %v3385_v27  ;;  %v1729_v38 = vrot.slane %v1701_v6, %v3385_v27 }
 0x4a5   : > { %v1733_v9 = vrot.slane %v2937_v42, %v3385_v27  ;;  %v1737_v47 = vrot.slane %v1703_v43, %v3385_v27  ;;  %v1741_v50 = vrot.slane %v2938_v34, %v3385_v27  ;;  %v1745_v14 = vrot.slane %v1705_v13, %v3385_v27 }
 0x4a6   : > { %v1749_v22 = vrot.slane %v2939_v31, %v3385_v27  ;;  %v1765_v26 = vrot.slane %v2941_v15, %v3385_v27  ;;  %v1779_v20 = vpack.i.b16 %v1717_v37, %v1717_v37  ;;  %v1786_v54 = vpack.i.b16 %v1721_v40, %v1721_v40 }
 0x4a7   : > { %v1793_v17 = vpack.i.b16 %v1725_v35, %v1725_v35  ;;  %v1800_v10 = vpack.i.b16 %v1729_v38, %v1729_v38  ;;  %v1807_v53 = vpack.i.b16 %v1733_v9, %v1733_v9  ;;  %v1814_v63 = vpack.i.b16 %v1737_v47, %v1737_v47 }
 0x4a8   : > { %v1821_v23 = vpack.i.b16 %v1741_v50, %v1741_v50  ;;  %v1828_v60 = vpack.i.b16 %v1745_v14, %v1745_v14  ;;  %v2264_v18 = vsel %vm2230_vm4, %v3926_v45, 0.0  ;;  %v1757_v48 = vrot.slane %v2940_v2, %v3385_v27 }
 0x4a9   : > { %2265 = vadd.xlane.f32.xlu0 %v2264_v18  ;;  %v1773_v19 = vrot.slane %v2942_v5, %v3385_v27  ;;  %v1784_v51 = vrot.slane %v1779_v20, %v3385_v27  ;;  %v1798_v36 = vrot.slane %v1793_v17, %v3385_v27  ;;  %v1812_v49 = vrot.slane %v1807_v53, %v3385_v27 }
 0x4aa   : > { %v1826_v8 = vrot.slane %v1821_v23, %v3385_v27  ;;  %v1835_v28 = vpack.i.b16 %v1749_v22, %v1749_v22  ;;  %v1849_v25 = vpack.i.b16 %v1757_v48, %v1757_v48  ;;  %v1863_v12 = vpack.i.b16 %v1765_v26, %v1765_v26 }
 0x4ab   : > { %v1877_v11 = vpack.i.b16 %v1773_v19, %v1773_v19  ;;  %v1892_v7 = vpack.i.b16 %v1798_v36, %v1784_v51  ;;  %v1893_v33 = vshrl.u32 %v1784_v51, 16  ;;  %v1894_v46 = vshrl.u32 %v1798_v36, 16 }
 0x4ac   : > { %v1840_v61 = vrot.slane %v1835_v28, %v3385_v27  ;;  %v1854_v24 = vrot.slane %v1849_v25, %v3385_v27  ;;  %v1868_v41 = vrot.slane %v1863_v12, %v3385_v27  ;;  %v1904_v57 = vpack.i.b16 %v1826_v8, %v1812_v49 }
 0x4ad   : > { %v1882_v1 = vrot.slane %v1877_v11, %v3385_v27  ;;  %v1895_v44 = vpack.i.b16 %v1894_v46, %v1893_v33  ;;  %v1905_v55 = vshrl.u32 %v1812_v49, 16  ;;  %v1906_v39 = vshrl.u32 %v1826_v8, 16 }
 0x4ae   : > { %v1916_v29 = vpack.i.b16 %v1854_v24, %v1840_v61  ;;  %v2279_v30 = vcombine.low %v1892_v7, %v1904_v57  ;;  %v1917_v6 = vshrl.u32 %v1840_v61, 16  ;;  %v1918_v42 = vshrl.u32 %v1854_v24, 16 }
 0x4af   : > { %v1928_v43 = vpack.i.b16 %v1882_v1, %v1868_v41  ;;  %v1907_v34 = vpack.i.b16 %v1906_v39, %v1905_v55  ;;  %v1929_v13 = vshrl.u32 %v1868_v41, 16  ;;  %v1930_v31 = vshrl.u32 %v1882_v1, 16 }
 0x4b0   : > { %v2287_v2 = vrot.slane %v2279_v30, %v3552_v62  ;;  %v1919_v15 = vpack.i.b16 %v1918_v42, %v1917_v6  ;;  %v1753_v5 = vrot.slane %v1707_v58, %v3385_v27  ;;  %v1761_v37 = vrot.slane %v1709_v4, %v3385_v27 }
 0x4b1   : > { %v2280_v40 = vcombine.low %v1916_v29, %v1928_v43  ;;  %v1931_v35 = vpack.i.b16 %v1930_v31, %v1929_v13  ;;  %v2350_v38 = vcombine.low %v1895_v44, %v1907_v34  ;;  %v1769_v9 = vrot.slane %v1711_v3, %v3385_v27 }
 0x4b2   : > { %v1777_v47 = vrot.slane %v1713_v16, %v3385_v27  ;;  %v1791_v50 = vrot.slane %v1786_v54, %v3385_v27  ;;  %v1805_v14 = vrot.slane %v1800_v10, %v3385_v27  ;;  %v1819_v22 = vrot.slane %v1814_v63, %v3385_v27 }
 0x4b3   : > { %v2294_v26 = vrot.slane %v2280_v40, %v3552_v62  ;;  %v2351_v20 = vcombine.low %v1919_v15, %v1931_v35  ;;  %v2358_v58 = vrot.slane %v2350_v38, %v3552_v62  ;;  %v1833_v4 = vrot.slane %v1828_v60, %v3385_v27 }
 0x4b4   : > { %v1842_v17 = vpack.i.b16 %v1753_v5, %v1753_v5  ;;  %v1856_v53 = vpack.i.b16 %v1761_v37, %v1761_v37  ;;  %v1870_v23 = vpack.i.b16 %v1769_v9, %v1769_v9  ;;  %v1884_v18 = vpack.i.b16 %v1777_v47, %v1777_v47 }
 0x4b5   : > { %v2295_v3 = vcombine.low %v2287_v2, %v2294_v26  ;;  %v2365_v16 = vrot.slane %v2351_v20, %v3552_v62  ;;  %v1898_v48 = vpack.i.b16 %v1805_v14, %v1791_v50  ;;  %v1910_v54 = vpack.i.b16 %v1833_v4, %v1819_v22 }
 0x4b6   : > { %v1847_v10 = vrot.slane %v1842_v17, %v3385_v27  ;;  %v1861_v63 = vrot.slane %v1856_v53, %v3385_v27  ;;  %v1875_v19 = vrot.slane %v1870_v23, %v3385_v27  ;;  %v1889_v51 = vrot.slane %v1884_v18, %v3385_v27  ;;  %v3126_v23 = vld [vmem:[#allocation4] sm:$0xff]   ;;  %v3127_v18 = vld [vmem:[#allocation4 + $0x8] sm:$0xff]  }
 0x4b7   : > { %v2302_v36 = vrot.slane %v2295_v3, %v3552_v62  ;;  %v2366_v60 = vcombine.low %v2358_v58, %v2365_v16  ;;  %v2420_v49 = vcombine.low %v1898_v48, %v1910_v54  ;;  %v1899_v25 = vshrl.u32 %v1791_v50, 16  ;;  %3037 = vmatpush3.bf16.msra.mxu0 %v3126_v23  ;;  %v3129_v3 = vld [vmem:[#allocation4 + $0x18] sm:$0xff]   ;;  %v3130_v16 = vld [vmem:[#allocation4 + $0x20] sm:$0xff]  }
 0x4b8   : > { %v1922_v8 = vpack.i.b16 %v1861_v63, %v1847_v10  ;;  %v1934_v28 = vpack.i.b16 %v1889_v51, %v1875_v19  ;;  %v1900_v12 = vshrl.u32 %v1805_v14, 16  ;;  %v1911_v33 = vshrl.u32 %v1819_v22, 16  ;;  %3038 = vmatprep.subr.bf16.mxu0 %v4055_v21 }
 0x4b9   : > { %v2308_v11 = vsel %vm2306_vm5, %v2302_v36, 0  ;;  %v2373_v7 = vrot.slane %v2366_v60, %v3552_v62  ;;  %v1912_v46 = vshrl.u32 %v1833_v4, 16  ;;  %v1923_v41 = vshrl.u32 %v1847_v10, 16 }
 0x4ba   : > { %3013 = vmatpush3.bf16.msra.mxu1 %v2308_v11  ;;  %v2421_v61 = vcombine.low %v1922_v8, %v1934_v28  ;;  %v1901_v24 = vpack.i.b16 %v1900_v12, %v1899_v25  ;;  %v1924_v57 = vshrl.u32 %v1861_v63, 16  ;;  %v1935_v44 = vshrl.u32 %v1875_v19, 16 }
 0x4bb   : > { %3018 = vmatprep.subr.bf16.mxu1 %v4055_v21  ;;  %v2378_v27 = vsel %vm2306_vm5, %v2373_v7, 0  ;;  %v1913_v1 = vpack.i.b16 %v1912_v46, %v1911_v33  ;;  %v1936_v55 = vshrl.u32 %v1889_v51, 16  ;;  %v2428_v39 = vrot.slane %v2420_v49, %v3552_v62  ;;  %3039 = vmatpush3.bf16.msra.mxu0 %v3127_v18 }
 0x4bc   : > { %v2435_v29 = vrot.slane %v2421_v61, %v3552_v62  ;;  %v1925_v30 = vpack.i.b16 %v1924_v57, %v1923_v41  ;;  %3040 = vmatprep.subr.bf16.mxu0 %v4055_v21 }
 0x4bd   : > { %v1937_v6 = vpack.i.b16 %v1936_v55, %v1935_v44  ;;  %v2490_v42 = vcombine.low %v1901_v24, %v1913_v1 }
 0x4be   : > { %v2436_v43 = vcombine.low %v2428_v39, %v2435_v29 }
 0x4bf   : > { %v2491_v34 = vcombine.low %v1925_v30, %v1937_v6  ;;  %v2498_v31 = vrot.slane %v2490_v42, %v3552_v62  ;;  %v3132_v6 = vld [vmem:[#allocation4 + $0x30] sm:$0xff]  }
 0x4c0   : > { %v2443_v13 = vrot.slane %v2436_v43, %v3552_v62 }
 0x4c1   : > { %v2505_v2 = vrot.slane %v2491_v34, %v3552_v62 }
 0x4c2   : > { %v2448_v15 = vsel %vm2306_vm5, %v2443_v13, 0 }
 0x4c3   : > { %v2506_v5 = vcombine.low %v2498_v31, %v2505_v2 }
 0x4c5   : > { %v2513_v37 = vrot.slane %v2506_v5, %v3552_v62 }
 0x4c7   : > { %v2518_v40 = vsel %vm2306_vm5, %v2513_v37, 0 }
 0x511   : > { %v2257_v35 = vpop.xlane.xlu1 %2256 }
 0x512   : > { %3144 = vrcp.f32 %v2257_v35 }
 0x519   : > { %v2260_v38 = vpop.xlane.xlu0 %2259 }
 0x51a   : > { %3146 = vrcp.f32 %v2260_v38 }
 0x51c   : > { %v3145_v9 = vpop.eup %3144 }
 0x51d   : > { %v2271_v47 = vmul.f32 %v3145_v9, %v3884_v0  ;;  %v3133_v9 = vld [vmem:[#allocation4 + $0x38] sm:$0xff]  }
 0x51f   : > { %v2275_v50 = vpack.c.bf16 %v2271_v47, %v2271_v47 }
 0x521   : > { %v2263_v14 = vpop.xlane.xlu1 %2262  ;;  %3015 = vmatmul.mubr.msk.bf16.vlgmr.msra.gmra.mrb[16].mxu1 %vm2230_vm4, %v2275_v50 }
 0x522   : > { %3148 = vrcp.f32 %v2263_v14  ;;  %3019 = vmatpush3.bf16.msra.mxu1 %v2378_v27  ;;  %3020 = vmatprep.mubr.msk.bf16.mxu1 %vm3239_vm0, %v4055_v21 }
 0x523   : > { %3024 = vmatprep.subr.bf16.mxu1 %v4055_v21 }
 0x524   : > { %v3147_v62 = vpop.eup %3146 }
 0x525   : > { %v2272_v22 = vmul.f32 %v3147_v62, %v3888_v56 }
 0x527   : > { %v2276_v26 = vpack.c.bf16 %v2272_v22, %v2272_v22 }
 0x529   : > { %3021 = vmatmul.mubr.msk.bf16.vlgmr.msra.gmra.mrb[20].mxu1 %vm2230_vm4, %v2276_v26 }
 0x52a   : > { %3025 = vmatpush3.bf16.msra.mxu1 %v2448_v15  ;;  %3026 = vmatprep.mubr.msk.bf16.mxu1 %vm3239_vm0, %v4055_v21 }
 0x52b   : > { %3030 = vmatprep.subr.bf16.mxu1 %v4055_v21 }
 0x52c   : > { %v3149_v0 = vpop.eup %3148 }
 0x52d   : > { %v2273_v20 = vmul.f32 %v3149_v0, %v3896_v32  ;;  %v3128_v32 = vld [vmem:[#allocation4 + $0x10] sm:$0xff]  }
 0x52e   : > { %3041 = vmatpush3.bf16.msra.mxu0 %v3128_v32 }
 0x52f   : > { %v2277_v58 = vpack.c.bf16 %v2273_v20, %v2273_v20  ;;  %3042 = vmatprep.subr.bf16.mxu0 %v4055_v21 }
 0x531   : > { %3027 = vmatmul.mubr.msk.bf16.vlgmr.msra.gmra.mrb[24].mxu1 %vm2230_vm4, %v2277_v58 }
 0x532   : > { %3031 = vmatpush3.bf16.msra.mxu1 %v2518_v40  ;;  %3032 = vmatprep.mubr.msk.bf16.mxu1 %vm3239_vm0, %v4055_v21 }
 0x533   : > { %3043 = vmatpush3.bf16.msra.mxu0 %v3129_v3 }
 0x534   : > { %3044 = vmatprep.subr.bf16.mxu0 %v4055_v21 }
 0x536   : > { %v2266_v56 = vpop.xlane.xlu0 %2265 }
 0x537   : > { %3150 = vrcp.f32 %v2266_v56  ;;  %3045 = vmatpush3.bf16.msra.mxu0 %v3130_v16  ;;  %v4058_v16 = vld [vmem:[#allocation8_spill] sm:$0xff] }
 0x538   : > { %3046 = vmatprep.subr.bf16.mxu0 %v4055_v21 }
 0x541   : > { %v3151_v4 = vpop.eup %3150 }
 0x542   : > { %v2274_v17 = vmul.f32 %v3151_v4, %v3926_v45  ;;  %v3131_v45 = vld [vmem:[#allocation4 + $0x28] sm:$0xff]  }
 0x543   : > { %3047 = vmatpush3.bf16.msra.mxu0 %v3131_v45 }
 0x544   : > { %v2278_v53 = vpack.c.bf16 %v2274_v17, %v2274_v17  ;;  %3048 = vmatprep.subr.bf16.mxu0 %v4055_v21 }
 0x546   : > { %3033 = vmatmul.mubr.msk.bf16.vlgmr.msra.gmra.mrb[28].mxu1 %vm2230_vm4, %v2278_v53 }
 0x547   : > { %3049 = vmatpush3.bf16.msra.mxu0 %v3132_v6 }
 0x548   : > { %3050 = vmatprep.subr.bf16.mxu0 %v4055_v21 }
 0x54b   : > { %3051 = vmatpush3.bf16.msra.mxu0 %v3133_v9 }
 0x5f4   : > { %v2344_v48 = vpop.f32.mrb[16].mxu1 }
 0x5f5   : > { %v3016_v54 = vpop.f32.mrb[17].mxu1 }
 0x5f6   : > { %v2347_v10 = vpop.f32.mrb[18].mxu1 }
 0x5f7   : > { %v3017_v63 = vpop.f32.mrb[19].mxu1 }
 0x5fc   : > { %v2414_v19 = vpop.f32.mrb[20].mxu1 }
 0x5fd   : > { %v3022_v51 = vpop.f32.mrb[21].mxu1 }
 0x5fe   : > { %v2417_v36 = vpop.f32.mrb[22].mxu1 }
 0x5ff   : > { %v3023_v60 = vpop.f32.mrb[23].mxu1 }
 0x604   : > { %v2484_v49 = vpop.f32.mrb[24].mxu1 }
 0x605   : > { %v2560_v8 = vcombine.low %v2344_v48, %v2484_v49  ;;  %v2561_v28 = vcombine.high %v2344_v48, %v2484_v49  ;;  %v3028_v25 = vpop.f32.mrb[25].mxu1 }
 0x606   : > { %v2487_v12 = vpop.f32.mrb[26].mxu1 }
 0x607   : > { %v3029_v11 = vpop.f32.mrb[27].mxu1  ;;  %v2568_v41 = vrot.slane %v2560_v8, %v3406_v52  ;;  %v2575_v57 = vrot.slane %v2561_v28, %v3406_v52 }
 0x619   : > { %v2554_v7 = vpop.f32.mrb[28].mxu1 }
 0x61a   : > { %v2576_v33 = vcombine.low %v2414_v19, %v2554_v7  ;;  %v2577_v46 = vcombine.high %v2414_v19, %v2554_v7  ;;  %v3034_v61 = vpop.f32.mrb[29].mxu1 }
 0x61b   : > { %v2557_v24 = vpop.f32.mrb[30].mxu1 }
 0x61c   : > { %v2584_v27 = vrot.slane %v2576_v33, %v3406_v52  ;;  %v2591_v1 = vrot.slane %v2577_v46, %v3406_v52  ;;  %v3035_v44 = vpop.f32.mrb[31].mxu1 }
 0x61e   : > { %v2592_v55 = vcombine.low %v2568_v41, %v2584_v27  ;;  %v2593_v39 = vcombine.high %v2568_v41, %v2584_v27  ;;  %v2608_v29 = vcombine.low %v2575_v57, %v2591_v1  ;;  %v2609_v30 = vcombine.high %v2575_v57, %v2591_v1 }
 0x620   : > { %v2600_v42 = vrot.slane %v2592_v55, %v3417_v59  ;;  %v2607_v43 = vrot.slane %v2593_v39, %v3417_v59  ;;  %v2616_v34 = vrot.slane %v2608_v29, %v3417_v59  ;;  %v2623_v13 = vrot.slane %v2609_v30, %v3417_v59 }
 0x622   : > { %v2628_v31 = vcombine.low %v2600_v42, %v2607_v43  ;;  %v2951_v2 = vcombine.high %v2600_v42, %v2607_v43  ;;  %v2644_v15 = vcombine.low %v2616_v34, %v2623_v13  ;;  %v2952_v5 = vcombine.high %v2616_v34, %v2623_v13 }
 0x624   : > { %v2635_v37 = vrot.slane %v2628_v31, %v3406_v52  ;;  %v2643_v40 = vrot.slane %v2951_v2, %v3406_v52  ;;  %v2651_v35 = vrot.slane %v2644_v15, %v3406_v52  ;;  %v2659_v38 = vrot.slane %v2952_v5, %v3406_v52 }
 0x626   : > { %v2661_v47 = vcombine.high %v2635_v37, %v2643_v40  ;;  %v2677_v50 = vcombine.high %v2651_v35, %v2659_v38  ;;  %v2660_v14 = vcombine.low %v2635_v37, %v2643_v40  ;;  %v2676_v62 = vcombine.low %v2651_v35, %v2659_v38 }
 0x628   : > { %v2675_v22 = vrot.slane %v2661_v47, %v3417_v59  ;;  %v2691_v26 = vrot.slane %v2677_v50, %v3417_v59  ;;  %v2668_v21 = vrot.slane %v2660_v14, %v3417_v59  ;;  %v2684_v0 = vrot.slane %v2676_v62, %v3417_v59 }
 0x62a   : > { %v2694_v20 = vcombine.low %v2675_v22, %v2691_v26  ;;  %v2693_v58 = vcombine.high %v2668_v21, %v2684_v0  ;;  %v2695_v56 = vcombine.high %v2675_v22, %v2691_v26  ;;  %v2692_v4 = vcombine.low %v2668_v21, %v2684_v0 }
 0x62c   : > { %2701 = vrot.lane.b32.xlu0 %v2694_v20, %s3233_s21  ;;  %2697 = vrot.lane.b32.xlu1 %v2693_v58, %s3234_s22 }
 0x630   : > { %2705 = vrot.lane.b32.xlu1 %v2695_v56, %s3232_s20 }
 0x69e   : > { %v2698_v52 = vpop.permute.xlu1 %2697  ;;  %v2702_v17 = vpop.permute.xlu0 %2701 }
 0x69f   : > { %v2708_v53 = vsel %vm1962_vm2, %v2692_v4, %v2698_v52 }
 0x6a0   : > { %v2710_v18 = vsel %vm2709_vm6, %v2708_v53, %v2702_v17 }
 0x6a2   : > { %v2706_v23 = vpop.permute.xlu1 %2705 }
 0x6a3   : > { %v2712_v59 = vsel %vm2711_vm7, %v2710_v18, %v2706_v23 }
 0x6a4   : > { %v2713_v32 = vpack.c.bf16 %v2712_v59, %v2712_v59 }
 0x6a6   : > { %3053 = vmatmul.mubr.bf16.vlgmr.msra.gmra.mrb[4].mxu0 %v2713_v32 }
 0x779   : > { %v2812_v3 = vpop.f32.mrb[4].mxu0 }
 0x77a   : > { %v2818_v45 = vadd.f32 %v2812_v3, %v4058_v16  ;;  %v3054_v48 = vpop.f32.mrb[5].mxu0 }
 0x77b   : > { %v2815_v54 = vpop.f32.mrb[6].mxu0 }
 0x77c   : > { %v2819_v10 = vpack.c.bf16 %v2818_v45, %v2818_v45  ;;  %v3055_v63 = vpop.f32.mrb[7].mxu0 }
 0x77e   : > { %2820 = vst [vmem:[%s303_s13] sm:$0xf] %v2819_v10 }
 0x77f PF: > { %s19_s24 = sadd.s32 1, %s3222_s24  }
 0x780   : > { %p16_p5 = scmp.ge.s32.totalorder %s19_s24, 4  }
 0x782   :  { %18 = sbr.rel (!%p16_p5) target bundleno = 2 (0x2), region = 87 }
 0x789   :  { %2840 = vsyncpa [#allocation3], 1 }
 0x78a   :  { %2842 = vsyncpa [#allocation3 + $0x1], 1 }
 0x78b   :  { %2843 = vsyncpa [#allocation5], 1 }

</bundles_post_ra>
